<compile_context>
chip_gen: v7x
topology: tpu7x:2x2x1
jax: 0.10.0
libtpu: 0.0.40
codegen_flags: <defaults>
</compile_context>

<pallas_src>
import functools

import jax
import jax.numpy as jnp
from jax.experimental import pallas as pl
from jax.experimental.pallas import tpu as pltpu


# ---------------------------------------------------------------------------
# small math helpers (traced inside the kernel)
# ---------------------------------------------------------------------------
def _relu(v):
    return jnp.maximum(v, 0.0)


def _hsig(v):  # h_sigmoid: relu6(x + 3) / 6
    return jnp.minimum(jnp.maximum(v + 3.0, 0.0), 6.0) * (1.0 / 6.0)


# ---------------------------------------------------------------------------
# fused Pallas kernel (expand 1x1x1 -> dw 3x3x3 -> SE -> h_swish -> project 1x1x1 -> residual)
# ---------------------------------------------------------------------------
def _make_fused_kernel(B, D, H, W, c_in, c_hid, c_out, identity):
    WC = W * c_hid                   # merged lane width (= 128 for the toy config)
    N = B * D * H
    HPAD = 8                         # front pad on the H (sublane) axis -> tile-aligned store

    def kernel(x_ref, we_ref, be_ref, wtap_ref, bdw_ref,
               w1_ref, b1_ref, w2_ref, b2_ref, wp_ref, bp_ref,
               o_ref, ypad_ref):
        # ---- stage 1: 1x1x1 DBB expand as a block-diagonal MXU matmul (lane-dense output) ---
        xv = x_ref[...]                                                  # (N, W*c_in)
        y = jnp.dot(xv, we_ref[...], preferred_element_type=jnp.float32) + be_ref[...]
        y = _relu(y)                                                     # DBB nonlinear (ReLU)
        y = y * _hsig(y)                                                 # h_swish, (N, WC)

        # zero-padded activation kept in VMEM scratch: D padded 1|1 (major axis), H padded
        # HPAD|1 (sublane axis, aligned store); W padding handled by masks folded into taps.
        ypad_ref[...] = jnp.zeros(ypad_ref.shape, jnp.float32)
        ypad_ref[:, 1:1 + D, HPAD:HPAD + H, :] = y.reshape(B, D, H, WC)

        # ---- stage 2: depthwise 3x3x3 DBB, 27-tap MAC chain at full 128-lane density --------
        # kd/kh taps slice the major/sublane axes of the padded scratch; kw taps are lane rolls
        # by +/-c_hid with the W boundary mask pre-folded into the (H, WC) weight maps.
        acc = None
        for kd in range(3):
            for kh in range(3):
                slab = ypad_ref[:, kd:kd + D, HPAD - 1 + kh:HPAD - 1 + kh + H, :]  # (B,D,H,WC)
                for kw in range(3):
                    t = kd * 9 + kh * 3 + kw
                    if kw == 1:
                        r = slab
                    else:
                        r = pltpu.roll(slab, shift=((1 - kw) * c_hid) % WC, axis=3)
                    contrib = r * wtap_ref[t]
                    acc = contrib if acc is None else acc + contrib
        a = _relu(acc + bdw_ref[...])                                    # DBB nonlinear (ReLU)

        # ---- SELayer: avg-pool -> Linear -> ReLU -> Linear -> h_sigmoid -> scale ------------
        # Pool over D (major adds) and H (sublane reduce), then all-reduce the W blocks with a
        # lane-roll tree; mean scale and W replication are folded into w1 in the wrapper, so
        # the gate comes out of the second FC already replicated across W.
        s = jnp.sum(jnp.sum(a, axis=1), axis=1)                          # (B, WC)
        shift = c_hid
        while shift < WC:                                                # W assumed power of 2
            s = s + pltpu.roll(s, shift=shift, axis=1)
            shift *= 2
        hfc = _relu(jnp.dot(s, w1_ref[...], preferred_element_type=jnp.float32) + b1_ref[...])
        gate = _hsig(jnp.dot(hfc, w2_ref[...], preferred_element_type=jnp.float32)
                     + b2_ref[...])                                      # (B, WC)
        g = a * gate[:, None, None, :]                                   # vectorized gating
        y2 = g * _hsig(g)                                                # h_swish

        # ---- stage 3: 1x1x1 DBB projection (block-diagonal matmul) + ReLU (+ residual) ------
        p = jnp.dot(y2.reshape(N, WC), wp_ref[...],
                    preferred_element_type=jnp.float32) + bp_ref[...]
        out = _relu(p)                                                   # DBB nonlinear (ReLU)
        if identity:
            out = out + xv                                               # identity residual
        o_ref[...] = out

    return kernel


# ---------------------------------------------------------------------------
# wrapper: lays parameters out for the merged-lane kernel and calls pallas_call once
# ---------------------------------------------------------------------------
def inverted_residual_forward(x_ncdhw, params, identity=True):
    B, c_in, D, H, W = x_ncdhw.shape
    c_hid = params['w_expand'].shape[1]
    c_out = params['w_project'].shape[1]
    assert (W & (W - 1)) == 0, "TODO(synk): SE lane-roll reduction assumes W is a power of two"
    if identity:
        assert c_in == c_out
    N = B * D * H
    WC = W * c_hid
    HPAD = 8
    f32 = jnp.float32

    # NCDHW -> channels-last, lane-merged (w-major, channel-minor) flat layout (tiny glue).
    # TODO(synk): at scale, accept channels-last activations directly at the block boundary.
    x = jnp.transpose(x_ncdhw, (0, 2, 3, 4, 1)).astype(f32)
    x_flat = x.reshape(N, W * c_in)

    eye_w = jnp.eye(W, dtype=f32)
    we_big = jnp.kron(eye_w, params['w_expand'].astype(f32))       # (W*c_in, W*c_hid)
    be_lane = jnp.tile(params['b_expand'].astype(f32), (1, W))     # (1, W*c_hid)
    wp_big = jnp.kron(eye_w, params['w_project'].astype(f32))      # (W*c_hid, W*c_out)
    bp_lane = jnp.tile(params['b_project'].astype(f32), (1, W))    # (1, W*c_out)

    # depthwise taps expanded onto the merged lane axis, W zero-pad mask folded in
    k_taps = params['w_dw'][:, 0, :].astype(f32)                   # (27, c_hid)
    lane_taps = jnp.tile(k_taps, (1, W))                           # (27, W*c_hid)
    w_of_lane = (jnp.arange(WC) // c_hid)[None, :]
    kw_of_tap = (jnp.arange(27) % 3)[:, None]
    mask = jnp.where((kw_of_tap == 0) & (w_of_lane == 0), 0.0, 1.0)
    mask = mask * jnp.where((kw_of_tap == 2) & (w_of_lane == W - 1), 0.0, 1.0)
    w_taps = jnp.broadcast_to((lane_taps * mask)[:, None, :], (27, H, WC)).astype(f32)
    bdw_lane = jnp.tile(params['b_dw'].astype(f32), (1, W))        # (1, W*c_hid)

    # SE weights in lane-replicated form; fold the 1/(D*H*W) mean and 1/W replication into w1
    w1rep = jnp.tile(params['w_fc1'].astype(f32), (W, 1)) / float(W * D * H * W)  # (WC, S)
    b1 = params['b_fc1'].astype(f32)                                              # (1, S)
    w2rep = jnp.tile(params['w_fc2'].astype(f32), (1, W))                         # (S, WC)
    b2_lane = jnp.tile(params['b_fc2'].astype(f32), (1, W))                       # (1, WC)

    kernel = _make_fused_kernel(B, D, H, W, c_in, c_hid, c_out, identity)
    vmem = pl.BlockSpec(memory_space=pltpu.MemorySpace.VMEM)
    out_flat = pl.pallas_call(
        kernel,
        out_shape=jax.ShapeDtypeStruct((N, W * c_out), f32),
        in_specs=[vmem] * 11,
        out_specs=vmem,
        scratch_shapes=[pltpu.VMEM((B, D + 2, H + HPAD + 1, WC), f32)],
    )(x_flat, we_big, be_lane, w_taps, bdw_lane,
      w1rep, b1, w2rep, b2_lane, wp_big, bp_lane)

    out = out_flat.reshape(B, D, H, W, c_out)
    return jnp.transpose(out, (0, 4, 1, 2, 3))                     # back to NCDHW


# ---------------------------------------------------------------------------
# deterministic parameter construction + DBB fusion (glue, plain JAX)
# ---------------------------------------------------------------------------
def _make_divisible(v, divisor, min_value=None):
    if min_value is None:
        min_value = divisor
    new_v = max(min_value, int(v + divisor / 2) // divisor * divisor)
    if new_v < 0.9 * v:
        new_v += divisor
    return new_v


def _make_bn(key, c):
    k1, k2, k3, k4 = jax.random.split(key, 4)
    gamma = jax.random.uniform(k1, (c,), jnp.float32, 0.5, 1.5)
    beta = jax.random.normal(k2, (c,), jnp.float32) * 0.1
    mean = jax.random.normal(k3, (c,), jnp.float32) * 0.1
    var = jax.random.uniform(k4, (c,), jnp.float32, 0.5, 1.5)
    return gamma, beta, mean, var, 1e-5


def _fuse_bn(kernel, bn):                        # transI_fusebn
    gamma, beta, mean, var, eps = bn
    t = gamma / jnp.sqrt(var + eps)
    return kernel * t.reshape((-1,) + (1,) * (kernel.ndim - 1)), beta - mean * t


def make_fused_pointwise_dbb(key, cin, cout):
    """DiverseBranchBlock(k=1, stride=1, pad=0, groups=1) fused (eval) into one 1x1x1 conv."""
    ks = jax.random.split(key, 10)
    sw = 0.1
    w_o = jax.random.normal(ks[0], (cout, cin), jnp.float32) * sw      # dbb_origin.conv
    bn_o = _make_bn(ks[1], cout)
    w_1 = jax.random.normal(ks[2], (cout, cin), jnp.float32) * sw      # dbb_1x1.conv
    bn_1 = _make_bn(ks[3], cout)
    w_a = jax.random.normal(ks[4], (cout, cin), jnp.float32) * sw      # dbb_avg.conv
    bn_a1 = _make_bn(ks[5], cout)                                      # dbb_avg.bn
    bn_a2 = _make_bn(ks[6], cout)                                      # dbb_avg.avgbn
    w_id = jnp.eye(cin, dtype=jnp.float32)                             # IdentityBasedConv1x1
    bn_k1 = _make_bn(ks[7], cin)
    w_k2 = jax.random.normal(ks[8], (cout, cin), jnp.float32) * sw     # dbb_1x1_kxk.conv2
    bn_k2 = _make_bn(ks[9], cout)

    k_o, b_o = _fuse_bn(w_o, bn_o)
    k_1, b_1 = _fuse_bn(w_1, bn_1)
    k_f, b_f = _fuse_bn(w_id, bn_k1)
    k_s, b_s = _fuse_bn(w_k2, bn_k2)
    k_kxk = k_s @ k_f                                                  # transIII (groups=1)
    b_kxk = k_s @ b_f + b_s
    k_av2, b_av2 = _fuse_bn(jnp.eye(cout, dtype=jnp.float32), bn_a2)   # transV_avg(1) + avgbn
    k_av1, b_av1 = _fuse_bn(w_a, bn_a1)
    k_avg = k_av2 @ k_av1
    b_avg = k_av2 @ b_av1 + b_av2
    K = k_o + k_1 + k_kxk + k_avg                                      # transII
    b = b_o + b_1 + b_kxk + b_avg
    return K.T, b.reshape(1, cout)                                     # (cin, cout), (1, cout)


def make_fused_depthwise_dbb(key, c):
    """Depthwise DiverseBranchBlock(k=3, stride=1, pad=1, groups=c) fused into one dw conv."""
    ks = jax.random.split(key, 7)
    sw = 0.1
    w_o = jax.random.normal(ks[0], (c, 1, 3, 3, 3), jnp.float32) * sw       # dbb_origin.conv
    bn_o = _make_bn(ks[1], c)
    bn_avg = _make_bn(ks[2], c)                                              # dbb_avg.avgbn
    w_1 = jax.random.normal(ks[3], (2 * c, 1, 1, 1, 1), jnp.float32) * sw    # dbb_1x1_kxk.conv1
    bn_k1 = _make_bn(ks[4], 2 * c)
    w_2 = jax.random.normal(ks[5], (c, 2, 3, 3, 3), jnp.float32) * sw        # dbb_1x1_kxk.conv2
    bn_k2 = _make_bn(ks[6], c)

    k_o, b_o = _fuse_bn(w_o, bn_o)
    k_f, b_f = _fuse_bn(w_1, bn_k1)
    k_s, b_s = _fuse_bn(w_2, bn_k2)
    k1v = k_f.reshape(c, 2)
    b1v = b_f.reshape(c, 2)
    k_kxk = jnp.einsum('cmdhw,cm->cdhw', k_s, k1v)[:, None]                  # transIII (grouped)
    b_kxk = jnp.einsum('cmdhw,cm->c', k_s, b1v) + b_s
    g, bta, m, v, eps = bn_avg
    t = g / jnp.sqrt(v + eps)
    k_avg = (jnp.ones((c, 1, 3, 3, 3), jnp.float32) / 27.0) * t.reshape(c, 1, 1, 1, 1)
    b_avg = bta - m * t
    K = k_o + k_kxk + k_avg                                                  # transII
    b = b_o + b_kxk + b_avg
    w_taps = jnp.transpose(K[:, 0], (1, 2, 3, 0)).reshape(27, 1, c)          # (kd*9+kh*3+kw,1,c)
    return w_taps, b.reshape(1, c)


def make_se_params(key, c):
    se_dim = _make_divisible(c // 4, 8)
    k1, k2, k3, k4 = jax.random.split(key, 4)
    w1 = jax.random.normal(k1, (se_dim, c), jnp.float32) * 0.1               # Linear(c, se_dim)
    b1 = jax.random.normal(k2, (se_dim,), jnp.float32) * 0.1
    w2 = jax.random.normal(k3, (c, se_dim), jnp.float32) * 0.1               # Linear(se_dim, c)
    b2 = jax.random.normal(k4, (c,), jnp.float32) * 0.1
    return w1.T, b1.reshape(1, se_dim), w2.T, b2.reshape(1, c)


# ---------------------------------------------------------------------------
# pure-JAX reference (same fused params) used only to validate the Pallas kernel
# ---------------------------------------------------------------------------
def ref_forward(x_ncdhw, params, identity=True):
    hp = jax.lax.Precision.HIGHEST
    x = jnp.transpose(x_ncdhw, (0, 2, 3, 4, 1)).astype(jnp.float32)
    y = _relu(jnp.einsum('bdhwc,co->bdhwo', x, params['w_expand'], precision=hp)
              + params['b_expand'][0])
    y = y * _hsig(y)
    C = y.shape[-1]
    kdw = params['w_dw'].reshape(3, 3, 3, 1, C)
    y2 = jax.lax.conv_general_dilated(
        y, kdw, (1, 1, 1), [(1, 1)] * 3,
        dimension_numbers=('NDHWC', 'DHWIO', 'NDHWC'),
        feature_group_count=C, precision=hp)
    y2 = _relu(y2 + params['b_dw'][0])
    s = jnp.mean(y2, axis=(1, 2, 3))
    h = _relu(jnp.dot(s, params['w_fc1'], precision=hp) + params['b_fc1'][0])
    gate = _hsig(jnp.dot(h, params['w_fc2'], precision=hp) + params['b_fc2'][0])
    y2 = y2 * gate[:, None, None, None, :]
    y2 = y2 * _hsig(y2)
    out = _relu(jnp.einsum('bdhwc,co->bdhwo', y2, params['w_project'], precision=hp)
                + params['b_project'][0])
    if identity:
        out = out + x
    return jnp.transpose(out, (0, 4, 1, 2, 3))


# ---------------------------------------------------------------------------
if __name__ == "__main__":
    key = jax.random.PRNGKey(0)
    kx, k1, k2, k3, k4 = jax.random.split(key, 5)

    B, INP, HID, OUP = 2, 8, 16, 8          # inp, hidden_dim, oup
    D = H = W = 8                           # spatial (D, H, W); W * HID = 128 merged lanes

    x = jax.random.normal(kx, (B, INP, D, H, W), dtype=jnp.float32)   # NCDHW like PyTorch

    params = {}
    params['w_expand'], params['b_expand'] = make_fused_pointwise_dbb(k1, INP, HID)
    params['w_dw'], params['b_dw'] = make_fused_depthwise_dbb(k2, HID)
    (params['w_fc1'], params['b_fc1'],
     params['w_fc2'], params['b_fc2']) = make_se_params(k3, HID)
    params['w_project'], params['b_project'] = make_fused_pointwise_dbb(k4, HID, OUP)

    fwd = jax.jit(functools.partial(inverted_residual_forward, identity=True))
    out = jax.block_until_ready(fwd(x, params))

    ref = ref_forward(x, params, identity=True)
    assert out.shape == x.shape and out.dtype == jnp.float32
    err = float(jnp.max(jnp.abs(out - ref)))
    scale = max(1.0, float(jnp.max(jnp.abs(ref))))
    assert err <= 5e-3 * scale, f"mismatch vs reference: max abs err {err}"
    print("KERNEL_OK")
</pallas_src>

<mosaic_0001>
module attributes {stable_mosaic.version = 11 : i64} {
  func.func @kernel(%arg0: memref<128x64xf32, #tpu.memory_space<vmem>>, %arg1: memref<64x128xf32, #tpu.memory_space<vmem>>, %arg2: memref<1x128xf32, #tpu.memory_space<vmem>>, %arg3: memref<27x8x128xf32, #tpu.memory_space<vmem>>, %arg4: memref<1x128xf32, #tpu.memory_space<vmem>>, %arg5: memref<128x8xf32, #tpu.memory_space<vmem>>, %arg6: memref<1x8xf32, #tpu.memory_space<vmem>>, %arg7: memref<8x128xf32, #tpu.memory_space<vmem>>, %arg8: memref<1x128xf32, #tpu.memory_space<vmem>>, %arg9: memref<128x64xf32, #tpu.memory_space<vmem>>, %arg10: memref<1x64xf32, #tpu.memory_space<vmem>>, %arg11: memref<128x64xf32, #tpu.memory_space<vmem>>, %arg12: memref<2x10x17x128xf32, #tpu.memory_space<vmem>>) attributes {dimension_semantics = [], scalar_prefetch = 0 : i64, scratch_operands = 1 : i64, tpu.core_type = #tpu.core_type<tc>} {
    %c0 = arith.constant 0 : index
    %c0_0 = arith.constant 0 : index
    %0 = vector.load %arg0[%c0, %c0_0] : memref<128x64xf32, #tpu.memory_space<vmem>>, vector<128x64xf32>
    %c0_1 = arith.constant 0 : index
    %c0_2 = arith.constant 0 : index
    %1 = vector.load %arg1[%c0_1, %c0_2] : memref<64x128xf32, #tpu.memory_space<vmem>>, vector<64x128xf32>
    %cst = arith.constant dense<0.000000e+00> : vector<128x128xf32>
    %2 = tpu.matmul %0, %1, %cst {dimension_numbers = #tpu.dot_dimension_numbers<[1], [0], [0], [1], [0, 0, 1, 1], [], []>} : vector<128x64xf32>, vector<64x128xf32>, vector<128x128xf32> -> vector<128x128xf32>
    %c0_3 = arith.constant 0 : index
    %c0_4 = arith.constant 0 : index
    %3 = vector.load %arg2[%c0_3, %c0_4] : memref<1x128xf32, #tpu.memory_space<vmem>>, vector<1x128xf32>
    %4 = vector.broadcast %3 : vector<1x128xf32> to vector<128x128xf32>
    %5 = arith.addf %2, %4 : vector<128x128xf32>
    %cst_5 = arith.constant 0.000000e+00 : f32
    %6 = vector.broadcast %cst_5 : f32 to vector<128x128xf32>
    %7 = arith.maximumf %5, %6 : vector<128x128xf32>
    %cst_6 = arith.constant 3.000000e+00 : f32
    %8 = vector.broadcast %cst_6 : f32 to vector<128x128xf32>
    %9 = arith.addf %7, %8 : vector<128x128xf32>
    %cst_7 = arith.constant 0.000000e+00 : f32
    %10 = vector.broadcast %cst_7 : f32 to vector<128x128xf32>
    %11 = arith.maximumf %9, %10 : vector<128x128xf32>
    %cst_8 = arith.constant 6.000000e+00 : f32
    %12 = vector.broadcast %cst_8 : f32 to vector<128x128xf32>
    %13 = arith.minimumf %11, %12 : vector<128x128xf32>
    %cst_9 = arith.constant 0.166666672 : f32
    %14 = vector.broadcast %cst_9 : f32 to vector<128x128xf32>
    %15 = arith.mulf %13, %14 : vector<128x128xf32>
    %16 = arith.mulf %7, %15 : vector<128x128xf32>
    %cst_10 = arith.constant 0.000000e+00 : f32
    %17 = vector.broadcast %cst_10 : f32 to vector<2x10x17x128xf32>
    %c0_11 = arith.constant 0 : index
    %c0_12 = arith.constant 0 : index
    %c0_13 = arith.constant 0 : index
    %c0_14 = arith.constant 0 : index
    %18 = vector.load %arg12[%c0_11, %c0_12, %c0_13, %c0_14] : memref<2x10x17x128xf32, #tpu.memory_space<vmem>>, vector<2x10x17x128xf32>
    tpu.vector_store %arg12[%c0_11, %c0_12, %c0_13, %c0_14], %17 {strides = array<i32>} : memref<2x10x17x128xf32, #tpu.memory_space<vmem>>, vector<2x10x17x128xf32>,
    %19 = vector.shape_cast %16 : vector<128x128xf32> to vector<2x8x8x128xf32>
    %c0_15 = arith.constant 0 : index
    %c1 = arith.constant 1 : index
    %c8 = arith.constant 8 : index
    %c0_16 = arith.constant 0 : index
    %20 = vector.load %arg12[%c0_15, %c1, %c8, %c0_16] : memref<2x10x17x128xf32, #tpu.memory_space<vmem>>, vector<2x8x8x128xf32>
    tpu.vector_store %arg12[%c0_15, %c1, %c8, %c0_16], %19 {strides = array<i32>} : memref<2x10x17x128xf32, #tpu.memory_space<vmem>>, vector<2x8x8x128xf32>,
    %c0_17 = arith.constant 0 : index
    %c0_18 = arith.constant 0 : index
    %c7 = arith.constant 7 : index
    %c0_19 = arith.constant 0 : index
    %21 = vector.load %arg12[%c0_17, %c0_18, %c7, %c0_19] : memref<2x10x17x128xf32, #tpu.memory_space<vmem>>, vector<2x8x8x128xf32>
    %c16_i32 = arith.constant 16 : i32
    %22 = tpu.dynamic_rotate %21 by %c16_i32 dim 3 : vector<2x8x8x128xf32>, i32 -> vector<2x8x8x128xf32>
    %c0_20 = arith.constant 0 : index
    %c0_21 = arith.constant 0 : index
    %c0_22 = arith.constant 0 : index
    %23 = vector.load %arg3[%c0_20, %c0_21, %c0_22] : memref<27x8x128xf32, #tpu.memory_space<vmem>>, vector<1x8x128xf32>
    %24 = vector.shape_cast %23 : vector<1x8x128xf32> to vector<8x128xf32>
    %25 = vector.shape_cast %24 : vector<8x128xf32> to vector<1x1x8x128xf32>
    %26 = vector.broadcast %25 : vector<1x1x8x128xf32> to vector<2x8x8x128xf32>
    %27 = arith.mulf %22, %26 : vector<2x8x8x128xf32>
    %c1_23 = arith.constant 1 : index
    %c0_24 = arith.constant 0 : index
    %c0_25 = arith.constant 0 : index
    %28 = vector.load %arg3[%c1_23, %c0_24, %c0_25] : memref<27x8x128xf32, #tpu.memory_space<vmem>>, vector<1x8x128xf32>
    %29 = vector.shape_cast %28 : vector<1x8x128xf32> to vector<8x128xf32>
    %30 = vector.shape_cast %29 : vector<8x128xf32> to vector<1x1x8x128xf32>
    %31 = vector.broadcast %30 : vector<1x1x8x128xf32> to vector<2x8x8x128xf32>
    %32 = arith.mulf %21, %31 : vector<2x8x8x128xf32>
    %33 = arith.addf %27, %32 : vector<2x8x8x128xf32>
    %c112_i32 = arith.constant 112 : i32
    %34 = tpu.dynamic_rotate %21 by %c112_i32 dim 3 : vector<2x8x8x128xf32>, i32 -> vector<2x8x8x128xf32>
    %c2 = arith.constant 2 : index
    %c0_26 = arith.constant 0 : index
    %c0_27 = arith.constant 0 : index
    %35 = vector.load %arg3[%c2, %c0_26, %c0_27] : memref<27x8x128xf32, #tpu.memory_space<vmem>>, vector<1x8x128xf32>
    %36 = vector.shape_cast %35 : vector<1x8x128xf32> to vector<8x128xf32>
    %37 = vector.shape_cast %36 : vector<8x128xf32> to vector<1x1x8x128xf32>
    %38 = vector.broadcast %37 : vector<1x1x8x128xf32> to vector<2x8x8x128xf32>
    %39 = arith.mulf %34, %38 : vector<2x8x8x128xf32>
    %40 = arith.addf %33, %39 : vector<2x8x8x128xf32>
    %c0_28 = arith.constant 0 : index
    %c0_29 = arith.constant 0 : index
    %c8_30 = arith.constant 8 : index
    %c0_31 = arith.constant 0 : index
    %41 = vector.load %arg12[%c0_28, %c0_29, %c8_30, %c0_31] : memref<2x10x17x128xf32, #tpu.memory_space<vmem>>, vector<2x8x8x128xf32>
    %c16_i32_32 = arith.constant 16 : i32
    %42 = tpu.dynamic_rotate %41 by %c16_i32_32 dim 3 : vector<2x8x8x128xf32>, i32 -> vector<2x8x8x128xf32>
    %c3 = arith.constant 3 : index
    %c0_33 = arith.constant 0 : index
    %c0_34 = arith.constant 0 : index
    %43 = vector.load %arg3[%c3, %c0_33, %c0_34] : memref<27x8x128xf32, #tpu.memory_space<vmem>>, vector<1x8x128xf32>
    %44 = vector.shape_cast %43 : vector<1x8x128xf32> to vector<8x128xf32>
    %45 = vector.shape_cast %44 : vector<8x128xf32> to vector<1x1x8x128xf32>
    %46 = vector.broadcast %45 : vector<1x1x8x128xf32> to vector<2x8x8x128xf32>
    %47 = arith.mulf %42, %46 : vector<2x8x8x128xf32>
    %48 = arith.addf %40, %47 : vector<2x8x8x128xf32>
    %c4 = arith.constant 4 : index
    %c0_35 = arith.constant 0 : index
    %c0_36 = arith.constant 0 : index
    %49 = vector.load %arg3[%c4, %c0_35, %c0_36] : memref<27x8x128xf32, #tpu.memory_space<vmem>>, vector<1x8x128xf32>
    %50 = vector.shape_cast %49 : vector<1x8x128xf32> to vector<8x128xf32>
    %51 = vector.shape_cast %50 : vector<8x128xf32> to vector<1x1x8x128xf32>
    %52 = vector.broadcast %51 : vector<1x1x8x128xf32> to vector<2x8x8x128xf32>
    %53 = arith.mulf %41, %52 : vector<2x8x8x128xf32>
    %54 = arith.addf %48, %53 : vector<2x8x8x128xf32>
    %c112_i32_37 = arith.constant 112 : i32
    %55 = tpu.dynamic_rotate %41 by %c112_i32_37 dim 3 : vector<2x8x8x128xf32>, i32 -> vector<2x8x8x128xf32>
    %c5 = arith.constant 5 : index
    %c0_38 = arith.constant 0 : index
    %c0_39 = arith.constant 0 : index
    %56 = vector.load %arg3[%c5, %c0_38, %c0_39] : memref<27x8x128xf32, #tpu.memory_space<vmem>>, vector<1x8x128xf32>
    %57 = vector.shape_cast %56 : vector<1x8x128xf32> to vector<8x128xf32>
    %58 = vector.shape_cast %57 : vector<8x128xf32> to vector<1x1x8x128xf32>
    %59 = vector.broadcast %58 : vector<1x1x8x128xf32> to vector<2x8x8x128xf32>
    %60 = arith.mulf %55, %59 : vector<2x8x8x128xf32>
    %61 = arith.addf %54, %60 : vector<2x8x8x128xf32>
    %c0_40 = arith.constant 0 : index
    %c0_41 = arith.constant 0 : index
    %c9 = arith.constant 9 : index
    %c0_42 = arith.constant 0 : index
    %62 = vector.load %arg12[%c0_40, %c0_41, %c9, %c0_42] : memref<2x10x17x128xf32, #tpu.memory_space<vmem>>, vector<2x8x8x128xf32>
    %c16_i32_43 = arith.constant 16 : i32
    %63 = tpu.dynamic_rotate %62 by %c16_i32_43 dim 3 : vector<2x8x8x128xf32>, i32 -> vector<2x8x8x128xf32>
    %c6 = arith.constant 6 : index
    %c0_44 = arith.constant 0 : index
    %c0_45 = arith.constant 0 : index
    %64 = vector.load %arg3[%c6, %c0_44, %c0_45] : memref<27x8x128xf32, #tpu.memory_space<vmem>>, vector<1x8x128xf32>
    %65 = vector.shape_cast %64 : vector<1x8x128xf32> to vector<8x128xf32>
    %66 = vector.shape_cast %65 : vector<8x128xf32> to vector<1x1x8x128xf32>
    %67 = vector.broadcast %66 : vector<1x1x8x128xf32> to vector<2x8x8x128xf32>
    %68 = arith.mulf %63, %67 : vector<2x8x8x128xf32>
    %69 = arith.addf %61, %68 : vector<2x8x8x128xf32>
    %c7_46 = arith.constant 7 : index
    %c0_47 = arith.constant 0 : index
    %c0_48 = arith.constant 0 : index
    %70 = vector.load %arg3[%c7_46, %c0_47, %c0_48] : memref<27x8x128xf32, #tpu.memory_space<vmem>>, vector<1x8x128xf32>
    %71 = vector.shape_cast %70 : vector<1x8x128xf32> to vector<8x128xf32>
    %72 = vector.shape_cast %71 : vector<8x128xf32> to vector<1x1x8x128xf32>
    %73 = vector.broadcast %72 : vector<1x1x8x128xf32> to vector<2x8x8x128xf32>
    %74 = arith.mulf %62, %73 : vector<2x8x8x128xf32>
    %75 = arith.addf %69, %74 : vector<2x8x8x128xf32>
    %c112_i32_49 = arith.constant 112 : i32
    %76 = tpu.dynamic_rotate %62 by %c112_i32_49 dim 3 : vector<2x8x8x128xf32>, i32 -> vector<2x8x8x128xf32>
    %c8_50 = arith.constant 8 : index
    %c0_51 = arith.constant 0 : index
    %c0_52 = arith.constant 0 : index
    %77 = vector.load %arg3[%c8_50, %c0_51, %c0_52] : memref<27x8x128xf32, #tpu.memory_space<vmem>>, vector<1x8x128xf32>
    %78 = vector.shape_cast %77 : vector<1x8x128xf32> to vector<8x128xf32>
    %79 = vector.shape_cast %78 : vector<8x128xf32> to vector<1x1x8x128xf32>
    %80 = vector.broadcast %79 : vector<1x1x8x128xf32> to vector<2x8x8x128xf32>
    %81 = arith.mulf %76, %80 : vector<2x8x8x128xf32>
    %82 = arith.addf %75, %81 : vector<2x8x8x128xf32>
    %c0_53 = arith.constant 0 : index
    %c1_54 = arith.constant 1 : index
    %c7_55 = arith.constant 7 : index
    %c0_56 = arith.constant 0 : index
    %83 = vector.load %arg12[%c0_53, %c1_54, %c7_55, %c0_56] : memref<2x10x17x128xf32, #tpu.memory_space<vmem>>, vector<2x8x8x128xf32>
    %c16_i32_57 = arith.constant 16 : i32
    %84 = tpu.dynamic_rotate %83 by %c16_i32_57 dim 3 : vector<2x8x8x128xf32>, i32 -> vector<2x8x8x128xf32>
    %c9_58 = arith.constant 9 : index
    %c0_59 = arith.constant 0 : index
    %c0_60 = arith.constant 0 : index
    %85 = vector.load %arg3[%c9_58, %c0_59, %c0_60] : memref<27x8x128xf32, #tpu.memory_space<vmem>>, vector<1x8x128xf32>
    %86 = vector.shape_cast %85 : vector<1x8x128xf32> to vector<8x128xf32>
    %87 = vector.shape_cast %86 : vector<8x128xf32> to vector<1x1x8x128xf32>
    %88 = vector.broadcast %87 : vector<1x1x8x128xf32> to vector<2x8x8x128xf32>
    %89 = arith.mulf %84, %88 : vector<2x8x8x128xf32>
    %90 = arith.addf %82, %89 : vector<2x8x8x128xf32>
    %c10 = arith.constant 10 : index
    %c0_61 = arith.constant 0 : index
    %c0_62 = arith.constant 0 : index
    %91 = vector.load %arg3[%c10, %c0_61, %c0_62] : memref<27x8x128xf32, #tpu.memory_space<vmem>>, vector<1x8x128xf32>
    %92 = vector.shape_cast %91 : vector<1x8x128xf32> to vector<8x128xf32>
    %93 = vector.shape_cast %92 : vector<8x128xf32> to vector<1x1x8x128xf32>
    %94 = vector.broadcast %93 : vector<1x1x8x128xf32> to vector<2x8x8x128xf32>
    %95 = arith.mulf %83, %94 : vector<2x8x8x128xf32>
    %96 = arith.addf %90, %95 : vector<2x8x8x128xf32>
    %c112_i32_63 = arith.constant 112 : i32
    %97 = tpu.dynamic_rotate %83 by %c112_i32_63 dim 3 : vector<2x8x8x128xf32>, i32 -> vector<2x8x8x128xf32>
    %c11 = arith.constant 11 : index
    %c0_64 = arith.constant 0 : index
    %c0_65 = arith.constant 0 : index
    %98 = vector.load %arg3[%c11, %c0_64, %c0_65] : memref<27x8x128xf32, #tpu.memory_space<vmem>>, vector<1x8x128xf32>
    %99 = vector.shape_cast %98 : vector<1x8x128xf32> to vector<8x128xf32>
    %100 = vector.shape_cast %99 : vector<8x128xf32> to vector<1x1x8x128xf32>
    %101 = vector.broadcast %100 : vector<1x1x8x128xf32> to vector<2x8x8x128xf32>
    %102 = arith.mulf %97, %101 : vector<2x8x8x128xf32>
    %103 = arith.addf %96, %102 : vector<2x8x8x128xf32>
    %c0_66 = arith.constant 0 : index
    %c1_67 = arith.constant 1 : index
    %c8_68 = arith.constant 8 : index
    %c0_69 = arith.constant 0 : index
    %104 = vector.load %arg12[%c0_66, %c1_67, %c8_68, %c0_69] : memref<2x10x17x128xf32, #tpu.memory_space<vmem>>, vector<2x8x8x128xf32>
    %c16_i32_70 = arith.constant 16 : i32
    %105 = tpu.dynamic_rotate %104 by %c16_i32_70 dim 3 : vector<2x8x8x128xf32>, i32 -> vector<2x8x8x128xf32>
    %c12 = arith.constant 12 : index
    %c0_71 = arith.constant 0 : index
    %c0_72 = arith.constant 0 : index
    %106 = vector.load %arg3[%c12, %c0_71, %c0_72] : memref<27x8x128xf32, #tpu.memory_space<vmem>>, vector<1x8x128xf32>
    %107 = vector.shape_cast %106 : vector<1x8x128xf32> to vector<8x128xf32>
    %108 = vector.shape_cast %107 : vector<8x128xf32> to vector<1x1x8x128xf32>
    %109 = vector.broadcast %108 : vector<1x1x8x128xf32> to vector<2x8x8x128xf32>
    %110 = arith.mulf %105, %109 : vector<2x8x8x128xf32>
    %111 = arith.addf %103, %110 : vector<2x8x8x128xf32>
    %c13 = arith.constant 13 : index
    %c0_73 = arith.constant 0 : index
    %c0_74 = arith.constant 0 : index
    %112 = vector.load %arg3[%c13, %c0_73, %c0_74] : memref<27x8x128xf32, #tpu.memory_space<vmem>>, vector<1x8x128xf32>
    %113 = vector.shape_cast %112 : vector<1x8x128xf32> to vector<8x128xf32>
    %114 = vector.shape_cast %113 : vector<8x128xf32> to vector<1x1x8x128xf32>
    %115 = vector.broadcast %114 : vector<1x1x8x128xf32> to vector<2x8x8x128xf32>
    %116 = arith.mulf %104, %115 : vector<2x8x8x128xf32>
    %117 = arith.addf %111, %116 : vector<2x8x8x128xf32>
    %c112_i32_75 = arith.constant 112 : i32
    %118 = tpu.dynamic_rotate %104 by %c112_i32_75 dim 3 : vector<2x8x8x128xf32>, i32 -> vector<2x8x8x128xf32>
    %c14 = arith.constant 14 : index
    %c0_76 = arith.constant 0 : index
    %c0_77 = arith.constant 0 : index
    %119 = vector.load %arg3[%c14, %c0_76, %c0_77] : memref<27x8x128xf32, #tpu.memory_space<vmem>>, vector<1x8x128xf32>
    %120 = vector.shape_cast %119 : vector<1x8x128xf32> to vector<8x128xf32>
    %121 = vector.shape_cast %120 : vector<8x128xf32> to vector<1x1x8x128xf32>
    %122 = vector.broadcast %121 : vector<1x1x8x128xf32> to vector<2x8x8x128xf32>
    %123 = arith.mulf %118, %122 : vector<2x8x8x128xf32>
    %124 = arith.addf %117, %123 : vector<2x8x8x128xf32>
    %c0_78 = arith.constant 0 : index
    %c1_79 = arith.constant 1 : index
    %c9_80 = arith.constant 9 : index
    %c0_81 = arith.constant 0 : index
    %125 = vector.load %arg12[%c0_78, %c1_79, %c9_80, %c0_81] : memref<2x10x17x128xf32, #tpu.memory_space<vmem>>, vector<2x8x8x128xf32>
    %c16_i32_82 = arith.constant 16 : i32
    %126 = tpu.dynamic_rotate %125 by %c16_i32_82 dim 3 : vector<2x8x8x128xf32>, i32 -> vector<2x8x8x128xf32>
    %c15 = arith.constant 15 : index
    %c0_83 = arith.constant 0 : index
    %c0_84 = arith.constant 0 : index
    %127 = vector.load %arg3[%c15, %c0_83, %c0_84] : memref<27x8x128xf32, #tpu.memory_space<vmem>>, vector<1x8x128xf32>
    %128 = vector.shape_cast %127 : vector<1x8x128xf32> to vector<8x128xf32>
    %129 = vector.shape_cast %128 : vector<8x128xf32> to vector<1x1x8x128xf32>
    %130 = vector.broadcast %129 : vector<1x1x8x128xf32> to vector<2x8x8x128xf32>
    %131 = arith.mulf %126, %130 : vector<2x8x8x128xf32>
    %132 = arith.addf %124, %131 : vector<2x8x8x128xf32>
    %c16 = arith.constant 16 : index
    %c0_85 = arith.constant 0 : index
    %c0_86 = arith.constant 0 : index
    %133 = vector.load %arg3[%c16, %c0_85, %c0_86] : memref<27x8x128xf32, #tpu.memory_space<vmem>>, vector<1x8x128xf32>
    %134 = vector.shape_cast %133 : vector<1x8x128xf32> to vector<8x128xf32>
    %135 = vector.shape_cast %134 : vector<8x128xf32> to vector<1x1x8x128xf32>
    %136 = vector.broadcast %135 : vector<1x1x8x128xf32> to vector<2x8x8x128xf32>
    %137 = arith.mulf %125, %136 : vector<2x8x8x128xf32>
    %138 = arith.addf %132, %137 : vector<2x8x8x128xf32>
    %c112_i32_87 = arith.constant 112 : i32
    %139 = tpu.dynamic_rotate %125 by %c112_i32_87 dim 3 : vector<2x8x8x128xf32>, i32 -> vector<2x8x8x128xf32>
    %c17 = arith.constant 17 : index
    %c0_88 = arith.constant 0 : index
    %c0_89 = arith.constant 0 : index
    %140 = vector.load %arg3[%c17, %c0_88, %c0_89] : memref<27x8x128xf32, #tpu.memory_space<vmem>>, vector<1x8x128xf32>
    %141 = vector.shape_cast %140 : vector<1x8x128xf32> to vector<8x128xf32>
    %142 = vector.shape_cast %141 : vector<8x128xf32> to vector<1x1x8x128xf32>
    %143 = vector.broadcast %142 : vector<1x1x8x128xf32> to vector<2x8x8x128xf32>
    %144 = arith.mulf %139, %143 : vector<2x8x8x128xf32>
    %145 = arith.addf %138, %144 : vector<2x8x8x128xf32>
    %c0_90 = arith.constant 0 : index
    %c2_91 = arith.constant 2 : index
    %c7_92 = arith.constant 7 : index
    %c0_93 = arith.constant 0 : index
    %146 = vector.load %arg12[%c0_90, %c2_91, %c7_92, %c0_93] : memref<2x10x17x128xf32, #tpu.memory_space<vmem>>, vector<2x8x8x128xf32>
    %c16_i32_94 = arith.constant 16 : i32
    %147 = tpu.dynamic_rotate %146 by %c16_i32_94 dim 3 : vector<2x8x8x128xf32>, i32 -> vector<2x8x8x128xf32>
    %c18 = arith.constant 18 : index
    %c0_95 = arith.constant 0 : index
    %c0_96 = arith.constant 0 : index
    %148 = vector.load %arg3[%c18, %c0_95, %c0_96] : memref<27x8x128xf32, #tpu.memory_space<vmem>>, vector<1x8x128xf32>
    %149 = vector.shape_cast %148 : vector<1x8x128xf32> to vector<8x128xf32>
    %150 = vector.shape_cast %149 : vector<8x128xf32> to vector<1x1x8x128xf32>
    %151 = vector.broadcast %150 : vector<1x1x8x128xf32> to vector<2x8x8x128xf32>
    %152 = arith.mulf %147, %151 : vector<2x8x8x128xf32>
    %153 = arith.addf %145, %152 : vector<2x8x8x128xf32>
    %c19 = arith.constant 19 : index
    %c0_97 = arith.constant 0 : index
    %c0_98 = arith.constant 0 : index
    %154 = vector.load %arg3[%c19, %c0_97, %c0_98] : memref<27x8x128xf32, #tpu.memory_space<vmem>>, vector<1x8x128xf32>
    %155 = vector.shape_cast %154 : vector<1x8x128xf32> to vector<8x128xf32>
    %156 = vector.shape_cast %155 : vector<8x128xf32> to vector<1x1x8x128xf32>
    %157 = vector.broadcast %156 : vector<1x1x8x128xf32> to vector<2x8x8x128xf32>
    %158 = arith.mulf %146, %157 : vector<2x8x8x128xf32>
    %159 = arith.addf %153, %158 : vector<2x8x8x128xf32>
    %c112_i32_99 = arith.constant 112 : i32
    %160 = tpu.dynamic_rotate %146 by %c112_i32_99 dim 3 : vector<2x8x8x128xf32>, i32 -> vector<2x8x8x128xf32>
    %c20 = arith.constant 20 : index
    %c0_100 = arith.constant 0 : index
    %c0_101 = arith.constant 0 : index
    %161 = vector.load %arg3[%c20, %c0_100, %c0_101] : memref<27x8x128xf32, #tpu.memory_space<vmem>>, vector<1x8x128xf32>
    %162 = vector.shape_cast %161 : vector<1x8x128xf32> to vector<8x128xf32>
    %163 = vector.shape_cast %162 : vector<8x128xf32> to vector<1x1x8x128xf32>
    %164 = vector.broadcast %163 : vector<1x1x8x128xf32> to vector<2x8x8x128xf32>
    %165 = arith.mulf %160, %164 : vector<2x8x8x128xf32>
    %166 = arith.addf %159, %165 : vector<2x8x8x128xf32>
    %c0_102 = arith.constant 0 : index
    %c2_103 = arith.constant 2 : index
    %c8_104 = arith.constant 8 : index
    %c0_105 = arith.constant 0 : index
    %167 = vector.load %arg12[%c0_102, %c2_103, %c8_104, %c0_105] : memref<2x10x17x128xf32, #tpu.memory_space<vmem>>, vector<2x8x8x128xf32>
    %c16_i32_106 = arith.constant 16 : i32
    %168 = tpu.dynamic_rotate %167 by %c16_i32_106 dim 3 : vector<2x8x8x128xf32>, i32 -> vector<2x8x8x128xf32>
    %c21 = arith.constant 21 : index
    %c0_107 = arith.constant 0 : index
    %c0_108 = arith.constant 0 : index
    %169 = vector.load %arg3[%c21, %c0_107, %c0_108] : memref<27x8x128xf32, #tpu.memory_space<vmem>>, vector<1x8x128xf32>
    %170 = vector.shape_cast %169 : vector<1x8x128xf32> to vector<8x128xf32>
    %171 = vector.shape_cast %170 : vector<8x128xf32> to vector<1x1x8x128xf32>
    %172 = vector.broadcast %171 : vector<1x1x8x128xf32> to vector<2x8x8x128xf32>
    %173 = arith.mulf %168, %172 : vector<2x8x8x128xf32>
    %174 = arith.addf %166, %173 : vector<2x8x8x128xf32>
    %c22 = arith.constant 22 : index
    %c0_109 = arith.constant 0 : index
    %c0_110 = arith.constant 0 : index
    %175 = vector.load %arg3[%c22, %c0_109, %c0_110] : memref<27x8x128xf32, #tpu.memory_space<vmem>>, vector<1x8x128xf32>
    %176 = vector.shape_cast %175 : vector<1x8x128xf32> to vector<8x128xf32>
    %177 = vector.shape_cast %176 : vector<8x128xf32> to vector<1x1x8x128xf32>
    %178 = vector.broadcast %177 : vector<1x1x8x128xf32> to vector<2x8x8x128xf32>
    %179 = arith.mulf %167, %178 : vector<2x8x8x128xf32>
    %180 = arith.addf %174, %179 : vector<2x8x8x128xf32>
    %c112_i32_111 = arith.constant 112 : i32
    %181 = tpu.dynamic_rotate %167 by %c112_i32_111 dim 3 : vector<2x8x8x128xf32>, i32 -> vector<2x8x8x128xf32>
    %c23 = arith.constant 23 : index
    %c0_112 = arith.constant 0 : index
    %c0_113 = arith.constant 0 : index
    %182 = vector.load %arg3[%c23, %c0_112, %c0_113] : memref<27x8x128xf32, #tpu.memory_space<vmem>>, vector<1x8x128xf32>
    %183 = vector.shape_cast %182 : vector<1x8x128xf32> to vector<8x128xf32>
    %184 = vector.shape_cast %183 : vector<8x128xf32> to vector<1x1x8x128xf32>
    %185 = vector.broadcast %184 : vector<1x1x8x128xf32> to vector<2x8x8x128xf32>
    %186 = arith.mulf %181, %185 : vector<2x8x8x128xf32>
    %187 = arith.addf %180, %186 : vector<2x8x8x128xf32>
    %c0_114 = arith.constant 0 : index
    %c2_115 = arith.constant 2 : index
    %c9_116 = arith.constant 9 : index
    %c0_117 = arith.constant 0 : index
    %188 = vector.load %arg12[%c0_114, %c2_115, %c9_116, %c0_117] : memref<2x10x17x128xf32, #tpu.memory_space<vmem>>, vector<2x8x8x128xf32>
    %c16_i32_118 = arith.constant 16 : i32
    %189 = tpu.dynamic_rotate %188 by %c16_i32_118 dim 3 : vector<2x8x8x128xf32>, i32 -> vector<2x8x8x128xf32>
    %c24 = arith.constant 24 : index
    %c0_119 = arith.constant 0 : index
    %c0_120 = arith.constant 0 : index
    %190 = vector.load %arg3[%c24, %c0_119, %c0_120] : memref<27x8x128xf32, #tpu.memory_space<vmem>>, vector<1x8x128xf32>
    %191 = vector.shape_cast %190 : vector<1x8x128xf32> to vector<8x128xf32>
    %192 = vector.shape_cast %191 : vector<8x128xf32> to vector<1x1x8x128xf32>
    %193 = vector.broadcast %192 : vector<1x1x8x128xf32> to vector<2x8x8x128xf32>
    %194 = arith.mulf %189, %193 : vector<2x8x8x128xf32>
    %195 = arith.addf %187, %194 : vector<2x8x8x128xf32>
    %c25 = arith.constant 25 : index
    %c0_121 = arith.constant 0 : index
    %c0_122 = arith.constant 0 : index
    %196 = vector.load %arg3[%c25, %c0_121, %c0_122] : memref<27x8x128xf32, #tpu.memory_space<vmem>>, vector<1x8x128xf32>
    %197 = vector.shape_cast %196 : vector<1x8x128xf32> to vector<8x128xf32>
    %198 = vector.shape_cast %197 : vector<8x128xf32> to vector<1x1x8x128xf32>
    %199 = vector.broadcast %198 : vector<1x1x8x128xf32> to vector<2x8x8x128xf32>
    %200 = arith.mulf %188, %199 : vector<2x8x8x128xf32>
    %201 = arith.addf %195, %200 : vector<2x8x8x128xf32>
    %c112_i32_123 = arith.constant 112 : i32
    %202 = tpu.dynamic_rotate %188 by %c112_i32_123 dim 3 : vector<2x8x8x128xf32>, i32 -> vector<2x8x8x128xf32>
    %c26 = arith.constant 26 : index
    %c0_124 = arith.constant 0 : index
    %c0_125 = arith.constant 0 : index
    %203 = vector.load %arg3[%c26, %c0_124, %c0_125] : memref<27x8x128xf32, #tpu.memory_space<vmem>>, vector<1x8x128xf32>
    %204 = vector.shape_cast %203 : vector<1x8x128xf32> to vector<8x128xf32>
    %205 = vector.shape_cast %204 : vector<8x128xf32> to vector<1x1x8x128xf32>
    %206 = vector.broadcast %205 : vector<1x1x8x128xf32> to vector<2x8x8x128xf32>
    %207 = arith.mulf %202, %206 : vector<2x8x8x128xf32>
    %208 = arith.addf %201, %207 : vector<2x8x8x128xf32>
    %c0_126 = arith.constant 0 : index
    %c0_127 = arith.constant 0 : index
    %209 = vector.load %arg4[%c0_126, %c0_127] : memref<1x128xf32, #tpu.memory_space<vmem>>, vector<1x128xf32>
    %210 = vector.shape_cast %209 : vector<1x128xf32> to vector<1x1x1x128xf32>
    %211 = vector.broadcast %210 : vector<1x1x1x128xf32> to vector<2x8x8x128xf32>
    %212 = arith.addf %208, %211 : vector<2x8x8x128xf32>
    %cst_128 = arith.constant 0.000000e+00 : f32
    %213 = vector.broadcast %cst_128 : f32 to vector<2x8x8x128xf32>
    %214 = arith.maximumf %212, %213 : vector<2x8x8x128xf32>
    %cst_129 = arith.constant dense<0.000000e+00> : vector<2x8x128xf32>
    %215 = vector.multi_reduction <add>, %214, %cst_129 [1] : vector<2x8x8x128xf32> to vector<2x8x128xf32>
    %cst_130 = arith.constant dense<0.000000e+00> : vector<2x128xf32>
    %216 = vector.multi_reduction <add>, %215, %cst_130 [1] : vector<2x8x128xf32> to vector<2x128xf32>
    %c16_i32_131 = arith.constant 16 : i32
    %217 = tpu.dynamic_rotate %216 by %c16_i32_131 dim 1 : vector<2x128xf32>, i32 -> vector<2x128xf32>
    %218 = arith.addf %216, %217 : vector<2x128xf32>
    %c32_i32 = arith.constant 32 : i32
    %219 = tpu.dynamic_rotate %218 by %c32_i32 dim 1 : vector<2x128xf32>, i32 -> vector<2x128xf32>
    %220 = arith.addf %218, %219 : vector<2x128xf32>
    %c64_i32 = arith.constant 64 : i32
    %221 = tpu.dynamic_rotate %220 by %c64_i32 dim 1 : vector<2x128xf32>, i32 -> vector<2x128xf32>
    %222 = arith.addf %220, %221 : vector<2x128xf32>
    %c0_132 = arith.constant 0 : index
    %c0_133 = arith.constant 0 : index
    %223 = vector.load %arg5[%c0_132, %c0_133] : memref<128x8xf32, #tpu.memory_space<vmem>>, vector<128x8xf32>
    %cst_134 = arith.constant dense<0.000000e+00> : vector<2x8xf32>
    %224 = tpu.matmul %222, %223, %cst_134 {dimension_numbers = #tpu.dot_dimension_numbers<[1], [0], [0], [1], [0, 0, 1, 1], [], []>} : vector<2x128xf32>, vector<128x8xf32>, vector<2x8xf32> -> vector<2x8xf32>
    %c0_135 = arith.constant 0 : index
    %c0_136 = arith.constant 0 : index
    %225 = vector.load %arg6[%c0_135, %c0_136] : memref<1x8xf32, #tpu.memory_space<vmem>>, vector<1x8xf32>
    %226 = vector.broadcast %225 : vector<1x8xf32> to vector<2x8xf32>
    %227 = arith.addf %224, %226 : vector<2x8xf32>
    %cst_137 = arith.constant 0.000000e+00 : f32
    %228 = vector.broadcast %cst_137 : f32 to vector<2x8xf32>
    %229 = arith.maximumf %227, %228 : vector<2x8xf32>
    %c0_138 = arith.constant 0 : index
    %c0_139 = arith.constant 0 : index
    %230 = vector.load %arg7[%c0_138, %c0_139] : memref<8x128xf32, #tpu.memory_space<vmem>>, vector<8x128xf32>
    %cst_140 = arith.constant dense<0.000000e+00> : vector<2x128xf32>
    %231 = tpu.matmul %229, %230, %cst_140 {dimension_numbers = #tpu.dot_dimension_numbers<[1], [0], [0], [1], [0, 0, 1, 1], [], []>} : vector<2x8xf32>, vector<8x128xf32>, vector<2x128xf32> -> vector<2x128xf32>
    %c0_141 = arith.constant 0 : index
    %c0_142 = arith.constant 0 : index
    %232 = vector.load %arg8[%c0_141, %c0_142] : memref<1x128xf32, #tpu.memory_space<vmem>>, vector<1x128xf32>
    %233 = vector.broadcast %232 : vector<1x128xf32> to vector<2x128xf32>
    %234 = arith.addf %231, %233 : vector<2x128xf32>
    %cst_143 = arith.constant 3.000000e+00 : f32
    %235 = vector.broadcast %cst_143 : f32 to vector<2x128xf32>
    %236 = arith.addf %234, %235 : vector<2x128xf32>
    %cst_144 = arith.constant 0.000000e+00 : f32
    %237 = vector.broadcast %cst_144 : f32 to vector<2x128xf32>
    %238 = arith.maximumf %236, %237 : vector<2x128xf32>
    %cst_145 = arith.constant 6.000000e+00 : f32
    %239 = vector.broadcast %cst_145 : f32 to vector<2x128xf32>
    %240 = arith.minimumf %238, %239 : vector<2x128xf32>
    %cst_146 = arith.constant 0.166666672 : f32
    %241 = vector.broadcast %cst_146 : f32 to vector<2x128xf32>
    %242 = arith.mulf %240, %241 : vector<2x128xf32>
    %243 = vector.shape_cast %242 : vector<2x128xf32> to vector<2x1x1x128xf32>
    %244 = vector.broadcast %243 : vector<2x1x1x128xf32> to vector<2x8x8x128xf32>
    %245 = arith.mulf %214, %244 : vector<2x8x8x128xf32>
    %cst_147 = arith.constant 3.000000e+00 : f32
    %246 = vector.broadcast %cst_147 : f32 to vector<2x8x8x128xf32>
    %247 = arith.addf %245, %246 : vector<2x8x8x128xf32>
    %cst_148 = arith.constant 0.000000e+00 : f32
    %248 = vector.broadcast %cst_148 : f32 to vector<2x8x8x128xf32>
    %249 = arith.maximumf %247, %248 : vector<2x8x8x128xf32>
    %cst_149 = arith.constant 6.000000e+00 : f32
    %250 = vector.broadcast %cst_149 : f32 to vector<2x8x8x128xf32>
    %251 = arith.minimumf %249, %250 : vector<2x8x8x128xf32>
    %cst_150 = arith.constant 0.166666672 : f32
    %252 = vector.broadcast %cst_150 : f32 to vector<2x8x8x128xf32>
    %253 = arith.mulf %251, %252 : vector<2x8x8x128xf32>
    %254 = arith.mulf %245, %253 : vector<2x8x8x128xf32>
    %255 = vector.shape_cast %254 : vector<2x8x8x128xf32> to vector<128x128xf32>
    %c0_151 = arith.constant 0 : index
    %c0_152 = arith.constant 0 : index
    %256 = vector.load %arg9[%c0_151, %c0_152] : memref<128x64xf32, #tpu.memory_space<vmem>>, vector<128x64xf32>
    %cst_153 = arith.constant dense<0.000000e+00> : vector<128x64xf32>
    %257 = tpu.matmul %255, %256, %cst_153 {dimension_numbers = #tpu.dot_dimension_numbers<[1], [0], [0], [1], [0, 0, 1, 1], [], []>} : vector<128x128xf32>, vector<128x64xf32>, vector<128x64xf32> -> vector<128x64xf32>
    %c0_154 = arith.constant 0 : index
    %c0_155 = arith.constant 0 : index
    %258 = vector.load %arg10[%c0_154, %c0_155] : memref<1x64xf32, #tpu.memory_space<vmem>>, vector<1x64xf32>
    %259 = vector.broadcast %258 : vector<1x64xf32> to vector<128x64xf32>
    %260 = arith.addf %257, %259 : vector<128x64xf32>
    %cst_156 = arith.constant 0.000000e+00 : f32
    %261 = vector.broadcast %cst_156 : f32 to vector<128x64xf32>
    %262 = arith.maximumf %260, %261 : vector<128x64xf32>
    %263 = arith.addf %262, %0 : vector<128x64xf32>
    %c0_157 = arith.constant 0 : index
    %c0_158 = arith.constant 0 : index
    %264 = vector.load %arg11[%c0_157, %c0_158] : memref<128x64xf32, #tpu.memory_space<vmem>>, vector<128x64xf32>
    tpu.vector_store %arg11[%c0_157, %c0_158], %263 {strides = array<i32>} : memref<128x64xf32, #tpu.memory_space<vmem>>, vector<128x64xf32>,
    return
  }
}

</mosaic_0001>

<bundles_post_ra>
// kernel: tile.62
= control target key start
LH: loop header
LB: loop body
LE: loop exit
PB: predicated region body
PF: predicated region fallthrough
CT: control target
= control target key end

     0   :  { %vm4_vm0 = vcmask 1047556   ;;  %s99_s14 = smov 112   ;;  %s100_s19 = smov 80   ;;  %vm6_vm1 = vcmask 130048   ;;  %vm16_vm2 = vcmask 1048448   ;;  %vm26_vm3 = vcmask 917248   ;;  %s196_s0 = inlined_call_operand.vmem [shape: f32[8,8,16], index: 0, kind: input, shape index: {}]   ;;  %s197_s1 = inlined_call_operand.vmem [shape: f32[8,128], index: 1, kind: output, shape index: {}]  }
   0x1   :  { %v78_v0 = vld [vmem:[%s196_s0 + $0x7] ss:$8 sm:$0xf]   ;;  %v82_v3 = vld [vmem:[%s196_s0 + $0x5] ss:$8 sm:$0xf]  }
   0x2   :  { %v79_v1 = vld [vmem:[%s196_s0 + $0x7] ss:$8 sm:$0xf0]   ;;  %v83_v4 = vld [vmem:[%s196_s0 + $0x5] ss:$8 sm:$0xf0]  }
   0x3   :  { %v13_v2 = vsel %vm4_vm0, %v79_v1, %v78_v0  ;;  %v33_v5 = vsel %vm4_vm0, %v83_v4, %v82_v3  ;;  %v80_v6 = vld [vmem:[%s196_s0 + $0x6] ss:$8 sm:$0xf]   ;;  %v84_v9 = vld [vmem:[%s196_s0 + $0x4] ss:$8 sm:$0xf]  }
   0x4   :  { %14 = vrot.lane.b32.xlu0 %v13_v2, %s99_s14  ;;  %v81_v7 = vld [vmem:[%s196_s0 + $0x6] ss:$8 sm:$0xf0]   ;;  %34 = vrot.lane.b32.xlu1 %v33_v5, %s100_s19  ;;  %v85_v10 = vld [vmem:[%s196_s0 + $0x4] ss:$8 sm:$0xf0]  }
   0x5   :  { %v23_v8 = vsel %vm4_vm0, %v81_v7, %v80_v6  ;;  %v86_v11 = vld [vmem:[%s196_s0 + $0x3] ss:$8 sm:$0xf]   ;;  %v43_v12 = vsel %vm4_vm0, %v85_v10, %v84_v9  ;;  %s101_s28 = smov 96   ;;  %s102_s4 = smov 64   ;;  %vm36_vm4 = vcmask 786048  }
   0x6   :  { %v87_v13 = vld [vmem:[%s196_s0 + $0x3] ss:$8 sm:$0xf0]   ;;  %v88_v14 = vld [vmem:[%s196_s0 + $0x2] ss:$8 sm:$0xf]  }
   0x7   :  { %v89_v15 = vld [vmem:[%s196_s0 + $0x2] ss:$8 sm:$0xf0]   ;;  %v53_v16 = vsel %vm4_vm0, %v87_v13, %v86_v11  ;;  %v90_v17 = vld [vmem:[%s196_s0 + $0x1] ss:$8 sm:$0xf]  }
   0x8   :  { %24 = vrot.lane.b32.xlu0 %v23_v8, %s101_s28  ;;  %44 = vrot.lane.b32.xlu1 %v43_v12, %s102_s4  ;;  %v63_v18 = vsel %vm4_vm0, %v89_v15, %v88_v14  ;;  %v91_v19 = vld [vmem:[%s196_s0 + $0x1] ss:$8 sm:$0xf0]   ;;  %v2_v20 = vld [vmem:[%s196_s0] ss:$8 sm:$0xf]  }
   0x9   :  { %v3_v21 = vld [vmem:[%s196_s0] ss:$8 sm:$0xf0]   ;;  %s103_s0 = smov 48   ;;  %s104_s13 = smov 32   ;;  %v73_v23 = vsel %vm4_vm0, %v91_v19, %v90_v17  ;;  %vm46_vm5 = vcmask 654848  }
   0xa   :  { %v5_v22 = vsel %vm4_vm0, %v3_v21, %v2_v20  ;;  %s105_s16 = smov 16   ;;  %vm56_vm6 = vcmask 523648   ;;  %vm66_vm7 = vcmask 392448   ;;  %vm76_vm8 = vcmask 261248  }
   0xb   :  { %7 = vst.msk [vmem:[%s197_s1] sm:$0xff] %vm6_vm1, %v5_v22  }
   0xc   :  { %54 = vrot.lane.b32.xlu0 %v53_v16, %s103_s0  ;;  %64 = vrot.lane.b32.xlu1 %v63_v18, %s104_s13 }
  0x10   :  { %74 = vrot.lane.b32.xlu0 %v73_v23, %s105_s16 }
  0x76   :  { %v15_v24 = vpop.permute.xlu0 %14   ;;  %v35_v25 = vpop.permute.xlu1 %34  }
  0x77   :  { %17 = vst.msk [vmem:[%s197_s1] sm:$0xff] %vm16_vm2, %v15_v24  }
  0x7a   :  { %v25_v26 = vpop.permute.xlu0 %24   ;;  %v45_v27 = vpop.permute.xlu1 %44  }
  0x7b   :  { %27 = vst.msk [vmem:[%s197_s1] sm:$0xff] %vm26_vm3, %v25_v26  }
  0x7c   :  { %37 = vst.msk [vmem:[%s197_s1] sm:$0xff] %vm36_vm4, %v35_v25  }
  0x7d   :  { %47 = vst.msk [vmem:[%s197_s1] sm:$0xff] %vm46_vm5, %v45_v27  }
  0x7e   :  { %v55_v28 = vpop.permute.xlu0 %54   ;;  %v65_v29 = vpop.permute.xlu1 %64  }
  0x7f   :  { %57 = vst.msk [vmem:[%s197_s1] sm:$0xff] %vm56_vm6, %v55_v28  }
  0x80   :  { %67 = vst.msk [vmem:[%s197_s1] sm:$0xff] %vm66_vm7, %v65_v29  }
  0x82   :  { %v75_v30 = vpop.permute.xlu0 %74  }
  0x83   :  { %77 = vst.msk [vmem:[%s197_s1] sm:$0xff] %vm76_vm8, %v75_v30  }

// kernel: inverted_residual_forward.1
= control target key start
LH: loop header
LB: loop body
LE: loop exit
PB: predicated region body
PF: predicated region fallthrough
CT: control target
= control target key end

     0   :  { %vm69_vm0 = vcmask 523264   ;;  %v3171_v26 = vmov 0.0   ;;  %s3172_s21 = smov 16   ;;  %s3173_s22 = smov 112   ;;  %vm2125_vm1 = vcmask 1041409   ;;  %vm3176_vm2 = vmmov 0   ;;  %s6289_s1 = inlined_call_operand.vmem [shape: f32[64,128], index: 1, kind: input, shape index: {}]   ;;  %s6290_s0 = inlined_call_operand.vmem [shape: f32[128,64], index: 0, kind: input, shape index: {}]   ;;  %s6291_s3 = inlined_call_operand.vmem [shape: f32[27,8,128], index: 3, kind: input, shape index: {}]   ;;  %s6292_s2 = inlined_call_operand.vmem [shape: f32[1,128], index: 2, kind: input, shape index: {}]   ;;  %s6293_s4 = inlined_call_operand.vmem [shape: f32[1,128], index: 4, kind: input, shape index: {}]   ;;  %s6294_s5 = inlined_call_operand.vmem [shape: f32[128,8], index: 5, kind: input, shape index: {}]   ;;  %s6295_s7 = inlined_call_operand.vmem [shape: f32[8,128], index: 7, kind: input, shape index: {}]   ;;  %s6296_s9 = inlined_call_operand.vmem [shape: f32[128,64], index: 9, kind: input, shape index: {}]   ;;  %s6297_s6 = inlined_call_operand.vmem [shape: f32[1,8], index: 6, kind: input, shape index: {}]   ;;  %s6298_s8 = inlined_call_operand.vmem [shape: f32[1,128], index: 8, kind: input, shape index: {}]   ;;  %s6299_s10 = inlined_call_operand.vmem [shape: f32[1,64], index: 10, kind: input, shape index: {}]   ;;  %s6300_s11 = inlined_call_operand.vmem [shape: f32[128,64], index: 11, kind: output, shape index: {}]  }
   0x1   :  { %v54_v0 = vld [vmem:[%s6289_s1] sm:$0xff]  ;;  %v55_v1 = vld [vmem:[%s6289_s1 + $0x8] sm:$0xff]  ;;  %v56_v2 = vld [vmem:[%s6289_s1 + $0x10] sm:$0xff]  ;;  %359 = vst [vmem:[#allocation2] sm:$0xff] %v3171_v26  ;;  %s3175_s13 = smov 32   ;;  %s3177_s30 = smov 64  }
   0x2   :  { %v2955_v3 = vpack.c.bf16 %v55_v1, %v54_v0  ;;  %v57_v4 = vld [vmem:[%s6289_s1 + $0x18] sm:$0xff]  ;;  %v58_v6 = vld [vmem:[%s6289_s1 + $0x20] sm:$0xff]  ;;  %v59_v7 = vld [vmem:[%s6289_s1 + $0x28] sm:$0xff]  ;;  %360 = vst [vmem:[#allocation2 + $0x8] sm:$0xff] %v3171_v26  ;;  %vm2269_vm3 = vcmask 64512  }
   0x3   :  { %v2959_v5 = vpack.c.bf16 %v57_v4, %v56_v2  ;;  %v38_v8 = vld [vmem:[%s6290_s0] sm:$0xff]  ;;  %v2963_v9 = vpack.c.bf16 %v59_v7, %v58_v6  ;;  %v60_v10 = vld [vmem:[%s6289_s1 + $0x30] sm:$0xff]  ;;  %v61_v11 = vld [vmem:[%s6289_s1 + $0x38] sm:$0xff]  ;;  %361 = vst [vmem:[#allocation2 + $0x10] sm:$0x1] %v3171_v26 }
   0x4   :  { %2956 = vmatprep.subr.bf16.mxu1 %v2955_v3  ;;  %2835 = vmatprep.mubr.msk.f32.mxu1 %vm69_vm0, %v38_v8  ;;  %v2967_v12 = vpack.c.bf16 %v61_v11, %v60_v10  ;;  %v39_v13 = vld [vmem:[%s6290_s0 + $0x8] sm:$0xff]  ;;  %v40_v14 = vld [vmem:[%s6290_s0 + $0x10] sm:$0xff]  ;;  %v41_v15 = vld [vmem:[%s6290_s0 + $0x18] sm:$0xff]  ;;  %362 = vst [vmem:[#allocation2 + $0x18] sm:$0xff] %v3171_v26 }
   0x5   :  { %2958 = vmatpush3.bf16.msra.mxu1 %v2955_v3  ;;  %v42_v16 = vld [vmem:[%s6290_s0 + $0x20] sm:$0xff]  ;;  %v43_v17 = vld [vmem:[%s6290_s0 + $0x28] sm:$0xff]  ;;  %v44_v18 = vld [vmem:[%s6290_s0 + $0x30] sm:$0xff]  ;;  %364 = vst [vmem:[#allocation2 + $0x28] sm:$0x1] %v3171_v26 }
   0x6   :  { %2960 = vmatprep.subr.bf16.mxu1 %v2959_v5  ;;  %v45_v19 = vld [vmem:[%s6290_s0 + $0x38] sm:$0xff]  ;;  %v46_v20 = vld [vmem:[%s6290_s0 + $0x40] sm:$0xff]  ;;  %v47_v21 = vld [vmem:[%s6290_s0 + $0x48] sm:$0xff]  ;;  %365 = vst [vmem:[#allocation2 + $0x30] sm:$0xff] %v3171_v26 }
   0x7   :  { %v48_v22 = vld [vmem:[%s6290_s0 + $0x50] sm:$0xff]  ;;  %v49_v23 = vld [vmem:[%s6290_s0 + $0x58] sm:$0xff]  ;;  %v50_v24 = vld [vmem:[%s6290_s0 + $0x60] sm:$0xff]  ;;  %367 = vst [vmem:[#allocation2 + $0x40] sm:$0x1] %v3171_v26 }
   0x8   :  { %v51_v25 = vld [vmem:[%s6290_s0 + $0x68] sm:$0xff]  ;;  %368 = vst [vmem:[#allocation2 + $0x48] sm:$0xff] %v3171_v26  ;;  %370 = vst [vmem:[#allocation2 + $0x58] sm:$0x1] %v3171_v26  ;;  %v52_v33 = vld [vmem:[%s6290_s0 + $0x70] sm:$0xff] }
   0x9   :  { %2962 = vmatpush3.bf16.msra.mxu1 %v2959_v5  ;;  %371 = vst [vmem:[#allocation2 + $0x60] sm:$0xff] %v3171_v26  ;;  %373 = vst [vmem:[#allocation2 + $0x70] sm:$0x1] %v3171_v26  ;;  %v436_v27 = vld [vmem:[#allocation2 + $0x7] sm:$0xff]  ;;  %v53_v34 = vld [vmem:[%s6290_s0 + $0x78] sm:$0xff] }
   0xa   :  { %2964 = vmatprep.subr.bf16.mxu1 %v2963_v9  ;;  %374 = vst [vmem:[#allocation2 + $0x78] sm:$0xff] %v3171_v26  ;;  %376 = vst [vmem:[#allocation2 + $0x88] sm:$0x1] %v3171_v26  ;;  %v783_v30 = vld [vmem:[#allocation2 + $0x9] sm:$0xff]  ;;  %v3344_v37 = vld [vmem:[%s6291_s3] sm:$0xff] }
   0xb   :  { %377 = vst [vmem:[#allocation2 + $0x90] sm:$0xff] %v3171_v26  ;;  %379 = vst [vmem:[#allocation2 + $0xa0] sm:$0x1] %v3171_v26  ;;  %v3339_v35 = vld [vmem:[%s6291_s3 + $0x8] sm:$0xff]  ;;  %v3351_v43 = vld [vmem:[%s6291_s3 + $0x10] sm:$0xff] }
   0xc   :  { %380 = vst [vmem:[#allocation2 + $0xa8] sm:$0xff] %v3171_v26  ;;  %382 = vst [vmem:[#allocation2 + $0xb8] sm:$0x1] %v3171_v26  ;;  %v503_v38 = vmul.f32 %v3339_v35, %v436_v27  ;;  %v3360_v53 = vld [vmem:[%s6291_s3 + $0x18] sm:$0xff]  ;;  %v3365_v57 = vld [vmem:[%s6291_s3 + $0x28] sm:$0xff] }
   0xd   :  { %2966 = vmatpush3.bf16.msra.mxu1 %v2963_v9  ;;  %383 = vst [vmem:[#allocation2 + $0xc0] sm:$0xff] %v3171_v26  ;;  %385 = vst [vmem:[#allocation2 + $0xd0] sm:$0x1] %v3171_v26  ;;  %v3370_v58 = vld [vmem:[%s6292_s2] ss:$0 sm:$0xff]  ;;  %v3386_v11 = vld [vmem:[%s6291_s3 + $0x30] sm:$0xff] }
   0xe   :  { %2968 = vmatprep.subr.bf16.mxu1 %v2967_v12  ;;  %386 = vst [vmem:[#allocation2 + $0xd8] sm:$0xff] %v3171_v26  ;;  %387 = vst [vmem:[#allocation2 + $0xe0] sm:$0xff] %v3171_v26  ;;  %v3375_v59 = vld [vmem:[%s6291_s3 + $0x20] sm:$0xff] }
   0xf   :  { %388 = vst [vmem:[#allocation2 + $0xe8] sm:$0x1] %v3171_v26  ;;  %389 = vst [vmem:[#allocation2 + $0xf0] sm:$0xff] %v3171_v26  ;;  %v685_v0 = vmul.f32 0.0, %v3375_v59 }
  0x10   :  { %390 = vst [vmem:[#allocation2 + $0xf8] sm:$0xff] %v3171_v26  ;;  %391 = vst [vmem:[#allocation2 + $0x100] sm:$0x1] %v3171_v26 }
  0x11   :  { %2970 = vmatpush3.bf16.msra.mxu1 %v2967_v12  ;;  %392 = vst [vmem:[#allocation2 + $0x108] sm:$0xff] %v3171_v26  ;;  %394 = vst [vmem:[#allocation2 + $0x118] sm:$0x1] %v3171_v26 }
  0x12   :  { %395 = vst [vmem:[#allocation2 + $0x120] sm:$0xff] %v3171_v26  ;;  %397 = vst [vmem:[#allocation2 + $0x130] sm:$0x1] %v3171_v26 }
  0x13   :  { %398 = vst [vmem:[#allocation2 + $0x138] sm:$0xff] %v3171_v26  ;;  %400 = vst [vmem:[#allocation2 + $0x148] sm:$0x1] %v3171_v26 }
  0x14   :  { %2836 = vmatmul.mubr.msk.f32.vlgmr.msra.gmra.mrb[0].mxu1 %vm69_vm0, %v39_v13  ;;  %401 = vst [vmem:[#allocation2 + $0x150] sm:$0xff] %v3171_v26  ;;  %403 = vst [vmem:[#allocation2 + $0x160] sm:$0x1] %v3171_v26 }
  0x15   :  { %2838 = vmatprep.mubr.msk.f32.mxu1 %vm69_vm0, %v40_v14  ;;  %404 = vst [vmem:[#allocation2 + $0x168] sm:$0xff] %v3171_v26  ;;  %406 = vst [vmem:[#allocation2 + $0x178] sm:$0x1] %v3171_v26 }
  0x16   :  { %407 = vst [vmem:[#allocation2 + $0x180] sm:$0xff] %v3171_v26  ;;  %409 = vst [vmem:[#allocation2 + $0x190] sm:$0x1] %v3171_v26 }
  0x17   :  { %410 = vst [vmem:[#allocation2 + $0x198] sm:$0xff] %v3171_v26  ;;  %412 = vst [vmem:[#allocation2 + $0x1a8] sm:$0x1] %v3171_v26  ;;  %v444_v28 = vld [vmem:[#allocation2 + $0xf7] sm:$0xff] }
  0x18   :  { %2839 = vmatmul.mubr.msk.f32.gmra.mrb[2].mxu1 %vm69_vm0, %v41_v15  ;;  %413 = vst [vmem:[#allocation2 + $0x1b0] sm:$0xff] %v3171_v26  ;;  %415 = vst [vmem:[#allocation2 + $0x1c0] sm:$0x1] %v3171_v26  ;;  %v3035_v29 = vpack.i.bf16 %v444_v28, %v436_v27  ;;  %v3323_v31 = vld [vmem:[#allocation2 + $0xf9] sm:$0xff]  ;;  %v511_v39 = vmul.f32 %v3339_v35, %v444_v28 }
  0x19   :  { %2841 = vmatprep.mubr.msk.f32.mxu1 %vm69_vm0, %v42_v16  ;;  %416 = vst [vmem:[#allocation2 + $0x1c8] sm:$0xff] %v3171_v26  ;;  %417 = vst [vmem:[#allocation2 + $0x1d0] sm:$0xff] %v3171_v26  ;;  %v3055_v32 = vpack.i.bf16 %v3323_v31, %v783_v30  ;;  %v3392_v16 = vld [vmem:[%s6291_s3 + $0x38] sm:$0xff] }
  0x1a   :  { %418 = vst [vmem:[#allocation2 + $0x1d8] sm:$0x1] %v3171_v26  ;;  %3036 = vrot.lane.b32.xlu0 %v3035_v29, %s3172_s21  ;;  %3041 = vrot.lane.b32.xlu1 %v3035_v29, %s3173_s22 }
  0x1c   :  { %2842 = vmatmul.mubr.msk.f32.gmra.mrb[4].mxu1 %vm69_vm0, %v43_v17 }
  0x1d   :  { %2844 = vmatprep.mubr.msk.f32.mxu1 %vm69_vm0, %v44_v18 }
  0x1e   :  { %3046 = vrot.lane.b32.xlu0 %v3171_v26, %s3172_s21  ;;  %3051 = vrot.lane.b32.xlu1 %v3171_v26, %s3173_s22 }
  0x20   :  { %2845 = vmatmul.mubr.msk.f32.gmra.mrb[6].mxu1 %vm69_vm0, %v45_v19 }
  0x21   :  { %2847 = vmatprep.mubr.msk.f32.mxu1 %vm69_vm0, %v46_v20  ;;  %v867_v20 = vmul.f32 %v3392_v16, %v783_v30 }
  0x22   :  { %3056 = vrot.lane.b32.xlu0 %v3055_v32, %s3172_s21  ;;  %3061 = vrot.lane.b32.xlu1 %v3055_v32, %s3173_s22  ;;  %v875_v32 = vmul.f32 %v3392_v16, %v3323_v31 }
  0x24   :  { %2848 = vmatmul.mubr.msk.f32.gmra.mrb[8].mxu1 %vm69_vm0, %v47_v21 }
  0x25   :  { %2850 = vmatprep.mubr.msk.f32.mxu1 %vm69_vm0, %v48_v22 }
  0x28   :  { %2851 = vmatmul.mubr.msk.f32.gmra.mrb[10].mxu1 %vm69_vm0, %v49_v23 }
  0x29   :  { %2853 = vmatprep.mubr.msk.f32.mxu1 %vm69_vm0, %v50_v24 }
  0x2c   :  { %2854 = vmatmul.mubr.msk.f32.gmra.mrb[12].mxu1 %vm69_vm0, %v51_v25 }
  0x2d   :  { %2856 = vmatprep.mubr.msk.f32.mxu1 %vm69_vm0, %v52_v33 }
  0x30   :  { %2857 = vmatmul.mubr.msk.f32.gmra.mrb[14].mxu1 %vm69_vm0, %v53_v34 }
  0x8c   :  { %v3037_v36 = vpop.permute.xlu0 %3036  ;;  %v3042_v42 = vpop.permute.xlu1 %3041 }
  0x8d   :  { %v3039_v40 = vunpack.i.h.bf16 %v3037_v36  ;;  %v3038_v41 = vunpack.i.l.bf16 %v3037_v36  ;;  %v3044_v46 = vunpack.i.h.bf16 %v3042_v42  ;;  %v3043_v47 = vunpack.i.l.bf16 %v3042_v42 }
  0x8f   :  { %v485_v44 = vmul.f32 %v3038_v41, %v3344_v37  ;;  %v493_v45 = vmul.f32 %v3039_v40, %v3344_v37  ;;  %v569_v51 = vmul.f32 %v3043_v47, %v3351_v43  ;;  %v577_v52 = vmul.f32 %v3044_v46, %v3351_v43 }
  0x90   :  { %v3047_v48 = vpop.permute.xlu0 %3046  ;;  %v3052_v56 = vpop.permute.xlu1 %3051 }
  0x91   :  { %v519_v49 = vadd.f32 %v503_v38, %v485_v44  ;;  %v527_v50 = vadd.f32 %v511_v39, %v493_v45  ;;  %v3049_v54 = vunpack.i.h.bf16 %v3047_v48  ;;  %v3048_v55 = vunpack.i.l.bf16 %v3047_v48 }
  0x92   :  { %v3054_v62 = vunpack.i.h.bf16 %v3052_v56  ;;  %v3053_v63 = vunpack.i.l.bf16 %v3052_v56 }
  0x93   :  { %v585_v60 = vadd.f32 %v569_v51, %v519_v49  ;;  %v593_v61 = vadd.f32 %v577_v52, %v527_v50  ;;  %v651_v1 = vmul.f32 %v3048_v55, %v3360_v53  ;;  %v659_v2 = vmul.f32 %v3049_v54, %v3360_v53 }
  0x94   :  { %v751_v4 = vmul.f32 %v3053_v63, %v3365_v57  ;;  %v759_v9 = vmul.f32 %v3054_v62, %v3365_v57  ;;  %v3057_v10 = vpop.permute.xlu0 %3056 }
  0x95   :  { %v667_v7 = vadd.f32 %v651_v1, %v585_v60  ;;  %v675_v8 = vadd.f32 %v659_v2, %v593_v61  ;;  %v3059_v13 = vunpack.i.h.bf16 %v3057_v10  ;;  %v3058_v14 = vunpack.i.l.bf16 %v3057_v10 }
  0x97   :  { %v701_v17 = vadd.f32 %v685_v0, %v667_v7  ;;  %v709_v18 = vadd.f32 %v685_v0, %v675_v8  ;;  %v833_v22 = vmul.f32 %v3058_v14, %v3386_v11  ;;  %v841_v23 = vmul.f32 %v3059_v13, %v3386_v11 }
  0x99   :  { %v767_v27 = vadd.f32 %v751_v4, %v701_v17  ;;  %v775_v28 = vadd.f32 %v759_v9, %v709_v18 }
  0x9b   :  { %v849_v30 = vadd.f32 %v833_v22, %v767_v27  ;;  %v857_v38 = vadd.f32 %v841_v23, %v775_v28 }
  0x9d   :  { %v3402_v47 = vadd.f32 %v867_v20, %v849_v30  ;;  %v3405_v50 = vadd.f32 %v875_v32, %v857_v38 }
  0xe7   :  { %v2837_v3 = vpop.f32.mrb[0].mxu1 }
  0xe8   :  { %v190_v5 = vadd.f32 %v2837_v3, %v3370_v58  ;;  %v184_v6 = vpop.f32.mrb[1].mxu1 }
  0xe9   :  { %v185_v12 = vadd.f32 %v3370_v58, %v184_v6 }
  0xea   :  { %v264_v15 = vmax.f32 %v190_v5, 0.0 }
  0xeb   :  { %v263_v19 = vmax.f32 %v185_v12, 0.0  ;;  %v2840_v21 = vpop.f32.mrb[2].mxu1 }
  0xec   :  { %v280_v24 = vadd.f32 3.0, %v264_v15  ;;  %v200_v25 = vadd.f32 %v2840_v21, %v3370_v58  ;;  %v194_v26 = vpop.f32.mrb[3].mxu1 }
  0xed   :  { %v279_v29 = vadd.f32 3.0, %v263_v19  ;;  %v195_v33 = vadd.f32 %v3370_v58, %v194_v26 }
  0xee   :  { %v296_v34 = vmax.f32 %v280_v24, 0.0  ;;  %v266_v36 = vmax.f32 %v200_v25, 0.0 }
  0xef   :  { %v295_v39 = vmax.f32 %v279_v29, 0.0  ;;  %v265_v40 = vmax.f32 %v195_v33, 0.0  ;;  %v2843_v41 = vpop.f32.mrb[4].mxu1 }
  0xf0   :  { %v312_v42 = vmin.f32 %v296_v34, 6.0  ;;  %v282_v44 = vadd.f32 3.0, %v266_v36  ;;  %v210_v45 = vadd.f32 %v2843_v41, %v3370_v58  ;;  %v204_v46 = vpop.f32.mrb[5].mxu1 }
  0xf1   :  { %v311_v48 = vmin.f32 %v295_v39, 6.0  ;;  %v281_v49 = vadd.f32 3.0, %v265_v40  ;;  %v205_v31 = vadd.f32 %v3370_v58, %v204_v46 }
  0xf2   :  { %v328_v51 = vmul.f32 0.16666667, %v312_v42  ;;  %v298_v52 = vmax.f32 %v282_v44, 0.0  ;;  %v268_v54 = vmax.f32 %v210_v45, 0.0 }
  0xf3   :  { %v327_v55 = vmul.f32 0.16666667, %v311_v48  ;;  %v297_v56 = vmax.f32 %v281_v49, 0.0  ;;  %v267_v60 = vmax.f32 %v205_v31, 0.0  ;;  %v2846_v61 = vpop.f32.mrb[6].mxu1 }
  0xf4   :  { %v3407_v62 = vmul.f32 %v328_v51, %v264_v15  ;;  %v314_v63 = vmin.f32 %v298_v52, 6.0  ;;  %v284_v0 = vadd.f32 3.0, %v268_v54  ;;  %v220_v1 = vadd.f32 %v2846_v61, %v3370_v58  ;;  %v214_v2 = vpop.f32.mrb[7].mxu1 }
  0xf5   :  { %v3410_v3 = vmul.f32 %v327_v55, %v263_v19  ;;  %v313_v4 = vmin.f32 %v297_v56, 6.0  ;;  %v283_v5 = vadd.f32 3.0, %v267_v60  ;;  %v215_v6 = vadd.f32 %v3370_v58, %v214_v2 }
  0xf6   :  { %421 = vst [vmem:[#allocation2 + $0x38] sm:$0xff] %v3407_v62  ;;  %v330_v7 = vmul.f32 0.16666667, %v314_v63  ;;  %v300_v8 = vmax.f32 %v284_v0, 0.0  ;;  %v270_v15 = vmax.f32 %v220_v1, 0.0 }
  0xf7   :  { %420 = vst [vmem:[#allocation2 + $0x20] sm:$0xff] %v3410_v3  ;;  %v329_v9 = vmul.f32 0.16666667, %v313_v4  ;;  %v299_v10 = vmax.f32 %v283_v5, 0.0  ;;  %v2849_v12 = vpop.f32.mrb[8].mxu1  ;;  %v269_v17 = vmax.f32 %v215_v6, 0.0 }
  0xf8   :  { %v3415_v13 = vmul.f32 %v330_v7, %v266_v36  ;;  %v316_v14 = vmin.f32 %v300_v8, 6.0  ;;  %v224_v18 = vpop.f32.mrb[9].mxu1  ;;  %v230_v21 = vadd.f32 %v2849_v12, %v3370_v58  ;;  %v286_v24 = vadd.f32 3.0, %v270_v15 }
  0xf9   :  { %v3417_v19 = vmul.f32 %v329_v9, %v265_v40  ;;  %v315_v20 = vmin.f32 %v299_v10, 6.0  ;;  %v225_v22 = vadd.f32 %v3370_v58, %v224_v18  ;;  %v285_v25 = vadd.f32 3.0, %v269_v17 }
  0xfa   :  { %423 = vst [vmem:[#allocation2 + $0x68] sm:$0xff] %v3415_v13  ;;  %v332_v23 = vmul.f32 0.16666667, %v316_v14  ;;  %v272_v27 = vmax.f32 %v230_v21, 0.0  ;;  %v302_v33 = vmax.f32 %v286_v24, 0.0 }
  0xfb   :  { %422 = vst [vmem:[#allocation2 + $0x50] sm:$0xff] %v3417_v19  ;;  %v331_v26 = vmul.f32 0.16666667, %v315_v20  ;;  %v271_v28 = vmax.f32 %v225_v22, 0.0  ;;  %v2852_v29 = vpop.f32.mrb[10].mxu1  ;;  %v301_v34 = vmax.f32 %v285_v25, 0.0 }
  0xfc   :  { %v3423_v32 = vmul.f32 %v332_v23, %v268_v54  ;;  %v234_v36 = vpop.f32.mrb[11].mxu1  ;;  %v288_v39 = vadd.f32 3.0, %v272_v27  ;;  %v318_v41 = vmin.f32 %v302_v33, 6.0  ;;  %v240_v48 = vadd.f32 %v2852_v29, %v3370_v58 }
  0xfd   :  { %v3425_v30 = vld [vmem:[#allocation2 + $0x37] sm:$0xff]  ;;  %v3427_v38 = vmul.f32 %v331_v26, %v267_v60  ;;  %v287_v40 = vadd.f32 3.0, %v271_v28  ;;  %v317_v44 = vmin.f32 %v301_v34, 6.0  ;;  %v235_v63 = vadd.f32 %v3370_v58, %v234_v36 }
  0xfe   :  { %539 = vrot.lane.b32.xlu0 %v3425_v30, %s3173_s22  ;;  %456 = vrot.lane.b32.xlu1 %v3425_v30, %s3172_s21  ;;  %425 = vst [vmem:[#allocation2 + $0x98] sm:$0xff] %v3423_v32  ;;  %v334_v42 = vmul.f32 0.16666667, %v318_v41  ;;  %v304_v45 = vmax.f32 %v288_v39, 0.0  ;;  %v274_v55 = vmax.f32 %v240_v48, 0.0  ;;  %v3442_v56 = vld [vmem:[#allocation2 + $0x39] sm:$0xff] }
  0xff   :  { %424 = vst [vmem:[#allocation2 + $0x80] sm:$0xff] %v3427_v38  ;;  %v303_v46 = vmax.f32 %v287_v40, 0.0  ;;  %v333_v31 = vmul.f32 0.16666667, %v317_v44  ;;  %v273_v4 = vmax.f32 %v235_v63, 0.0  ;;  %v3454_v6 = vld [vmem:[#allocation2 + $0x1f] sm:$0xff] }
 0x100   :  { %v350_v49 = vmul.f32 %v334_v42, %v270_v15  ;;  %v320_v51 = vmin.f32 %v304_v45, 6.0  ;;  %v290_v0 = vadd.f32 3.0, %v274_v55  ;;  %v3476_v18 = vld [vmem:[#allocation2 + $0x21] sm:$0xff]  ;;  %v2855_v20 = vpop.f32.mrb[12].mxu1 }
 0x101   :  { %v319_v52 = vmin.f32 %v303_v46, 6.0  ;;  %v3440_v54 = vmul.f32 %v333_v31, %v269_v17  ;;  %v289_v7 = vadd.f32 3.0, %v273_v4  ;;  %v244_v21 = vpop.f32.mrb[13].mxu1  ;;  %v250_v22 = vadd.f32 %v2855_v20, %v3370_v58  ;;  %v3496_v33 = vld [vmem:[#allocation2 + $0x67] sm:$0xff] }
 0x102   :  { %721 = vrot.lane.b32.xlu0 %v3407_v62, %s3173_s22  ;;  %621 = vrot.lane.b32.xlu1 %v3407_v62, %s3172_s21  ;;  %427 = vst [vmem:[#allocation2 + $0xc8] sm:$0xff] %v350_v49  ;;  %v336_v60 = vmul.f32 0.16666667, %v320_v51  ;;  %v306_v5 = vmax.f32 %v290_v0, 0.0  ;;  %v245_v23 = vadd.f32 %v3370_v58, %v244_v21  ;;  %v3516_v44 = vld [vmem:[#allocation2 + $0x4f] sm:$0xff] }
 0x103   :  { %v335_v61 = vmul.f32 0.16666667, %v319_v52  ;;  %426 = vst [vmem:[#allocation2 + $0xb0] sm:$0xff] %v3440_v54  ;;  %v305_v9 = vmax.f32 %v289_v7, 0.0  ;;  %v276_v24 = vmax.f32 %v250_v22, 0.0  ;;  %v3518_v45 = vld [vmem:[#allocation2 + $0x69] sm:$0xff]  ;;  %v3602_v22 = vpop.permute.xlu1 %3061 }
 0x104   :  { %v3450_v1 = vmul.f32 %v336_v60, %v272_v27  ;;  %v322_v8 = vmin.f32 %v306_v5, 6.0  ;;  %v275_v25 = vmax.f32 %v245_v23, 0.0  ;;  %v3532_v46 = vld [vmem:[#allocation2 + $0x51] sm:$0xff]  ;;  %v2858_v51 = vpop.f32.mrb[14].mxu1 }
 0x105   :  { %v3452_v2 = vmul.f32 %v335_v61, %v271_v28  ;;  %v321_v12 = vmin.f32 %v305_v9, 6.0  ;;  %v292_v26 = vadd.f32 3.0, %v276_v24  ;;  %v3538_v48 = vld [vmem:[#allocation2 + $0x97] sm:$0xff]  ;;  %v254_v52 = vpop.f32.mrb[15].mxu1 }
 0x106   :  { %903 = vrot.lane.b32.xlu0 %v3442_v56, %s3173_s22  ;;  %803 = vrot.lane.b32.xlu1 %v3442_v56, %s3172_s21  ;;  %429 = vst [vmem:[#allocation2 + $0x128] sm:$0xff] %v3450_v1  ;;  %v338_v10 = vmul.f32 0.16666667, %v322_v8  ;;  %v291_v27 = vadd.f32 3.0, %v275_v25  ;;  %6327 = vst [vmem:[#allocation3_spill] sm:$0xff] %v3538_v48  ;;  %v3548_v49 = vld [vmem:[#allocation2 + $0x7f] sm:$0xff]  ;;  %v255_v60 = vadd.f32 %v3370_v58, %v254_v52 }
 0x107   :  { %428 = vst [vmem:[#allocation2 + $0x110] sm:$0xff] %v3452_v2  ;;  %v337_v15 = vmul.f32 0.16666667, %v321_v12  ;;  %v308_v28 = vmax.f32 %v292_v26, 0.0  ;;  %6328 = vst [vmem:[#allocation4_spill] sm:$0xff] %v3548_v49 }
 0x108   :  { %v3466_v14 = vmul.f32 %v338_v10, %v274_v55  ;;  %v307_v29 = vmax.f32 %v291_v27, 0.0  ;;  %v260_v55 = vadd.f32 %v2858_v51, %v3370_v58  ;;  %v277_v63 = vmax.f32 %v255_v60, 0.0 }
 0x109   :  { %v3469_v17 = vmul.f32 %v337_v15, %v273_v4  ;;  %v324_v34 = vmin.f32 %v308_v28, 6.0 }
 0x10a   :  { %983 = vrot.lane.b32.xlu1 %v3425_v30, %s3172_s21  ;;  %454 = vrot.lane.b32.xlu0 %v3454_v6, %s3172_s21  ;;  %431 = vst [vmem:[#allocation2 + $0x158] sm:$0xff] %v3466_v14  ;;  %v323_v36 = vmin.f32 %v307_v29, 6.0  ;;  %v3558_v31 = vld [vmem:[#allocation2 + $0xaf] sm:$0xff]  ;;  %v278_v61 = vmax.f32 %v260_v55, 0.0  ;;  %v293_v5 = vadd.f32 3.0, %v277_v63 }
 0x10b   :  { %430 = vst [vmem:[#allocation2 + $0x140] sm:$0xff] %v3469_v17  ;;  %v340_v39 = vmul.f32 0.16666667, %v324_v34 }
 0x10c   :  { %v339_v40 = vmul.f32 0.16666667, %v323_v36  ;;  %v294_v4 = vadd.f32 3.0, %v278_v61  ;;  %v309_v58 = vmax.f32 %v293_v5, 0.0 }
 0x10d   :  { %v3502_v41 = vmul.f32 %v340_v39, %v276_v24  ;;  %v3570_v0 = vld [vmem:[#allocation2 + $0x127] sm:$0xff] }
 0x10e   :  { %1083 = vrot.lane.b32.xlu1 %v3425_v30, %s3173_s22  ;;  %537 = vrot.lane.b32.xlu0 %v3454_v6, %s3173_s22  ;;  %v3504_v42 = vmul.f32 %v339_v40, %v275_v25  ;;  %v310_v7 = vmax.f32 %v294_v4, 0.0  ;;  %v325_v9 = vmin.f32 %v309_v58, 6.0  ;;  %v3580_v15 = vld [vmem:[#allocation2 + $0x129] sm:$0xff]  ;;  %v505_v25 = vmul.f32 %v3339_v35, %v3425_v30  ;;  %v3645_v58 = vld [vmem:[#allocation2 + $0x81] sm:$0xff] }
 0x10f   :  { %433 = vst [vmem:[#allocation2 + $0x188] sm:$0xff] %v3502_v41  ;;  %v687_v40 = vmul.f32 %v3375_v59, %v3407_v62 }
 0x110   :  { %432 = vst [vmem:[#allocation2 + $0x170] sm:$0xff] %v3504_v42  ;;  %v326_v8 = vmin.f32 %v310_v7, 6.0  ;;  %v341_v12 = vmul.f32 0.16666667, %v325_v9 }
 0x112   :  { %1165 = vrot.lane.b32.xlu1 %v3407_v62, %s3172_s21  ;;  %719 = vrot.lane.b32.xlu0 %v3410_v3, %s3173_s22  ;;  %v342_v10 = vmul.f32 0.16666667, %v326_v8  ;;  %v3584_v21 = vmul.f32 %v341_v12, %v277_v63  ;;  %v3654_v12 = vld [vmem:[#allocation2 + $0x111] sm:$0xff] }
 0x114   :  { %v3582_v20 = vmul.f32 %v342_v10, %v278_v61  ;;  %434 = vst [vmem:[#allocation2 + $0x1a0] sm:$0xff] %v3584_v21  ;;  %v3631_v61 = vld [vmem:[#allocation2 + $0x10f] sm:$0xff]  ;;  %v3063_v10 = vunpack.i.l.bf16 %v3602_v22 }
 0x116   :  { %1265 = vrot.lane.b32.xlu1 %v3407_v62, %s3173_s22  ;;  %901 = vrot.lane.b32.xlu0 %v3476_v18, %s3173_s22  ;;  %435 = vst [vmem:[#allocation2 + $0x1b8] sm:$0xff] %v3582_v20 }
 0x11a   :  { %1347 = vrot.lane.b32.xlu1 %v3442_v56, %s3172_s21  ;;  %981 = vrot.lane.b32.xlu0 %v3454_v6, %s3172_s21 }
 0x11e   :  { %619 = vrot.lane.b32.xlu1 %v3410_v3, %s3172_s21  ;;  %1081 = vrot.lane.b32.xlu0 %v3454_v6, %s3173_s22 }
 0x122   :  { %801 = vrot.lane.b32.xlu1 %v3476_v18, %s3172_s21  ;;  %1163 = vrot.lane.b32.xlu0 %v3410_v3, %s3172_s21 }
 0x126   :  { %460 = vrot.lane.b32.xlu1 %v3496_v33, %s3172_s21  ;;  %1263 = vrot.lane.b32.xlu0 %v3410_v3, %s3173_s22 }
 0x12a   :  { %543 = vrot.lane.b32.xlu1 %v3496_v33, %s3173_s22  ;;  %1345 = vrot.lane.b32.xlu0 %v3476_v18, %s3172_s21 }
 0x12e   :  { %725 = vrot.lane.b32.xlu1 %v3415_v13, %s3173_s22  ;;  %625 = vrot.lane.b32.xlu0 %v3415_v13, %s3172_s21 }
 0x132   :  { %541 = vrot.lane.b32.xlu1 %v3516_v44, %s3173_s22  ;;  %807 = vrot.lane.b32.xlu0 %v3518_v45, %s3172_s21 }
 0x136   :  { %623 = vrot.lane.b32.xlu1 %v3417_v19, %s3172_s21  ;;  %907 = vrot.lane.b32.xlu0 %v3518_v45, %s3173_s22 }
 0x13a   :  { %723 = vrot.lane.b32.xlu1 %v3417_v19, %s3173_s22  ;;  %987 = vrot.lane.b32.xlu0 %v3496_v33, %s3172_s21 }
 0x13e   :  { %805 = vrot.lane.b32.xlu1 %v3532_v46, %s3172_s21  ;;  %1087 = vrot.lane.b32.xlu0 %v3496_v33, %s3173_s22 }
 0x142   :  { %547 = vrot.lane.b32.xlu1 %v3538_v48, %s3173_s22  ;;  %1169 = vrot.lane.b32.xlu0 %v3415_v13, %s3172_s21 }
 0x146   :  { %629 = vrot.lane.b32.xlu1 %v3423_v32, %s3172_s21  ;;  %458 = vrot.lane.b32.xlu0 %v3516_v44, %s3172_s21 }
 0x14a   :  { %462 = vrot.lane.b32.xlu1 %v3548_v49, %s3172_s21  ;;  %905 = vrot.lane.b32.xlu0 %v3532_v46, %s3173_s22 }
 0x14e   :  { %627 = vrot.lane.b32.xlu1 %v3427_v38, %s3172_s21  ;;  %985 = vrot.lane.b32.xlu0 %v3516_v44, %s3172_s21 }
 0x152   :  { %466 = vrot.lane.b32.xlu1 %v3558_v31, %s3172_s21  ;;  %1085 = vrot.lane.b32.xlu0 %v3516_v44, %s3173_s22 }
 0x156   :  { %549 = vrot.lane.b32.xlu1 %v3558_v31, %s3173_s22  ;;  %1167 = vrot.lane.b32.xlu0 %v3417_v19, %s3172_s21 }
 0x15a   :  { %555 = vrot.lane.b32.xlu1 %v3570_v0, %s3173_s22  ;;  %1267 = vrot.lane.b32.xlu0 %v3417_v19, %s3173_s22  ;;  %v3592_v19 = vld [vmem:[#allocation2 + $0x99] sm:$0xff] }
 0x15b   :  { %6329 = vst [vmem:[#allocation5_spill] sm:$0xff] %v3592_v19 }
 0x15e   :  { %737 = vrot.lane.b32.xlu1 %v3450_v1, %s3173_s22  ;;  %464 = vrot.lane.b32.xlu0 %v3538_v48, %s3172_s21 }
 0x162   :  { %919 = vrot.lane.b32.xlu1 %v3580_v15, %s3173_s22  ;;  %729 = vrot.lane.b32.xlu0 %v3423_v32, %s3173_s22 }
 0x166   :  { %999 = vrot.lane.b32.xlu1 %v3570_v0, %s3172_s21  ;;  %811 = vrot.lane.b32.xlu0 %v3592_v19, %s3172_s21 }
 0x16a   :  { %1099 = vrot.lane.b32.xlu1 %v3570_v0, %s3173_s22  ;;  %911 = vrot.lane.b32.xlu0 %v3592_v19, %s3173_s22 }
 0x16e   :  { %1181 = vrot.lane.b32.xlu1 %v3450_v1, %s3172_s21  ;;  %991 = vrot.lane.b32.xlu0 %v3538_v48, %s3172_s21 }
 0x170   :  { %v540_v23 = vpop.permute.xlu0 %539  ;;  %v457_v24 = vpop.permute.xlu1 %456 }
 0x171   :  { %v487_v26 = vmul.f32 %v3344_v37, %v457_v24  ;;  %v571_v27 = vmul.f32 %v3351_v43, %v540_v23  ;;  %v3659_v23 = vld [vmem:[%s6291_s3 + $0x40] sm:$0xff] }
 0x172   :  { %1281 = vrot.lane.b32.xlu1 %v3450_v1, %s3173_s22  ;;  %1091 = vrot.lane.b32.xlu0 %v3538_v48, %s3173_s22 }
 0x173   :  { %v521_v28 = vadd.f32 %v505_v25, %v487_v26  ;;  %v933_v26 = vmul.f32 %v3063_v10, %v3659_v23 }
 0x174   :  { %v3616_v29 = vpop.permute.xlu0 %721  ;;  %v622_v34 = vpop.permute.xlu1 %621 }
 0x175   :  { %6330 = vst [vmem:[#allocation6_spill] sm:$0xff] %v3616_v29  ;;  %v587_v36 = vadd.f32 %v571_v27, %v521_v28  ;;  %v653_v39 = vmul.f32 %v3360_v53, %v622_v34  ;;  %v3676_v28 = vld [vmem:[%s6291_s3 + $0x50] sm:$0xff]  ;;  %v3681_v34 = vld [vmem:[%s6291_s3 + $0x48] sm:$0xff] }
 0x176   :  { %1363 = vrot.lane.b32.xlu1 %v3580_v15, %s3172_s21  ;;  %1173 = vrot.lane.b32.xlu0 %v3423_v32, %s3172_s21 }
 0x177   :  { %v669_v51 = vadd.f32 %v653_v39, %v587_v36 }
 0x178   :  { %v3625_v52 = vpop.permute.xlu0 %903  ;;  %v3627_v55 = vpop.permute.xlu1 %803 }
 0x179   :  { %6331 = vst [vmem:[#allocation7_spill] sm:$0xff] %v3625_v52  ;;  %6332 = vst [vmem:[#allocation8_spill] sm:$0xff] %v3627_v55  ;;  %v3629_v60 = vadd.f32 %v687_v40, %v669_v51  ;;  %v504_v40 = vmul.f32 %v3339_v35, %v3454_v6 }
 0x17a   :  { %470 = vrot.lane.b32.xlu1 %v3631_v61, %s3172_s21  ;;  %545 = vrot.lane.b32.xlu0 %v3548_v49, %s3173_s22 }
 0x17b   :  { %6333 = vst [vmem:[#allocation9_spill] sm:$0xff] %v3629_v60 }
 0x17c   :  { %v3637_v63 = vpop.permute.xlu1 %983  ;;  %v455_v4 = vpop.permute.xlu0 %454 }
 0x17d   :  { %v486_v27 = vmul.f32 %v3344_v37, %v455_v4  ;;  %v949_v4 = vadd.f32 %v933_v26, %v3402_v47 }
 0x17e   :  { %553 = vrot.lane.b32.xlu1 %v3631_v61, %s3173_s22  ;;  %727 = vrot.lane.b32.xlu0 %v3427_v38, %s3173_s22 }
 0x17f   :  { %v520_v52 = vadd.f32 %v504_v40, %v486_v27  ;;  %v3714_v40 = vld [vmem:[%s6291_s3 + $0x68] sm:$0xff] }
 0x180   :  { %v3643_v5 = vpop.permute.xlu1 %1083  ;;  %v538_v7 = vpop.permute.xlu0 %537 }
 0x181   :  { %v570_v51 = vmul.f32 %v3351_v43, %v538_v7  ;;  %v3701_v7 = vld [vmem:[%s6291_s3 + $0x58] sm:$0xff] }
 0x182   :  { %735 = vrot.lane.b32.xlu1 %v3452_v2, %s3173_s22  ;;  %809 = vrot.lane.b32.xlu0 %v3645_v58, %s3172_s21  ;;  %6336 = vst [vmem:[#allocation12_spill] sm:$0xff] %v3701_v7 }
 0x184   :  { %v3651_v8 = vpop.permute.xlu1 %1165  ;;  %v720_v9 = vpop.permute.xlu0 %719 }
 0x186   :  { %917 = vrot.lane.b32.xlu1 %v3654_v12, %s3173_s22  ;;  %909 = vrot.lane.b32.xlu0 %v3645_v58, %s3173_s22 }
 0x188   :  { %v3665_v24 = vpop.permute.xlu1 %1265  ;;  %v902_v25 = vpop.permute.xlu0 %901 }
 0x189   :  { %6334 = vst [vmem:[#allocation10_spill] sm:$0xff] %v3665_v24  ;;  %v3690_v24 = vld [vmem:[#allocation2 + $0x159] sm:$0xff] }
 0x18a   :  { %641 = vrot.lane.b32.xlu1 %v3466_v14, %s3172_s21  ;;  %989 = vrot.lane.b32.xlu0 %v3548_v49, %s3172_s21 }
 0x18c   :  { %v3683_v36 = vpop.permute.xlu1 %1347  ;;  %v982_v39 = vpop.permute.xlu0 %981 }
 0x18d   :  { %6335 = vst [vmem:[#allocation11_spill] sm:$0xff] %v3683_v36  ;;  %v1015_v10 = vmul.f32 %v3681_v34, %v982_v39  ;;  %v1049_v36 = vmul.f32 %v3676_v28, %v3454_v6  ;;  %v586_v39 = vadd.f32 %v570_v51, %v520_v52  ;;  %v686_v6 = vmul.f32 %v3375_v59, %v3410_v3  ;;  %v3719_v52 = vld [vmem:[%s6291_s3 + $0x60] sm:$0xff] }
 0x18e   :  { %823 = vrot.lane.b32.xlu1 %v3690_v24, %s3172_s21  ;;  %1089 = vrot.lane.b32.xlu0 %v3548_v49, %s3173_s22  ;;  %6337 = vst [vmem:[#allocation13_spill] sm:$0xff] %v3719_v52  ;;  %v752_v51 = vmul.f32 %v3365_v57, %v720_v9 }
 0x18f   :  { %v1031_v55 = vadd.f32 %v1015_v10, %v949_v4 }
 0x190   :  { %v620_v47 = vpop.permute.xlu1 %619  ;;  %v1082_v26 = vpop.permute.xlu0 %1081 }
 0x191   :  { %v652_v60 = vmul.f32 %v3360_v53, %v620_v47  ;;  %v1065_v29 = vadd.f32 %v1049_v36, %v1031_v55  ;;  %v1115_v19 = vmul.f32 %v3701_v7, %v1082_v26  ;;  %v3723_v26 = vld [vmem:[#allocation2 + $0x157] sm:$0xff] }
 0x192   :  { %923 = vrot.lane.b32.xlu1 %v3690_v24, %s3173_s22  ;;  %1171 = vrot.lane.b32.xlu0 %v3427_v38, %s3172_s21 }
 0x193   :  { %v668_v27 = vadd.f32 %v652_v60, %v586_v39  ;;  %v1131_v10 = vadd.f32 %v1115_v19, %v1065_v29  ;;  %v3725_v60 = vld [vmem:[#allocation2 + $0xc7] sm:$0xff]  ;;  %v1231_v39 = vmul.f32 %v3714_v40, %v3410_v3  ;;  %v934_v3 = vmul.f32 %v3659_v23, %v902_v25 }
 0x194   :  { %v802_v55 = vpop.permute.xlu1 %801  ;;  %v1164_v36 = vpop.permute.xlu0 %1163 }
 0x195   :  { %v702_v4 = vadd.f32 %v686_v6, %v668_v27  ;;  %v1197_v47 = vmul.f32 %v3719_v52, %v1164_v36  ;;  %v834_v9 = vmul.f32 %v3386_v11, %v802_v55  ;;  %v868_v27 = vmul.f32 %v3392_v16, %v3476_v18 }
 0x196   :  { %1003 = vrot.lane.b32.xlu1 %v3723_v26, %s3172_s21  ;;  %995 = vrot.lane.b32.xlu0 %v3725_v60, %s3172_s21 }
 0x197   :  { %v768_v49 = vadd.f32 %v752_v51, %v702_v4  ;;  %v1213_v6 = vadd.f32 %v1197_v47, %v1131_v10  ;;  %v507_v47 = vmul.f32 %v3339_v35, %v3496_v33  ;;  %v1116_v35 = vmul.f32 %v3701_v7, %v3643_v5  ;;  %v4144_v7 = vld [vmem:[#allocation2 + $0x99] sm:$0xff] }
 0x198   :  { %v461_v19 = vpop.permute.xlu1 %460  ;;  %v3734_v29 = vpop.permute.xlu0 %1263 }
 0x199   :  { %6338 = vst [vmem:[#allocation14_spill] sm:$0xff] %v3734_v29  ;;  %v850_v36 = vadd.f32 %v834_v9, %v768_v49  ;;  %v3738_v48 = vadd.f32 %v1231_v39, %v1213_v6  ;;  %v489_v55 = vmul.f32 %v3344_v37, %v461_v19  ;;  %v1016_v49 = vmul.f32 %v3681_v34, %v3637_v63 }
 0x19a   :  { %1103 = vrot.lane.b32.xlu1 %v3723_v26, %s3173_s22  ;;  %631 = vrot.lane.b32.xlu0 %v3440_v54, %s3172_s21  ;;  %v1050_v37 = vmul.f32 %v3676_v28, %v3425_v30  ;;  %v689_v30 = vmul.f32 %v3375_v59, %v3415_v13 }
 0x19b   :  { %6339 = vst [vmem:[#allocation15_spill] sm:$0xff] %v3738_v48  ;;  %v884_v51 = vadd.f32 %v868_v27, %v850_v36  ;;  %v523_v6 = vadd.f32 %v507_v47, %v489_v55  ;;  %v1232_v47 = vmul.f32 %v3714_v40, %v3407_v62 }
 0x19c   :  { %v544_v4 = vpop.permute.xlu1 %543  ;;  %v3746_v10 = vpop.permute.xlu0 %1345 }
 0x19d   :  { %6340 = vst [vmem:[#allocation16_spill] sm:$0xff] %v3746_v10  ;;  %v950_v39 = vadd.f32 %v934_v3, %v884_v51  ;;  %v573_v9 = vmul.f32 %v3351_v43, %v544_v4  ;;  %v3762_v3 = vld [vmem:[#allocation2 + $0x13f] sm:$0xff]  ;;  %v3764_v51 = vld [vmem:[#allocation2 + $0xb1] sm:$0xff]  ;;  %v3099_v10 = vld [vmem:[#allocation2 + $0x68] sm:$0xff] }
 0x19e   :  { %1185 = vrot.lane.b32.xlu1 %v3466_v14, %s3172_s21  ;;  %731 = vrot.lane.b32.xlu0 %v3440_v54, %s3173_s22  ;;  %v1198_v54 = vmul.f32 %v3719_v52, %v3651_v8  ;;  %v4286_v48 = vmul.f32 %v3099_v10, %v3714_v40 }
 0x19f   :  { %v1032_v25 = vadd.f32 %v1016_v49, %v950_v39  ;;  %v589_v36 = vadd.f32 %v573_v9, %v523_v6  ;;  %v3779_v9 = vld [vmem:[#allocation2 + $0x141] sm:$0xff] }
 0x1a0   :  { %v726_v19 = vpop.permute.xlu1 %725  ;;  %v626_v27 = vpop.permute.xlu0 %625  ;;  %6447 = vst [vmem:[#allocation123_spill] sm:$0xff] %v4286_v48 }
 0x1a1   :  { %v1066_v63 = vadd.f32 %v1050_v37, %v1032_v25  ;;  %v655_v43 = vmul.f32 %v3360_v53, %v626_v27  ;;  %v755_v49 = vmul.f32 %v3365_v57, %v726_v19  ;;  %v871_v57 = vmul.f32 %v3392_v16, %v3518_v45 }
 0x1a2   :  { %474 = vrot.lane.b32.xlu1 %v3762_v3, %s3172_s21  ;;  %813 = vrot.lane.b32.xlu0 %v3764_v51, %s3172_s21 }
 0x1a3   :  { %v1132_v5 = vadd.f32 %v1116_v35, %v1066_v63  ;;  %v671_v55 = vadd.f32 %v655_v43, %v589_v36 }
 0x1a4   :  { %v3774_v4 = vpop.permute.xlu1 %541  ;;  %v808_v53 = vpop.permute.xlu0 %807 }
 0x1a5   :  { %v705_v39 = vadd.f32 %v689_v30, %v671_v55  ;;  %v1214_v37 = vadd.f32 %v1198_v54, %v1132_v5  ;;  %v837_v8 = vmul.f32 %v3386_v11, %v808_v53  ;;  %v3828_v54 = vld [vmem:[#allocation2 + $0x187] sm:$0xff] }
 0x1a6   :  { %921 = vrot.lane.b32.xlu1 %v3779_v9, %s3173_s22  ;;  %913 = vrot.lane.b32.xlu0 %v3764_v51, %s3173_s22 }
 0x1a7   :  { %v771_v59 = vadd.f32 %v755_v49, %v705_v39  ;;  %v3786_v25 = vadd.f32 %v1232_v47, %v1214_v37  ;;  %v3846_v47 = vld [vmem:[#allocation2 + $0x189] sm:$0xff] }
 0x1a8   :  { %v3788_v6 = vpop.permute.xlu1 %623  ;;  %v3790_v62 = vpop.permute.xlu0 %907 }
 0x1a9   :  { %6341 = vst [vmem:[#allocation17_spill] sm:$0xff] %v3786_v25  ;;  %6342 = vst [vmem:[#allocation18_spill] sm:$0xff] %v3790_v62  ;;  %v853_v19 = vadd.f32 %v837_v8, %v771_v59  ;;  %v3992_v25 = vld [vmem:[#allocation2 + $0x19f] sm:$0xff] }
 0x1aa   :  { %1001 = vrot.lane.b32.xlu1 %v3762_v3, %s3172_s21  ;;  %993 = vrot.lane.b32.xlu0 %v3558_v31, %s3172_s21 }
 0x1ab   :  { %v3798_v27 = vadd.f32 %v871_v57, %v853_v19 }
 0x1ac   :  { %v3800_v35 = vpop.permute.xlu1 %723  ;;  %v3802_v11 = vpop.permute.xlu0 %987 }
 0x1ad   :  { %6343 = vst [vmem:[#allocation19_spill] sm:$0xff] %v3798_v27  ;;  %6344 = vst [vmem:[#allocation20_spill] sm:$0xff] %v3802_v11  ;;  %v4243_v11 = vld [vmem:[#allocation2 + $0x97] sm:$0xff] }
 0x1ae   :  { %1101 = vrot.lane.b32.xlu1 %v3762_v3, %s3173_s22  ;;  %1093 = vrot.lane.b32.xlu0 %v3558_v31, %s3173_s22  ;;  %6444 = vst [vmem:[#allocation120_spill] sm:$0xff] %v4243_v11 }
 0x1b0   :  { %v3808_v16 = vpop.permute.xlu1 %805  ;;  %v3810_v45 = vpop.permute.xlu0 %1087 }
 0x1b1   :  { %6345 = vst [vmem:[#allocation21_spill] sm:$0xff] %v3810_v45 }
 0x1b2   :  { %1183 = vrot.lane.b32.xlu1 %v3469_v17, %s3172_s21  ;;  %472 = vrot.lane.b32.xlu0 %v3570_v0, %s3172_s21 }
 0x1b4   :  { %v3816_v63 = vpop.permute.xlu1 %547  ;;  %v3818_v36 = vpop.permute.xlu0 %1169 }
 0x1b5   :  { %6346 = vst [vmem:[#allocation22_spill] sm:$0xff] %v3816_v63  ;;  %6347 = vst [vmem:[#allocation23_spill] sm:$0xff] %v3818_v36 }
 0x1b6   :  { %1283 = vrot.lane.b32.xlu1 %v3469_v17, %s3173_s22  ;;  %637 = vrot.lane.b32.xlu0 %v3450_v1, %s3172_s21 }
 0x1b8   :  { %v3824_v43 = vpop.permute.xlu1 %629  ;;  %v3826_v30 = vpop.permute.xlu0 %458 }
 0x1b9   :  { %6348 = vst [vmem:[#allocation24_spill] sm:$0xff] %v3824_v43 }
 0x1ba   :  { %480 = vrot.lane.b32.xlu1 %v3828_v54, %s3172_s21  ;;  %819 = vrot.lane.b32.xlu0 %v3580_v15, %s3172_s21 }
 0x1bc   :  { %v3834_v5 = vpop.permute.xlu1 %462  ;;  %v3836_v55 = vpop.permute.xlu0 %905 }
 0x1bd   :  { %6349 = vst [vmem:[#allocation25_spill] sm:$0xff] %v3836_v55 }
 0x1be   :  { %745 = vrot.lane.b32.xlu1 %v3502_v41, %s3173_s22  ;;  %635 = vrot.lane.b32.xlu0 %v3452_v2, %s3172_s21 }
 0x1c0   :  { %v3842_v1 = vpop.permute.xlu1 %627  ;;  %v3844_v53 = vpop.permute.xlu0 %985 }
 0x1c2   :  { %827 = vrot.lane.b32.xlu1 %v3846_v47, %s3172_s21  ;;  %817 = vrot.lane.b32.xlu0 %v3654_v12, %s3172_s21 }
 0x1c4   :  { %v3852_v49 = vpop.permute.xlu1 %466  ;;  %v3854_v39 = vpop.permute.xlu0 %1085 }
 0x1c5   :  { %6350 = vst [vmem:[#allocation26_spill] sm:$0xff] %v3852_v49  ;;  %6351 = vst [vmem:[#allocation27_spill] sm:$0xff] %v3854_v39  ;;  %v4224_v49 = vld [vmem:[#allocation2 + $0xc9] sm:$0xff] }
 0x1c6   :  { %927 = vrot.lane.b32.xlu1 %v3846_v47, %s3173_s22  ;;  %997 = vrot.lane.b32.xlu0 %v3631_v61, %s3172_s21  ;;  %6439 = vst [vmem:[#allocation115_spill] sm:$0xff] %v4224_v49 }
 0x1c8   :  { %v3860_v37 = vpop.permute.xlu1 %549  ;;  %v3862_v59 = vpop.permute.xlu0 %1167 }
 0x1c9   :  { %6352 = vst [vmem:[#allocation28_spill] sm:$0xff] %v3860_v37  ;;  %6353 = vst [vmem:[#allocation29_spill] sm:$0xff] %v3862_v59  ;;  %v3974_v37 = vld [vmem:[#allocation2 + $0x1a1] sm:$0xff] }
 0x1ca   :  { %1007 = vrot.lane.b32.xlu1 %v3828_v54, %s3172_s21  ;;  %1097 = vrot.lane.b32.xlu0 %v3631_v61, %s3173_s22 }
 0x1cc   :  { %v3868_v8 = vpop.permute.xlu1 %555  ;;  %v3870_v57 = vpop.permute.xlu0 %1267 }
 0x1cd   :  { %6354 = vst [vmem:[#allocation30_spill] sm:$0xff] %v3868_v8  ;;  %6355 = vst [vmem:[#allocation31_spill] sm:$0xff] %v3870_v57  ;;  %v3888_v57 = vld [vmem:[#allocation2 + $0x16f] sm:$0xff] }
 0x1ce   :  { %1107 = vrot.lane.b32.xlu1 %v3828_v54, %s3173_s22  ;;  %1179 = vrot.lane.b32.xlu0 %v3452_v2, %s3172_s21 }
 0x1d0   :  { %v3876_v19 = vpop.permute.xlu1 %737  ;;  %v3878_v27 = vpop.permute.xlu0 %464 }
 0x1d1   :  { %6356 = vst [vmem:[#allocation32_spill] sm:$0xff] %v3876_v19 }
 0x1d2   :  { %1189 = vrot.lane.b32.xlu1 %v3502_v41, %s3172_s21  ;;  %1279 = vrot.lane.b32.xlu0 %v3452_v2, %s3173_s22 }
 0x1d4   :  { %v3884_v36 = vpop.permute.xlu1 %919  ;;  %v3886_v62 = vpop.permute.xlu0 %729 }
 0x1d5   :  { %6357 = vst [vmem:[#allocation33_spill] sm:$0xff] %v3884_v36  ;;  %6358 = vst [vmem:[#allocation34_spill] sm:$0xff] %v3886_v62  ;;  %v3906_v62 = vld [vmem:[#allocation2 + $0x171] sm:$0xff] }
 0x1d6   :  { %561 = vrot.lane.b32.xlu1 %v3888_v57, %s3173_s22  ;;  %1361 = vrot.lane.b32.xlu0 %v3654_v12, %s3172_s21  ;;  %6363 = vst [vmem:[#allocation39_spill] sm:$0xff] %v3906_v62 }
 0x1d8   :  { %v3894_v19 = vpop.permute.xlu1 %999  ;;  %v3896_v8 = vpop.permute.xlu0 %811 }
 0x1d9   :  { %6359 = vst [vmem:[#allocation35_spill] sm:$0xff] %v3894_v19  ;;  %6360 = vst [vmem:[#allocation36_spill] sm:$0xff] %v3896_v8 }
 0x1da   :  { %743 = vrot.lane.b32.xlu1 %v3504_v42, %s3173_s22  ;;  %476 = vrot.lane.b32.xlu0 %v3723_v26, %s3172_s21 }
 0x1dc   :  { %v3902_v2 = vpop.permute.xlu1 %1099  ;;  %v3904_v36 = vpop.permute.xlu0 %911 }
 0x1dd   :  { %6361 = vst [vmem:[#allocation37_spill] sm:$0xff] %v3902_v2  ;;  %6362 = vst [vmem:[#allocation38_spill] sm:$0xff] %v3904_v36 }
 0x1de   :  { %825 = vrot.lane.b32.xlu1 %v3906_v62, %s3172_s21  ;;  %559 = vrot.lane.b32.xlu0 %v3723_v26, %s3173_s22 }
 0x1e0   :  { %v3912_v19 = vpop.permute.xlu1 %1181  ;;  %v3914_v8 = vpop.permute.xlu0 %991 }
 0x1e1   :  { %6364 = vst [vmem:[#allocation40_spill] sm:$0xff] %v3912_v19  ;;  %6365 = vst [vmem:[#allocation41_spill] sm:$0xff] %v3914_v8 }
 0x1e2   :  { %925 = vrot.lane.b32.xlu1 %v3906_v62, %s3173_s22  ;;  %741 = vrot.lane.b32.xlu0 %v3466_v14, %s3173_s22 }
 0x1e4   :  { %v3920_v2 = vpop.permute.xlu1 %1281  ;;  %v3922_v36 = vpop.permute.xlu0 %1091 }
 0x1e5   :  { %6366 = vst [vmem:[#allocation42_spill] sm:$0xff] %v3920_v2  ;;  %6367 = vst [vmem:[#allocation43_spill] sm:$0xff] %v3922_v36 }
 0x1e6   :  { %1005 = vrot.lane.b32.xlu1 %v3888_v57, %s3172_s21  ;;  %557 = vrot.lane.b32.xlu0 %v3762_v3, %s3173_s22 }
 0x1e8   :  { %v3928_v45 = vpop.permute.xlu1 %1363  ;;  %v3930_v19 = vpop.permute.xlu0 %1173 }
 0x1e9   :  { %6368 = vst [vmem:[#allocation44_spill] sm:$0xff] %v3928_v45  ;;  %6369 = vst [vmem:[#allocation45_spill] sm:$0xff] %v3930_v19  ;;  %v3948_v19 = vld [vmem:[#allocation2 + $0x1b7] sm:$0xff] }
 0x1ea   :  { %1105 = vrot.lane.b32.xlu1 %v3888_v57, %s3173_s22  ;;  %639 = vrot.lane.b32.xlu0 %v3469_v17, %s3172_s21  ;;  %6373 = vst [vmem:[#allocation49_spill] sm:$0xff] %v3948_v19 }
 0x1ec   :  { %v3936_v8 = vpop.permute.xlu1 %470  ;;  %v3938_v2 = vpop.permute.xlu0 %545 }
 0x1ed   :  { %6370 = vst [vmem:[#allocation46_spill] sm:$0xff] %v3936_v8 }
 0x1ee   :  { %1187 = vrot.lane.b32.xlu1 %v3504_v42, %s3172_s21  ;;  %739 = vrot.lane.b32.xlu0 %v3469_v17, %s3173_s22 }
 0x1f0   :  { %v3944_v36 = vpop.permute.xlu1 %553  ;;  %v3946_v45 = vpop.permute.xlu0 %727 }
 0x1f1   :  { %6371 = vst [vmem:[#allocation47_spill] sm:$0xff] %v3944_v36  ;;  %6372 = vst [vmem:[#allocation48_spill] sm:$0xff] %v3946_v45  ;;  %v4264_v45 = vld [vmem:[%s6291_s3 + $0x80] sm:$0xff] }
 0x1f2   :  { %1011 = vrot.lane.b32.xlu1 %v3948_v19, %s3172_s21  ;;  %821 = vrot.lane.b32.xlu0 %v3779_v9, %s3172_s21  ;;  %v4305_v63 = vmul.f32 %v4264_v45, %v3442_v56  ;;  %v4309_v10 = vmul.f32 %v4264_v45, %v3476_v18 }
 0x1f4   :  { %v3954_v8 = vpop.permute.xlu1 %735  ;;  %v3956_v52 = vpop.permute.xlu0 %809  ;;  %6450 = vst [vmem:[#allocation126_spill] sm:$0xff] %v4305_v63  ;;  %6451 = vst [vmem:[#allocation127_spill] sm:$0xff] %v4309_v10  ;;  %v3102_v63 = vld [vmem:[#allocation2 + $0x80] sm:$0xff] }
 0x1f5   :  { %6374 = vst [vmem:[#allocation50_spill] sm:$0xff] %v3954_v8  ;;  %6375 = vst [vmem:[#allocation51_spill] sm:$0xff] %v3956_v52  ;;  %v6461_v10 = vld [vmem:[#allocation3_spill] sm:$0xff] }
 0x1f6   :  { %647 = vrot.lane.b32.xlu1 %v3584_v21, %s3172_s21  ;;  %563 = vrot.lane.b32.xlu0 %v3828_v54, %s3173_s22 }
 0x1f8   :  { %v3962_v17 = vpop.permute.xlu1 %917  ;;  %v3964_v36 = vpop.permute.xlu0 %909 }
 0x1f9   :  { %6376 = vst [vmem:[#allocation52_spill] sm:$0xff] %v3962_v17  ;;  %6377 = vst [vmem:[#allocation53_spill] sm:$0xff] %v3964_v36 }
 0x1fa   :  { %747 = vrot.lane.b32.xlu1 %v3584_v21, %s3173_s22  ;;  %645 = vrot.lane.b32.xlu0 %v3502_v41, %s3172_s21 }
 0x1fc   :  { %v3970_v59 = vpop.permute.xlu1 %641  ;;  %v3972_v8 = vpop.permute.xlu0 %989 }
 0x1fd   :  { %6378 = vst [vmem:[#allocation54_spill] sm:$0xff] %v3970_v59  ;;  %6379 = vst [vmem:[#allocation55_spill] sm:$0xff] %v3972_v8 }
 0x1fe   :  { %829 = vrot.lane.b32.xlu1 %v3974_v37, %s3172_s21  ;;  %478 = vrot.lane.b32.xlu0 %v3888_v57, %s3172_s21 }
 0x200   :  { %v3980_v17 = vpop.permute.xlu1 %823  ;;  %v3982_v36 = vpop.permute.xlu0 %1089 }
 0x201   :  { %6380 = vst [vmem:[#allocation56_spill] sm:$0xff] %v3980_v17  ;;  %6381 = vst [vmem:[#allocation57_spill] sm:$0xff] %v3982_v36 }
 0x202   :  { %929 = vrot.lane.b32.xlu1 %v3974_v37, %s3173_s22  ;;  %643 = vrot.lane.b32.xlu0 %v3504_v42, %s3172_s21 }
 0x204   :  { %v3988_v59 = vpop.permute.xlu1 %923  ;;  %v3990_v8 = vpop.permute.xlu0 %1171 }
 0x205   :  { %6382 = vst [vmem:[#allocation58_spill] sm:$0xff] %v3988_v59  ;;  %6383 = vst [vmem:[#allocation59_spill] sm:$0xff] %v3990_v8 }
 0x206   :  { %1009 = vrot.lane.b32.xlu1 %v3992_v25, %s3172_s21  ;;  %482 = vrot.lane.b32.xlu0 %v3992_v25, %s3172_s21 }
 0x208   :  { %v3998_v17 = vpop.permute.xlu1 %1003  ;;  %v4000_v36 = vpop.permute.xlu0 %995 }
 0x209   :  { %6384 = vst [vmem:[#allocation60_spill] sm:$0xff] %v3998_v17  ;;  %6385 = vst [vmem:[#allocation61_spill] sm:$0xff] %v4000_v36  ;;  %v4018_v36 = vld [vmem:[#allocation2 + $0x51] sm:$0xff] }
 0x20a   :  { %1109 = vrot.lane.b32.xlu1 %v3992_v25, %s3173_s22  ;;  %565 = vrot.lane.b32.xlu0 %v3992_v25, %s3173_s22  ;;  %6390 = vst [vmem:[#allocation66_spill] sm:$0xff] %v4018_v36 }
 0x20c   :  { %v4006_v59 = vpop.permute.xlu1 %1103  ;;  %v4008_v8 = vpop.permute.xlu0 %631 }
 0x20d   :  { %6386 = vst [vmem:[#allocation62_spill] sm:$0xff] %v4006_v59  ;;  %6387 = vst [vmem:[#allocation63_spill] sm:$0xff] %v4008_v8 }
 0x20e   :  { %1285 = vrot.lane.b32.xlu1 %v3466_v14, %s3173_s22  ;;  %1269 = vrot.lane.b32.xlu0 %v3415_v13, %s3173_s22 }
 0x210   :  { %v4014_v52 = vpop.permute.xlu1 %1185  ;;  %v4016_v17 = vpop.permute.xlu0 %731 }
 0x211   :  { %6388 = vst [vmem:[#allocation64_spill] sm:$0xff] %v4014_v52  ;;  %6389 = vst [vmem:[#allocation65_spill] sm:$0xff] %v4016_v17  ;;  %v4036_v52 = vld [vmem:[#allocation2 + $0xb0] sm:$0xff] }
 0x212   :  { %1365 = vrot.lane.b32.xlu1 %v3779_v9, %s3172_s21  ;;  %1349 = vrot.lane.b32.xlu0 %v4018_v36, %s3172_s21  ;;  %6395 = vst [vmem:[#allocation71_spill] sm:$0xff] %v4036_v52  ;;  %v4054_v17 = vld [vmem:[#allocation2 + $0x69] sm:$0xff] }
 0x214   :  { %v4024_v59 = vpop.permute.xlu1 %474  ;;  %v4026_v8 = vpop.permute.xlu0 %813 }
 0x215   :  { %6391 = vst [vmem:[#allocation67_spill] sm:$0xff] %v4024_v59  ;;  %6392 = vst [vmem:[#allocation68_spill] sm:$0xff] %v4026_v8 }
 0x216   :  { %1111 = vrot.lane.b32.xlu1 %v3948_v19, %s3173_s22  ;;  %1095 = vrot.lane.b32.xlu0 %v3725_v60, %s3173_s22 }
 0x218   :  { %v4032_v13 = vpop.permute.xlu1 %921  ;;  %v4034_v14 = vpop.permute.xlu0 %913 }
 0x219   :  { %6393 = vst [vmem:[#allocation69_spill] sm:$0xff] %v4032_v13  ;;  %6394 = vst [vmem:[#allocation70_spill] sm:$0xff] %v4034_v14 }
 0x21a   :  { %1191 = vrot.lane.b32.xlu1 %v3584_v21, %s3172_s21  ;;  %1175 = vrot.lane.b32.xlu0 %v4036_v52, %s3172_s21 }
 0x21c   :  { %v4042_v59 = vpop.permute.xlu1 %1001  ;;  %v4044_v8 = vpop.permute.xlu0 %993 }
 0x21d   :  { %6396 = vst [vmem:[#allocation72_spill] sm:$0xff] %v4042_v59  ;;  %6397 = vst [vmem:[#allocation73_spill] sm:$0xff] %v4044_v8 }
 0x21e   :  { %1287 = vrot.lane.b32.xlu1 %v3504_v42, %s3173_s22  ;;  %1271 = vrot.lane.b32.xlu0 %v3427_v38, %s3173_s22 }
 0x220   :  { %v4050_v13 = vpop.permute.xlu1 %1101  ;;  %v4052_v14 = vpop.permute.xlu0 %1093 }
 0x221   :  { %6398 = vst [vmem:[#allocation74_spill] sm:$0xff] %v4050_v13  ;;  %6399 = vst [vmem:[#allocation75_spill] sm:$0xff] %v4052_v14  ;;  %v4080_v13 = vld [vmem:[#allocation2 + $0xc8] sm:$0xff] }
 0x222   :  { %1367 = vrot.lane.b32.xlu1 %v3690_v24, %s3172_s21  ;;  %1351 = vrot.lane.b32.xlu0 %v4054_v17, %s3172_s21 }
 0x224   :  { %v4060_v59 = vpop.permute.xlu1 %1183  ;;  %v4062_v8 = vpop.permute.xlu0 %472 }
 0x225   :  { %6400 = vst [vmem:[#allocation76_spill] sm:$0xff] %v4060_v59  ;;  %6401 = vst [vmem:[#allocation77_spill] sm:$0xff] %v4062_v8 }
 0x226   :  { %1447 = vrot.lane.b32.xlu1 %v3442_v56, %s3173_s22  ;;  %1445 = vrot.lane.b32.xlu0 %v3476_v18, %s3173_s22 }
 0x228   :  { %v4068_v38 = vpop.permute.xlu1 %1283  ;;  %v4070_v42 = vpop.permute.xlu0 %637 }
 0x229   :  { %6402 = vst [vmem:[#allocation78_spill] sm:$0xff] %v4068_v38  ;;  %6403 = vst [vmem:[#allocation79_spill] sm:$0xff] %v4070_v42 }
 0x22a   :  { %1463 = vrot.lane.b32.xlu1 %v3580_v15, %s3173_s22  ;;  %1461 = vrot.lane.b32.xlu0 %v3654_v12, %s3173_s22 }
 0x22c   :  { %v4076_v14 = vpop.permute.xlu1 %480  ;;  %v4078_v59 = vpop.permute.xlu0 %819 }
 0x22d   :  { %6404 = vst [vmem:[#allocation80_spill] sm:$0xff] %v4076_v14  ;;  %6405 = vst [vmem:[#allocation81_spill] sm:$0xff] %v4078_v59 }
 0x22e   :  { %1193 = vrot.lane.b32.xlu1 %v3582_v20, %s3172_s21  ;;  %1177 = vrot.lane.b32.xlu0 %v4080_v13, %s3172_s21 }
 0x230   :  { %v4086_v38 = vpop.permute.xlu1 %745  ;;  %v4088_v42 = vpop.permute.xlu0 %635 }
 0x231   :  { %6406 = vst [vmem:[#allocation82_spill] sm:$0xff] %v4086_v38  ;;  %6407 = vst [vmem:[#allocation83_spill] sm:$0xff] %v4088_v42  ;;  %v4126_v42 = vld [vmem:[#allocation2 + $0x127] sm:$0xff] }
 0x232   :  { %1289 = vrot.lane.b32.xlu1 %v3502_v41, %s3173_s22  ;;  %1273 = vrot.lane.b32.xlu0 %v3423_v32, %s3173_s22 }
 0x234   :  { %v4094_v14 = vpop.permute.xlu1 %827  ;;  %v4096_v59 = vpop.permute.xlu0 %817 }
 0x235   :  { %6408 = vst [vmem:[#allocation84_spill] sm:$0xff] %v4094_v14  ;;  %6409 = vst [vmem:[#allocation85_spill] sm:$0xff] %v4096_v59  ;;  %v4114_v14 = vld [vmem:[#allocation2 + $0x4f] sm:$0xff]  ;;  %v4116_v59 = vld [vmem:[#allocation2 + $0x37] sm:$0xff] }
 0x236   :  { %1369 = vrot.lane.b32.xlu1 %v3906_v62, %s3172_s21  ;;  %1353 = vrot.lane.b32.xlu0 %v3645_v58, %s3172_s21 }
 0x238   :  { %v4102_v8 = vpop.permute.xlu1 %927  ;;  %v4104_v38 = vpop.permute.xlu0 %997 }
 0x239   :  { %6410 = vst [vmem:[#allocation86_spill] sm:$0xff] %v4102_v8  ;;  %6411 = vst [vmem:[#allocation87_spill] sm:$0xff] %v4104_v38 }
 0x23a   :  { %1465 = vrot.lane.b32.xlu1 %v3779_v9, %s3173_s22  ;;  %1449 = vrot.lane.b32.xlu0 %v4018_v36, %s3173_s22 }
 0x23c   :  { %v4110_v32 = vpop.permute.xlu1 %1007  ;;  %v4112_v41 = vpop.permute.xlu0 %1097 }
 0x23d   :  { %6412 = vst [vmem:[#allocation88_spill] sm:$0xff] %v4110_v32  ;;  %6413 = vst [vmem:[#allocation89_spill] sm:$0xff] %v4112_v41 }
 0x23e   :  { %1530 = vrot.lane.b32.xlu1 %v4114_v14, %s3172_s21  ;;  %1528 = vrot.lane.b32.xlu0 %v4116_v59, %s3172_s21 }
 0x240   :  { %v4122_v8 = vpop.permute.xlu1 %1107  ;;  %v4124_v38 = vpop.permute.xlu0 %1179 }
 0x241   :  { %6414 = vst [vmem:[#allocation90_spill] sm:$0xff] %v4122_v8  ;;  %6415 = vst [vmem:[#allocation91_spill] sm:$0xff] %v4124_v38 }
 0x242   :  { %1546 = vrot.lane.b32.xlu1 %v3762_v3, %s3172_s21  ;;  %1544 = vrot.lane.b32.xlu0 %v4126_v42, %s3172_s21 }
 0x244   :  { %v4132_v32 = vpop.permute.xlu1 %1189  ;;  %v4134_v41 = vpop.permute.xlu0 %1279 }
 0x245   :  { %6416 = vst [vmem:[#allocation92_spill] sm:$0xff] %v4132_v32  ;;  %6417 = vst [vmem:[#allocation93_spill] sm:$0xff] %v4134_v41 }
 0x246   :  { %1291 = vrot.lane.b32.xlu1 %v3584_v21, %s3173_s22  ;;  %1275 = vrot.lane.b32.xlu0 %v4036_v52, %s3173_s22 }
 0x248   :  { %v4140_v8 = vpop.permute.xlu1 %561  ;;  %v4142_v38 = vpop.permute.xlu0 %1361 }
 0x249   :  { %6418 = vst [vmem:[#allocation94_spill] sm:$0xff] %v4140_v8  ;;  %6419 = vst [vmem:[#allocation95_spill] sm:$0xff] %v4142_v38  ;;  %v4162_v8 = vld [vmem:[#allocation2 + $0x67] sm:$0xff] }
 0x24a   :  { %1371 = vrot.lane.b32.xlu1 %v3846_v47, %s3172_s21  ;;  %1355 = vrot.lane.b32.xlu0 %v4144_v7, %s3172_s21 }
 0x24c   :  { %v4150_v32 = vpop.permute.xlu1 %743  ;;  %v4152_v41 = vpop.permute.xlu0 %476 }
 0x24d   :  { %6420 = vst [vmem:[#allocation96_spill] sm:$0xff] %v4150_v32  ;;  %6421 = vst [vmem:[#allocation97_spill] sm:$0xff] %v4152_v41 }
 0x24e   :  { %1467 = vrot.lane.b32.xlu1 %v3690_v24, %s3173_s22  ;;  %1451 = vrot.lane.b32.xlu0 %v4054_v17, %s3173_s22 }
 0x250   :  { %v4158_v21 = vpop.permute.xlu1 %825  ;;  %v4160_v38 = vpop.permute.xlu0 %559 }
 0x251   :  { %6422 = vst [vmem:[#allocation98_spill] sm:$0xff] %v4158_v21  ;;  %6423 = vst [vmem:[#allocation99_spill] sm:$0xff] %v4160_v38 }
 0x252   :  { %1548 = vrot.lane.b32.xlu1 %v3723_v26, %s3172_s21  ;;  %1532 = vrot.lane.b32.xlu0 %v4162_v8, %s3172_s21 }
 0x254   :  { %v4168_v32 = vpop.permute.xlu1 %925  ;;  %v4170_v41 = vpop.permute.xlu0 %741 }
 0x255   :  { %6424 = vst [vmem:[#allocation100_spill] sm:$0xff] %v4168_v32  ;;  %6425 = vst [vmem:[#allocation101_spill] sm:$0xff] %v4170_v41  ;;  %v4196_v41 = vld [vmem:[#allocation2 + $0x7f] sm:$0xff] }
 0x256   :  { %1293 = vrot.lane.b32.xlu1 %v3582_v20, %s3173_s22  ;;  %1277 = vrot.lane.b32.xlu0 %v4080_v13, %s3173_s22 }
 0x258   :  { %v4176_v21 = vpop.permute.xlu1 %1005  ;;  %v4178_v38 = vpop.permute.xlu0 %557 }
 0x259   :  { %6426 = vst [vmem:[#allocation102_spill] sm:$0xff] %v4176_v21  ;;  %6427 = vst [vmem:[#allocation103_spill] sm:$0xff] %v4178_v38 }
 0x25a   :  { %1373 = vrot.lane.b32.xlu1 %v3974_v37, %s3172_s21  ;;  %1357 = vrot.lane.b32.xlu0 %v3764_v51, %s3172_s21 }
 0x25c   :  { %v4184_v39 = vpop.permute.xlu1 %1105  ;;  %v4186_v32 = vpop.permute.xlu0 %639 }
 0x25d   :  { %6428 = vst [vmem:[#allocation104_spill] sm:$0xff] %v4184_v39  ;;  %6429 = vst [vmem:[#allocation105_spill] sm:$0xff] %v4186_v32 }
 0x25e   :  { %1469 = vrot.lane.b32.xlu1 %v3906_v62, %s3173_s22  ;;  %1453 = vrot.lane.b32.xlu0 %v3645_v58, %s3173_s22 }
 0x260   :  { %v4192_v20 = vpop.permute.xlu1 %1187  ;;  %v4194_v21 = vpop.permute.xlu0 %739 }
 0x261   :  { %6430 = vst [vmem:[#allocation106_spill] sm:$0xff] %v4192_v20  ;;  %6431 = vst [vmem:[#allocation107_spill] sm:$0xff] %v4194_v21 }
 0x262   :  { %1550 = vrot.lane.b32.xlu1 %v3888_v57, %s3172_s21  ;;  %1534 = vrot.lane.b32.xlu0 %v4196_v41, %s3172_s21 }
 0x264   :  { %v4202_v39 = vpop.permute.xlu1 %1011  ;;  %v4204_v32 = vpop.permute.xlu0 %821 }
 0x265   :  { %6432 = vst [vmem:[#allocation108_spill] sm:$0xff] %v4202_v39  ;;  %6433 = vst [vmem:[#allocation109_spill] sm:$0xff] %v4204_v32  ;;  %v4222_v32 = vld [vmem:[#allocation2 + $0x1b9] sm:$0xff] }
 0x266   :  { %1630 = vrot.lane.b32.xlu1 %v4114_v14, %s3173_s22  ;;  %1628 = vrot.lane.b32.xlu0 %v4116_v59, %s3173_s22  ;;  %6438 = vst [vmem:[#allocation114_spill] sm:$0xff] %v4222_v32 }
 0x268   :  { %v4210_v20 = vpop.permute.xlu1 %647  ;;  %v4212_v21 = vpop.permute.xlu0 %563 }
 0x269   :  { %6434 = vst [vmem:[#allocation110_spill] sm:$0xff] %v4210_v20  ;;  %6435 = vst [vmem:[#allocation111_spill] sm:$0xff] %v4212_v21 }
 0x26a   :  { %1646 = vrot.lane.b32.xlu1 %v3762_v3, %s3173_s22  ;;  %1644 = vrot.lane.b32.xlu0 %v4126_v42, %s3173_s22 }
 0x26c   :  { %v4218_v38 = vpop.permute.xlu1 %747  ;;  %v4220_v39 = vpop.permute.xlu0 %645 }
 0x26d   :  { %6436 = vst [vmem:[#allocation112_spill] sm:$0xff] %v4218_v38  ;;  %6437 = vst [vmem:[#allocation113_spill] sm:$0xff] %v4220_v39  ;;  %v3064_v38 = vunpack.i.h.bf16 %v3602_v22 }
 0x26e   :  { %1375 = vrot.lane.b32.xlu1 %v4222_v32, %s3172_s21  ;;  %1359 = vrot.lane.b32.xlu0 %v4224_v49, %s3172_s21  ;;  %v4297_v32 = vld [vmem:[%s6291_s3 + $0x38] sm:$0xff] }
 0x26f   :  { %v4301_v55 = vmul.f32 %v4297_v32, %v3442_v56  ;;  %v4321_v48 = vmul.f32 %v4297_v32, %v3532_v46  ;;  %v4343_v46 = vld [vmem:[%s6291_s3 + $0x10] sm:$0xff] }
 0x270   :  { %v4230_v20 = vpop.permute.xlu1 %829  ;;  %v4232_v21 = vpop.permute.xlu0 %478 }
 0x271   :  { %6440 = vst [vmem:[#allocation116_spill] sm:$0xff] %v4230_v20  ;;  %6441 = vst [vmem:[#allocation117_spill] sm:$0xff] %v4232_v21  ;;  %v941_v20 = vmul.f32 %v3064_v38, %v3659_v23  ;;  %v4253_v21 = vld [vmem:[%s6291_s3] sm:$0xff]  ;;  %v4269_v38 = vld [vmem:[%s6291_s3 + $0x8] sm:$0xff] }
 0x272   :  { %1471 = vrot.lane.b32.xlu1 %v3846_v47, %s3173_s22  ;;  %1455 = vrot.lane.b32.xlu0 %v4144_v7, %s3173_s22  ;;  %v488_v22 = vmul.f32 %v4253_v21, %v3826_v30  ;;  %v4280_v30 = vld [vmem:[%s6291_s3 + $0x20] sm:$0xff] }
 0x273   :  { %v4292_v49 = vadd.f32 %v941_v20, %v3405_v50  ;;  %v4327_v18 = vmul.f32 %v3102_v63, %v4280_v30 }
 0x274   :  { %v4239_v39 = vpop.permute.xlu1 %929  ;;  %v4241_v43 = vpop.permute.xlu0 %643 }
 0x275   :  { %6442 = vst [vmem:[#allocation118_spill] sm:$0xff] %v4239_v39  ;;  %6443 = vst [vmem:[#allocation119_spill] sm:$0xff] %v4241_v43 }
 0x276   :  { %1552 = vrot.lane.b32.xlu1 %v3828_v54, %s3172_s21  ;;  %1536 = vrot.lane.b32.xlu0 %v4243_v11, %s3172_s21  ;;  %v506_v11 = vmul.f32 %v4269_v38, %v3516_v44  ;;  %6449 = vst [vmem:[#allocation125_spill] sm:$0xff] %v4292_v49  ;;  %v4317_v49 = vmul.f32 %v3676_v28, %v3496_v33  ;;  %6456 = vst [vmem:[#allocation132_spill] sm:$0xff] %v4327_v18 }
 0x277   :  { %v4335_v33 = vmul.f32 %v3676_v28, %v3516_v44  ;;  %v4353_v44 = vmul.f32 %v4269_v38, %v6461_v10 }
 0x278   :  { %v4257_v39 = vpop.permute.xlu1 %1009  ;;  %v4259_v43 = vpop.permute.xlu0 %482  ;;  %6454 = vst [vmem:[#allocation130_spill] sm:$0xff] %v4317_v49 }
 0x279   :  { %6445 = vst [vmem:[#allocation121_spill] sm:$0xff] %v4257_v39  ;;  %6446 = vst [vmem:[#allocation122_spill] sm:$0xff] %v4259_v43  ;;  %v3098_v39 = vld [vmem:[#allocation2 + $0x50] sm:$0xff] }
 0x27a   :  { %1648 = vrot.lane.b32.xlu1 %v3723_v26, %s3173_s22  ;;  %1632 = vrot.lane.b32.xlu0 %v4162_v8, %s3173_s22  ;;  %v4283_v43 = vmul.f32 %v3098_v39, %v4280_v30  ;;  %v4289_v19 = vmul.f32 %v3098_v39, %v3714_v40  ;;  %v522_v39 = vadd.f32 %v506_v11, %v488_v22  ;;  %v4329_v11 = vld [vmem:[#allocation2 + $0x50] sm:$0xff]  ;;  %v4331_v22 = vld [vmem:[#allocation2 + $0x38] sm:$0xff] }
 0x27b   :  { %6457 = vst [vmem:[#allocation133_spill] sm:$0xff] %v4329_v11  ;;  %6458 = vst [vmem:[#allocation134_spill] sm:$0xff] %v4331_v22 }
 0x27c   :  { %6448 = vst [vmem:[#allocation124_spill] sm:$0xff] %v4289_v19  ;;  %v4311_v50 = vpop.permute.xlu1 %1109  ;;  %v4313_v20 = vpop.permute.xlu0 %565  ;;  %v3101_v19 = vld [vmem:[#allocation2 + $0x98] sm:$0xff]  ;;  %6459 = vst [vmem:[#allocation135_spill] sm:$0xff] %v4335_v33  ;;  %v4376_v33 = vmul.f32 %v3102_v63, %v3714_v40 }
 0x27d   :  { %6452 = vst [vmem:[#allocation128_spill] sm:$0xff] %v4311_v50  ;;  %6453 = vst [vmem:[#allocation129_spill] sm:$0xff] %v4313_v20  ;;  %v4324_v56 = vmul.f32 %v3101_v19, %v4280_v30  ;;  %v4338_v50 = vmul.f32 %v3101_v19, %v3714_v40  ;;  %v572_v20 = vmul.f32 %v4343_v46, %v3774_v4  ;;  %v6462_v19 = vld [vmem:[#allocation4_spill] sm:$0xff] }
 0x27e   :  { %1712 = vrot.lane.b32.xlu1 %v4329_v11, %s3172_s21  ;;  %1710 = vrot.lane.b32.xlu0 %v4331_v22, %s3172_s21  ;;  %v4365_v4 = vmul.f32 %v3676_v28, %v6461_v10  ;;  %v4369_v11 = vmul.f32 %v4297_v32, %v3645_v58  ;;  %v4373_v22 = vmul.f32 %v3676_v28, %v6462_v19 }
 0x27f   :  { %6455 = vst [vmem:[#allocation131_spill] sm:$0xff] %v4324_v56  ;;  %6460 = vst [vmem:[#allocation136_spill] sm:$0xff] %v4338_v50  ;;  %v4357_v50 = vmul.f32 %v4269_v38, %v6462_v19  ;;  %v6463_v56 = vld [vmem:[#allocation5_spill] sm:$0xff]  ;;  %v588_v18 = vadd.f32 %v572_v20, %v522_v39  ;;  %v4397_v39 = vld [vmem:[%s6291_s3 + $0x98] sm:$0xff] }
 0x280   :  { %v4361_v49 = vmul.f32 %v4297_v32, %v6463_v56  ;;  %6465 = vst [vmem:[#allocation4_spill] sm:$0xff] %v4365_v4  ;;  %6466 = vst [vmem:[#allocation5_spill] sm:$0xff] %v4369_v11  ;;  %v4378_v29 = vpop.permute.xlu1 %1285  ;;  %v4380_v56 = vpop.permute.xlu0 %1269  ;;  %v3105_v11 = vld [vmem:[#allocation2 + $0x110] sm:$0xff]  ;;  %v4399_v20 = vld [vmem:[#allocation2 + $0x140] sm:$0xff] }
 0x281   :  { %6467 = vst [vmem:[#allocation137_spill] sm:$0xff] %v4376_v33  ;;  %6468 = vst [vmem:[#allocation138_spill] sm:$0xff] %v4378_v29  ;;  %v4389_v62 = vmul.f32 %v3105_v11, %v4280_v30  ;;  %v3106_v19 = vld [vmem:[#allocation2 + $0xb0] sm:$0xff]  ;;  %v4401_v29 = vld [vmem:[#allocation2 + $0x128] sm:$0xff]  ;;  %v4423_v33 = vmul.f32 %v3676_v28, %v3725_v60  ;;  %v4443_v60 = vmul.f32 %v4397_v39, %v4116_v59 }
 0x282   :  { %6464 = vst [vmem:[#allocation3_spill] sm:$0xff] %v4361_v49  ;;  %6469 = vst [vmem:[#allocation139_spill] sm:$0xff] %v4380_v56  ;;  %v3104_v49 = vld [vmem:[#allocation2 + $0x128] sm:$0xff]  ;;  %v4392_v63 = vmul.f32 %v3106_v19, %v4280_v30  ;;  %v4411_v19 = vmul.f32 %v3105_v11, %v3714_v40  ;;  %v4415_v56 = vmul.f32 %v4264_v45, %v4018_v36  ;;  %1728 = vrot.lane.b32.xlu1 %v4399_v20, %s3172_s21 }
 0x283   :  { %v4383_v10 = vmul.f32 %v3104_v49, %v4280_v30  ;;  %v4386_v4 = vmul.f32 %v3104_v49, %v3714_v40  ;;  %v4406_v49 = vld [vmem:[%s6291_s3 + $0x18] sm:$0xff]  ;;  %1726 = vrot.lane.b32.xlu0 %v4401_v29, %s3172_s21  ;;  %v4431_v11 = vmul.f32 %v4264_v45, %v3645_v58  ;;  %v4439_v36 = vmul.f32 %v3714_v40, %v4080_v13 }
 0x284   :  { %6471 = vst [vmem:[#allocation141_spill] sm:$0xff] %v4411_v19  ;;  %6472 = vst [vmem:[#allocation142_spill] sm:$0xff] %v4415_v56  ;;  %v4435_v56 = vmul.f32 %v4397_v39, %v4114_v14  ;;  %v4451_v58 = vpop.permute.xlu0 %1349  ;;  %v4455_v14 = vmul.f32 %v4269_v38, %v3558_v31  ;;  %v4459_v13 = vmul.f32 %v4297_v32, %v3764_v51 }
 0x285   :  { %6470 = vst [vmem:[#allocation140_spill] sm:$0xff] %v4386_v4  ;;  %v654_v4 = vmul.f32 %v4406_v49, %v3788_v6  ;;  %v4427_v6 = vmul.f32 %v4264_v45, %v4054_v17  ;;  %6474 = vst [vmem:[#allocation144_spill] sm:$0xff] %v4431_v11  ;;  %v4447_v17 = vmul.f32 %v4264_v45, %v4144_v7  ;;  %v3110_v11 = vld [vmem:[#allocation2 + $0x140] sm:$0xff] }
 0x286   :  { %6475 = vst [vmem:[#allocation145_spill] sm:$0xff] %v4435_v56  ;;  %6476 = vst [vmem:[#allocation146_spill] sm:$0xff] %v4439_v36  ;;  %v4463_v59 = vmul.f32 %v4397_v39, %v4162_v8  ;;  %v4467_v7 = vmul.f32 %v4397_v39, %v4196_v41  ;;  %v4474_v36 = vmul.f32 %v3676_v28, %v3558_v31  ;;  %1473 = vrot.lane.b32.xlu1 %v3974_v37, %s3173_s22  ;;  %v4495_v31 = vld [vmem:[%s6291_s3 + $0x28] sm:$0xff] }
 0x287   :  { %6473 = vst [vmem:[#allocation143_spill] sm:$0xff] %v4427_v6  ;;  %v670_v19 = vadd.f32 %v654_v4, %v588_v18  ;;  %6477 = vst [vmem:[#allocation147_spill] sm:$0xff] %v4443_v60  ;;  %v4449_v6 = vpop.permute.xlu1 %1365  ;;  %v3108_v18 = vld [vmem:[#allocation2 + $0x158] sm:$0xff]  ;;  %1457 = vrot.lane.b32.xlu0 %v3764_v51, %s3173_s22  ;;  %v4486_v8 = vmul.f32 %v4269_v38, %v3570_v0  ;;  %v4504_v51 = vmul.f32 %v3676_v28, %v3570_v0 }
 0x288   :  { %6478 = vst [vmem:[#allocation148_spill] sm:$0xff] %v4447_v17  ;;  %6479 = vst [vmem:[#allocation149_spill] sm:$0xff] %v4449_v6  ;;  %v4470_v4 = vmul.f32 %v3108_v18, %v4280_v30  ;;  %v4478_v17 = vmul.f32 %v3714_v40, %v4036_v52  ;;  %v4500_v6 = vmul.f32 %v3108_v18, %v3714_v40  ;;  %v6491_v18 = vld [vmem:[#allocation9_spill] sm:$0xff] }
 0x289   :  { %6480 = vst [vmem:[#allocation150_spill] sm:$0xff] %v4451_v58  ;;  %6481 = vst [vmem:[#allocation151_spill] sm:$0xff] %v4463_v59  ;;  %v4512_v58 = vmul.f32 %v4269_v38, %v3631_v61  ;;  %v704_v60 = vadd.f32 %v4283_v43, %v670_v19  ;;  %v4522_v0 = vmul.f32 %v4297_v32, %v3654_v12  ;;  %v4529_v52 = vld [vmem:[#allocation2 + $0xaf] sm:$0xff] }
 0x28a   :  { %6482 = vst [vmem:[#allocation152_spill] sm:$0xff] %v4467_v7  ;;  %6483 = vst [vmem:[#allocation153_spill] sm:$0xff] %v4474_v36  ;;  %v4490_v7 = vmul.f32 %v4297_v32, %v3580_v15  ;;  %v4508_v36 = vmul.f32 %v4264_v45, %v3580_v15  ;;  %v4525_v15 = vmul.f32 %v3110_v11, %v3714_v40  ;;  %1554 = vrot.lane.b32.xlu1 %v3992_v25, %s3172_s21 }
 0x28b   :  { %6484 = vst [vmem:[#allocation154_spill] sm:$0xff] %v4478_v17  ;;  %v6485_v17 = vld [vmem:[#allocation6_spill] sm:$0xff]  ;;  %6487 = vst [vmem:[#allocation155_spill] sm:$0xff] %v4504_v51  ;;  %v4515_v56 = vpop.permute.xlu1 %1111  ;;  %v754_v43 = vmul.f32 %v4495_v31, %v3800_v35  ;;  %v4535_v19 = vmul.f32 %v3676_v28, %v3631_v61  ;;  %1538 = vrot.lane.b32.xlu0 %v4529_v52, %s3172_s21  ;;  %v6494_v35 = vld [vmem:[#allocation8_spill] sm:$0xff]  ;;  %v4553_v61 = vmul.f32 %v3110_v11, %v4280_v30 }
 0x28c   :  { %v753_v59 = vmul.f32 %v4495_v31, %v6485_v17  ;;  %6486 = vst [vmem:[#allocation6_spill] sm:$0xff] %v4500_v6  ;;  %6488 = vst [vmem:[#allocation156_spill] sm:$0xff] %v4508_v36  ;;  %v4517_v17 = vpop.permute.xlu0 %1095  ;;  %v490_v36 = vmul.f32 %v4253_v21, %v3834_v5  ;;  %v4548_v5 = vld [vmem:[%s6291_s3 + $0x30] sm:$0xff]  ;;  %v4571_v11 = vmul.f32 %v4264_v45, %v3690_v24 }
 0x28d   :  { %6489 = vst [vmem:[#allocation157_spill] sm:$0xff] %v4515_v56  ;;  %6490 = vst [vmem:[#allocation158_spill] sm:$0xff] %v4517_v17  ;;  %v4559_v56 = vmul.f32 %v4397_v39, %v4126_v42  ;;  %v4563_v17 = vmul.f32 %v4297_v32, %v3690_v24  ;;  %v4592_v24 = vmul.f32 %v4297_v32, %v3779_v9 }
 0x28e   :  { %v769_v6 = vadd.f32 %v753_v59, %v6491_v18  ;;  %6492 = vst [vmem:[#allocation9_spill] sm:$0xff] %v4525_v15  ;;  %v4539_v59 = vmul.f32 %v4264_v45, %v3654_v12  ;;  %v835_v18 = vmul.f32 %v4548_v5, %v6494_v35  ;;  %v574_v12 = vmul.f32 %v4343_v46, %v3938_v2 }
 0x28f   :  { %6495 = vst [vmem:[#allocation8_spill] sm:$0xff] %v4559_v56  ;;  %6496 = vst [vmem:[#allocation160_spill] sm:$0xff] %v4563_v17  ;;  %v4567_v15 = vmul.f32 %v3676_v28, %v3723_v26  ;;  %v4573_v35 = vpop.permute.xlu1 %1191  ;;  %v524_v42 = vadd.f32 %v4357_v50, %v490_v36  ;;  %v4580_v56 = vmul.f32 %v4269_v38, %v3723_v26  ;;  %1650 = vrot.lane.b32.xlu1 %v3888_v57, %s3173_s22 }
 0x290   :  { %6493 = vst [vmem:[#allocation159_spill] sm:$0xff] %v4539_v59  ;;  %v770_v59 = vadd.f32 %v754_v43, %v704_v60  ;;  %6498 = vst [vmem:[#allocation162_spill] sm:$0xff] %v4571_v11  ;;  %v4575_v2 = vpop.permute.xlu0 %1175  ;;  %v851_v51 = vadd.f32 %v835_v18, %v769_v6  ;;  %v4584_v17 = vmul.f32 %v4397_v39, %v3723_v26  ;;  %1634 = vrot.lane.b32.xlu0 %v4196_v41, %s3173_s22  ;;  %v3112_v18 = vld [vmem:[#allocation2 + $0x188] sm:$0xff] }
 0x291   :  { %6497 = vst [vmem:[#allocation161_spill] sm:$0xff] %v4567_v15  ;;  %6499 = vst [vmem:[#allocation163_spill] sm:$0xff] %v4573_v35  ;;  %v4588_v60 = vmul.f32 %v4269_v38, %v3762_v3  ;;  %v836_v6 = vmul.f32 %v4548_v5, %v3808_v16  ;;  %v4602_v26 = vmul.f32 %v3676_v28, %v3762_v3  ;;  %v6517_v15 = vld [vmem:[#allocation39_spill] sm:$0xff] }
 0x292   :  { %6500 = vst [vmem:[#allocation164_spill] sm:$0xff] %v4575_v2  ;;  %6501 = vst [vmem:[#allocation165_spill] sm:$0xff] %v4584_v17  ;;  %v590_v36 = vadd.f32 %v574_v12, %v524_v42  ;;  %v4606_v50 = vmul.f32 %v4264_v45, %v3779_v9  ;;  %v4610_v43 = vmul.f32 %v4397_v39, %v3762_v3 }
 0x293   :  { %6502 = vst [vmem:[#allocation166_spill] sm:$0xff] %v4592_v24  ;;  %6503 = vst [vmem:[#allocation167_spill] sm:$0xff] %v4602_v26  ;;  %v852_v16 = vadd.f32 %v836_v6, %v770_v59  ;;  %v4613_v17 = vmul.f32 %v3112_v18, %v4280_v30  ;;  %v491_v41 = vmul.f32 %v4253_v21, %v3878_v27  ;;  %v4620_v12 = vpop.permute.xlu1 %1287  ;;  %v3113_v59 = vld [vmem:[#allocation2 + $0x170] sm:$0xff]  ;;  %v4633_v27 = vld [vmem:[#allocation2 + $0x158] sm:$0xff] }
 0x294   :  { %6504 = vst [vmem:[#allocation168_spill] sm:$0xff] %v4606_v50  ;;  %6505 = vst [vmem:[#allocation169_spill] sm:$0xff] %v4610_v43  ;;  %v4618_v11 = vmul.f32 %v3112_v18, %v3714_v40  ;;  %v4622_v42 = vpop.permute.xlu0 %1271  ;;  %v885_v9 = vadd.f32 %v4301_v55, %v851_v51  ;;  %v656_v3 = vmul.f32 %v4406_v49, %v3842_v1  ;;  %v4635_v18 = vld [vmem:[#allocation2 + $0x68] sm:$0xff]  ;;  %1730 = vrot.lane.b32.xlu1 %v4633_v27, %s3172_s21  ;;  %v6515_v51 = vld [vmem:[#allocation7_spill] sm:$0xff] }
 0x295   :  { %6506 = vst [vmem:[#allocation170_spill] sm:$0xff] %v4613_v17  ;;  %6508 = vst [vmem:[#allocation172_spill] sm:$0xff] %v4620_v12  ;;  %v4628_v6 = vmul.f32 %v3113_v59, %v4280_v30  ;;  %v4631_v43 = vmul.f32 %v3113_v59, %v3714_v40  ;;  %v4639_v2 = vmul.f32 %v4297_v32, %v3846_v47  ;;  %1714 = vrot.lane.b32.xlu0 %v4635_v18, %s3172_s21  ;;  %v6547_v24 = vld [vmem:[#allocation51_spill] sm:$0xff] }
 0x296   :  { %6507 = vst [vmem:[#allocation171_spill] sm:$0xff] %v4618_v11  ;;  %6509 = vst [vmem:[#allocation173_spill] sm:$0xff] %v4622_v42  ;;  %v4643_v55 = vmul.f32 %v3676_v28, %v3828_v54  ;;  %v4647_v1 = vmul.f32 %v3676_v28, %v3888_v57  ;;  %v935_v59 = vmul.f32 %v3659_v23, %v6515_v51 }
 0x297   :  { %6510 = vst [vmem:[#allocation174_spill] sm:$0xff] %v4628_v6  ;;  %6511 = vst [vmem:[#allocation175_spill] sm:$0xff] %v4631_v43  ;;  %v1017_v11 = vmul.f32 %v3681_v34, %v3844_v53  ;;  %v672_v50 = vadd.f32 %v656_v3, %v590_v36  ;;  %v4659_v35 = vmul.f32 %v4269_v38, %v3828_v54  ;;  %v4676_v36 = vpop.permute.xlu1 %1367  ;;  %v6549_v6 = vld [vmem:[#allocation17_spill] sm:$0xff] }
 0x298   :  { %6512 = vst [vmem:[#allocation176_spill] sm:$0xff] %v4639_v2  ;;  %6513 = vst [vmem:[#allocation177_spill] sm:$0xff] %v4643_v55  ;;  %v4664_v55 = vld [vmem:[%s6291_s3 + $0x70] sm:$0xff]  ;;  %v886_v43 = vadd.f32 %v4321_v48, %v852_v16  ;;  %v525_v12 = vadd.f32 %v4353_v44, %v491_v41  ;;  %v4670_v51 = vmul.f32 %v4297_v32, %v6517_v15  ;;  %v4678_v3 = vpop.permute.xlu0 %1351  ;;  %v6522_v2 = vld [vmem:[#allocation14_spill] sm:$0xff] }
 0x299   :  { %6514 = vst [vmem:[#allocation178_spill] sm:$0xff] %v4647_v1  ;;  %6516 = vst [vmem:[#allocation7_spill] sm:$0xff] %v4659_v35  ;;  %v4674_v53 = vmul.f32 %v4264_v45, %v6517_v15  ;;  %v1297_v1 = vmul.f32 %v4664_v55, %v6522_v2  ;;  %v951_v17 = vadd.f32 %v935_v59, %v885_v9  ;;  %v6525_v16 = vld [vmem:[#allocation22_spill] sm:$0xff]  ;;  %v6526_v41 = vld [vmem:[#allocation25_spill] sm:$0xff] }
 0x29a   :  { %6518 = vst [vmem:[#allocation39_spill] sm:$0xff] %v4670_v51  ;;  %6520 = vst [vmem:[#allocation180_spill] sm:$0xff] %v4676_v36  ;;  %v4684_v48 = vmul.f32 %v4264_v45, %v3846_v47  ;;  %v4688_v44 = vmul.f32 %v4397_v39, %v3888_v57  ;;  %v575_v15 = vmul.f32 %v4343_v46, %v6525_v16  ;;  %v6527_v2 = vld [vmem:[#allocation114_spill] sm:$0xff]  ;;  %v6528_v47 = vld [vmem:[#allocation115_spill] sm:$0xff] }
 0x29b   :  { %6519 = vst [vmem:[#allocation179_spill] sm:$0xff] %v4674_v53  ;;  %6521 = vst [vmem:[#allocation181_spill] sm:$0xff] %v4678_v3  ;;  %v936_v36 = vmul.f32 %v3659_v23, %v6526_v41  ;;  %v4696_v53 = vmul.f32 %v4269_v38, %v3888_v57  ;;  %1475 = vrot.lane.b32.xlu1 %v6527_v2, %s3173_s22  ;;  %1459 = vrot.lane.b32.xlu0 %v6528_v47, %s3173_s22  ;;  %v6529_v59 = vld [vmem:[#allocation132_spill] sm:$0xff]  ;;  %v4712_v23 = vld [vmem:[%s6291_s3 + $0x78] sm:$0xff] }
 0x29c   :  { %6523 = vst [vmem:[#allocation14_spill] sm:$0xff] %v4684_v48  ;;  %6524 = vst [vmem:[#allocation182_spill] sm:$0xff] %v4688_v44  ;;  %v1033_v9 = vadd.f32 %v1017_v11, %v951_v17  ;;  %v706_v39 = vadd.f32 %v6529_v59, %v672_v50  ;;  %v3114_v44 = vld [vmem:[#allocation2 + $0x1a0] sm:$0xff]  ;;  %v591_v41 = vadd.f32 %v575_v15, %v525_v12  ;;  %v6532_v2 = vld [vmem:[#allocation49_spill] sm:$0xff]  ;;  %v4724_v11 = vpop.permute.xlu0 %1445 }
 0x29d   :  { %v4704_v48 = vmul.f32 %v3114_v44, %v4280_v30  ;;  %v4707_v16 = vmul.f32 %v3114_v44, %v3714_v40  ;;  %v952_v57 = vadd.f32 %v936_v36, %v886_v43  ;;  %v4716_v47 = vmul.f32 %v3676_v28, %v6532_v2  ;;  %v4722_v30 = vpop.permute.xlu1 %1447  ;;  %6536 = vst [vmem:[#allocation49_spill] sm:$0xff] %v4724_v11  ;;  %v6537_v40 = vld [vmem:[#allocation10_spill] sm:$0xff]  ;;  %v6538_v44 = vld [vmem:[#allocation15_spill] sm:$0xff]  ;;  %v6540_v12 = vld [vmem:[#allocation48_spill] sm:$0xff] }
 0x29e   :  { %v4720_v17 = vmul.f32 %v4297_v32, %v3974_v37  ;;  %6535 = vst [vmem:[#allocation132_spill] sm:$0xff] %v4722_v30  ;;  %v1298_v50 = vmul.f32 %v4664_v55, %v6537_v40  ;;  %v1313_v59 = vadd.f32 %v1297_v1, %v6538_v44  ;;  %v756_v36 = vmul.f32 %v4495_v31, %v6540_v12  ;;  %v4733_v15 = vld [vmem:[#allocation2 + $0xc7] sm:$0xff]  ;;  %v6543_v51 = vld [vmem:[#allocation26_spill] sm:$0xff]  ;;  %v6548_v3 = vld [vmem:[#allocation77_spill] sm:$0xff] }
 0x29f   :  { %6530 = vst [vmem:[#allocation22_spill] sm:$0xff] %v4704_v48  ;;  %6531 = vst [vmem:[#allocation25_spill] sm:$0xff] %v4707_v16  ;;  %v6539_v16 = vld [vmem:[#allocation16_spill] sm:$0xff]  ;;  %v492_v11 = vmul.f32 %v4253_v21, %v6543_v51  ;;  %1556 = vrot.lane.b32.xlu1 %v6532_v2, %s3172_s21  ;;  %1540 = vrot.lane.b32.xlu0 %v4733_v15, %s3172_s21  ;;  %v6544_v1 = vld [vmem:[#allocation135_spill] sm:$0xff]  ;;  %v495_v51 = vmul.f32 %v4253_v21, %v6548_v3 }
 0x2a0   :  { %6533 = vst [vmem:[#allocation114_spill] sm:$0xff] %v4716_v47  ;;  %6534 = vst [vmem:[#allocation115_spill] sm:$0xff] %v4720_v17  ;;  %v1379_v43 = vmul.f32 %v4712_v23, %v6539_v16  ;;  %v6541_v47 = vld [vmem:[#allocation20_spill] sm:$0xff]  ;;  %v1067_v16 = vadd.f32 %v6544_v1, %v1033_v9  ;;  %v6545_v40 = vld [vmem:[#allocation27_spill] sm:$0xff]  ;;  %v772_v30 = vadd.f32 %v756_v36, %v706_v39  ;;  %v4755_v26 = vpop.permute.xlu0 %1461 }
 0x2a1   :  { %v1018_v32 = vmul.f32 %v3681_v34, %v6541_v47  ;;  %v6542_v17 = vld [vmem:[#allocation24_spill] sm:$0xff]  ;;  %v838_v34 = vmul.f32 %v4548_v5, %v6547_v24  ;;  %v1314_v42 = vadd.f32 %v1298_v50, %v6549_v6  ;;  %v4753_v2 = vpop.permute.xlu1 %1463  ;;  %6551 = vst [vmem:[#allocation15_spill] sm:$0xff] %v4755_v26  ;;  %v6553_v1 = vld [vmem:[#allocation29_spill] sm:$0xff]  ;;  %v4763_v24 = vmul.f32 %v3676_v28, %v3992_v25  ;;  %v6557_v3 = vld [vmem:[#allocation11_spill] sm:$0xff] }
 0x2a2   :  { %v657_v48 = vmul.f32 %v4406_v49, %v6542_v17  ;;  %v6546_v44 = vld [vmem:[#allocation12_spill] sm:$0xff]  ;;  %6550 = vst [vmem:[#allocation10_spill] sm:$0xff] %v4753_v2  ;;  %v1380_v6 = vmul.f32 %v4712_v23, %v6557_v3  ;;  %v526_v28 = vadd.f32 %v4455_v14, %v492_v11  ;;  %v6560_v36 = vld [vmem:[#allocation46_spill] sm:$0xff]  ;;  %v6578_v2 = vld [vmem:[#allocation31_spill] sm:$0xff] }
 0x2a3   :  { %v1117_v12 = vmul.f32 %v6546_v44, %v6545_v40  ;;  %v1034_v47 = vadd.f32 %v1018_v32, %v952_v57  ;;  %v6552_v35 = vld [vmem:[#allocation28_spill] sm:$0xff]  ;;  %v6554_v40 = vld [vmem:[#allocation13_spill] sm:$0xff]  ;;  %6555 = vst [vmem:[#allocation16_spill] sm:$0xff] %v4763_v24  ;;  %v1395_v57 = vadd.f32 %v1379_v43, %v1313_v59  ;;  %1652 = vrot.lane.b32.xlu1 %v3828_v54, %s3173_s22  ;;  %v6561_v32 = vld [vmem:[#allocation130_spill] sm:$0xff] }
 0x2a4   :  { %v673_v17 = vadd.f32 %v657_v48, %v591_v41  ;;  %v576_v9 = vmul.f32 %v4343_v46, %v6552_v35  ;;  %v1199_v39 = vmul.f32 %v6554_v40, %v6553_v1  ;;  %v4767_v48 = vmul.f32 %v4264_v45, %v3974_v37  ;;  %v6559_v35 = vld [vmem:[#allocation120_spill] sm:$0xff]  ;;  %v6562_v59 = vld [vmem:[#allocation131_spill] sm:$0xff]  ;;  %v4787_v54 = vpop.permute.xlu0 %1177 }
 0x2a5   :  { %v4773_v41 = vmul.f32 %v4269_v38, %v3992_v25  ;;  %1636 = vrot.lane.b32.xlu0 %v6559_v35, %s3173_s22  ;;  %v1133_v50 = vadd.f32 %v1117_v12, %v1067_v16  ;;  %v494_v45 = vmul.f32 %v4253_v21, %v6560_v36  ;;  %v854_v37 = vadd.f32 %v838_v34, %v772_v30  ;;  %v4785_v3 = vpop.permute.xlu1 %1193  ;;  %v6566_v16 = vld [vmem:[#allocation47_spill] sm:$0xff]  ;;  %v4793_v30 = vld [vmem:[#allocation2 + $0x170] sm:$0xff] }
 0x2a6   :  { %6556 = vst [vmem:[#allocation48_spill] sm:$0xff] %v4767_v48  ;;  %v1068_v1 = vadd.f32 %v6561_v32, %v1034_v47  ;;  %v707_v43 = vadd.f32 %v6562_v59, %v673_v17  ;;  %v529_v38 = vadd.f32 %v4486_v8, %v495_v51  ;;  %v1396_v40 = vadd.f32 %v1380_v6, %v1314_v42  ;;  %v6565_v48 = vld [vmem:[#allocation21_spill] sm:$0xff]  ;;  %v4795_v34 = vld [vmem:[#allocation2 + $0x80] sm:$0xff]  ;;  %v6567_v47 = vld [vmem:[#allocation30_spill] sm:$0xff] }
 0x2a7   :  { %6558 = vst [vmem:[#allocation20_spill] sm:$0xff] %v4773_v41  ;;  %6563 = vst [vmem:[#allocation24_spill] sm:$0xff] %v4785_v3  ;;  %v1118_v35 = vmul.f32 %v6546_v44, %v6565_v48  ;;  %v592_v14 = vadd.f32 %v576_v9, %v526_v28  ;;  %v1215_v11 = vadd.f32 %v1199_v39, %v1133_v50  ;;  %v6568_v42 = vld [vmem:[#allocation34_spill] sm:$0xff]  ;;  %v6569_v51 = vld [vmem:[#allocation63_spill] sm:$0xff]  ;;  %1732 = vrot.lane.b32.xlu1 %v4793_v30, %s3172_s21 }
 0x2a8   :  { %6564 = vst [vmem:[#allocation26_spill] sm:$0xff] %v4787_v54  ;;  %v578_v12 = vmul.f32 %v4343_v46, %v6566_v16  ;;  %v579_v8 = vmul.f32 %v4343_v46, %v6567_v47  ;;  %v757_v17 = vmul.f32 %v4495_v31, %v6568_v42  ;;  %v658_v6 = vmul.f32 %v4406_v49, %v6569_v51  ;;  %v6570_v9 = vld [vmem:[#allocation5_spill] sm:$0xff]  ;;  %v4812_v48 = vld [vmem:[%s6291_s3 + $0x40] sm:$0xff]  ;;  %v6577_v54 = vld [vmem:[#allocation124_spill] sm:$0xff] }
 0x2a9   :  { %1716 = vrot.lane.b32.xlu0 %v4795_v34, %s3172_s21  ;;  %v528_v44 = vadd.f32 %v4512_v58, %v494_v45  ;;  %v888_v39 = vadd.f32 %v6570_v9, %v854_v37  ;;  %v6571_v28 = vld [vmem:[#allocation53_spill] sm:$0xff]  ;;  %v6572_v36 = vld [vmem:[#allocation83_spill] sm:$0xff]  ;;  %v1134_v51 = vadd.f32 %v1118_v35, %v1068_v1  ;;  %v4820_v58 = vpop.permute.xlu1 %1289  ;;  %v4822_v45 = vpop.permute.xlu0 %1273  ;;  %v6576_v37 = vld [vmem:[#allocation18_spill] sm:$0xff]  ;;  %v1249_v3 = vadd.f32 %v6577_v54, %v1215_v11 }
 0x2aa   :  { %v938_v50 = vmul.f32 %v4812_v48, %v6571_v28  ;;  %v660_v32 = vmul.f32 %v4406_v49, %v6572_v36  ;;  %v773_v59 = vadd.f32 %v757_v17, %v707_v43  ;;  %v595_v16 = vadd.f32 %v579_v8, %v529_v38  ;;  %v6573_v47 = vld [vmem:[#allocation79_spill] sm:$0xff]  ;;  %6574 = vst [vmem:[#allocation135_spill] sm:$0xff] %v4820_v58  ;;  %v6580_v35 = vld [vmem:[#allocation36_spill] sm:$0xff]  ;;  %v6581_v36 = vld [vmem:[#allocation133_spill] sm:$0xff] }
 0x2ab   :  { %v661_v42 = vmul.f32 %v4406_v49, %v6573_v47  ;;  %6575 = vst [vmem:[#allocation27_spill] sm:$0xff] %v4822_v45  ;;  %v937_v9 = vmul.f32 %v4812_v48, %v6576_v37  ;;  %v1299_v28 = vmul.f32 %v4664_v55, %v6578_v2  ;;  %v594_v24 = vadd.f32 %v578_v12, %v528_v44  ;;  %v4832_v43 = vld [vmem:[%s6291_s3 + $0x60] sm:$0xff]  ;;  %v6582_v54 = vld [vmem:[#allocation134_spill] sm:$0xff]  ;;  %v1527_v58 = vld [vmem:[#allocation2 + $0x1cf] sm:$0xff] }
 0x2ac   :  { %v6579_v38 = vld [vmem:[#allocation23_spill] sm:$0xff]  ;;  %v839_v8 = vmul.f32 %v4548_v5, %v6580_v35  ;;  %v674_v17 = vadd.f32 %v658_v6, %v592_v14  ;;  %1812 = vrot.lane.b32.xlu1 %v6581_v36, %s3173_s22  ;;  %v954_v12 = vadd.f32 %v938_v50, %v888_v39  ;;  %v6585_v35 = vld [vmem:[#allocation126_spill] sm:$0xff] }
 0x2ad   :  { %v1200_v1 = vmul.f32 %v4832_v43, %v6579_v38  ;;  %1810 = vrot.lane.b32.xlu0 %v6582_v54, %s3173_s22  ;;  %v6583_v2 = vld [vmem:[#allocation19_spill] sm:$0xff]  ;;  %v676_v44 = vadd.f32 %v660_v32, %v594_v24  ;;  %v677_v26 = vadd.f32 %v661_v42, %v595_v16  ;;  %v4847_v14 = vadd.f32 %v6585_v35, %v1396_v40  ;;  %v4849_v6 = vpop.permute.xlu1 %1369  ;;  %v4851_v36 = vpop.permute.xlu0 %1353  ;;  %v4858_v24 = vld [vmem:[%s6291_s3 + $0x48] sm:$0xff]  ;;  %v6591_v42 = vld [vmem:[#allocation65_spill] sm:$0xff] }
 0x2ae   :  { %v953_v11 = vadd.f32 %v937_v9, %v6583_v2  ;;  %v6584_v47 = vld [vmem:[#allocation127_spill] sm:$0xff]  ;;  %v855_v38 = vadd.f32 %v839_v8, %v773_v59  ;;  %6586 = vst [vmem:[#allocation12_spill] sm:$0xff] %v4849_v6  ;;  %v4853_v54 = vadd.f32 %v1299_v28, %v1249_v3  ;;  %v6590_v59 = vld [vmem:[#allocation97_spill] sm:$0xff]  ;;  %v708_v16 = vadd.f32 %v4392_v63, %v674_v17  ;;  %v6592_v9 = vld [vmem:[#allocation32_spill] sm:$0xff] }
 0x2af   :  { %v4844_v37 = vadd.f32 %v6584_v47, %v1395_v57  ;;  %v1519_v45 = vld [vmem:[#allocation2 + $0xdf] sm:$0xff]  ;;  %v1216_v41 = vadd.f32 %v1200_v1, %v1134_v51  ;;  %v6588_v57 = vld [vmem:[#allocation41_spill] sm:$0xff]  ;;  %v497_v40 = vmul.f32 %v4253_v21, %v6590_v59  ;;  %v758_v3 = vmul.f32 %v4495_v31, %v6591_v42  ;;  %v6595_v35 = vld [vmem:[#allocation68_spill] sm:$0xff] }
 0x2b0   :  { %6587 = vst [vmem:[#allocation51_spill] sm:$0xff] %v4853_v54  ;;  %v1020_v39 = vmul.f32 %v4858_v24, %v6588_v57  ;;  %v6589_v50 = vld [vmem:[#allocation55_spill] sm:$0xff]  ;;  %1828 = vrot.lane.b32.xlu1 %v4399_v20, %s3173_s22  ;;  %v4873_v51 = vpack.i.bf16 %v1527_v58, %v1519_v45  ;;  %v761_v28 = vmul.f32 %v4495_v31, %v6592_v9 }
 0x2b1   :  { %v1019_v32 = vmul.f32 %v4858_v24, %v6589_v50  ;;  %1826 = vrot.lane.b32.xlu0 %v4401_v29, %s3173_s22  ;;  %v710_v8 = vadd.f32 %v4389_v62, %v676_v44  ;;  %v6593_v2 = vld [vmem:[#allocation99_spill] sm:$0xff]  ;;  %v840_v57 = vmul.f32 %v4548_v5, %v6595_v35  ;;  %v711_v20 = vadd.f32 %v4383_v10, %v677_v26  ;;  %v4887_v58 = vpop.permute.xlu1 %1465  ;;  %v4889_v45 = vpop.permute.xlu0 %1449  ;;  %v6602_v26 = vld [vmem:[#allocation38_spill] sm:$0xff] }
 0x2b2   :  { %v1036_v1 = vadd.f32 %v1020_v39, %v954_v12  ;;  %v581_v63 = vmul.f32 %v4343_v46, %v6593_v2  ;;  %v6594_v17 = vld [vmem:[#allocation3_spill] sm:$0xff]  ;;  %6597 = vst [vmem:[#allocation77_spill] sm:$0xff] %v4887_v58  ;;  %6598 = vst [vmem:[#allocation17_spill] sm:$0xff] %v4889_v45  ;;  %v6599_v12 = vld [vmem:[#allocation33_spill] sm:$0xff]  ;;  %v531_v10 = vadd.f32 %v4580_v56, %v497_v40 }
 0x2b3   :  { %v889_v47 = vadd.f32 %v6594_v17, %v855_v38  ;;  %v6596_v50 = vld [vmem:[#allocation123_spill] sm:$0xff]  ;;  %v4893_v62 = vmul.f32 %v4812_v48, %v6599_v12  ;;  %v6601_v38 = vld [vmem:[#allocation50_spill] sm:$0xff]  ;;  %v1035_v42 = vadd.f32 %v1019_v32, %v953_v11  ;;  %v774_v9 = vadd.f32 %v758_v3, %v708_v16  ;;  %v6603_v17 = vld [vmem:[#allocation37_spill] sm:$0xff] }
 0x2b4   :  { %v4885_v29 = vadd.f32 %v6596_v50, %v1216_v41  ;;  %v6600_v44 = vld [vmem:[#allocation35_spill] sm:$0xff]  ;;  %v760_v59 = vmul.f32 %v4495_v31, %v6601_v38  ;;  %v939_v41 = vmul.f32 %v4812_v48, %v6602_v26  ;;  %1638 = vrot.lane.b32.xlu1 %v4529_v52, %s3173_s22  ;;  %v4911_v2 = vld [vmem:[%s6291_s3 + $0x58] sm:$0xff]  ;;  %v6604_v56 = vld [vmem:[#allocation4_spill] sm:$0xff]  ;;  %v597_v11 = vadd.f32 %v581_v63, %v531_v10 }
 0x2b5   :  { %v4897_v39 = vmul.f32 %v4858_v24, %v6600_v44  ;;  %3066 = vrot.lane.b32.xlu0 %v4873_v51, %s3172_s21  ;;  %v4915_v35 = vmul.f32 %v4911_v2, %v6603_v17  ;;  %v1070_v40 = vadd.f32 %v6604_v56, %v1036_v1  ;;  %v6605_v16 = vld [vmem:[#allocation40_spill] sm:$0xff]  ;;  %v856_v3 = vadd.f32 %v840_v57, %v774_v9  ;;  %v4924_v44 = vpop.permute.xlu1 %1530  ;;  %v4926_v38 = vpop.permute.xlu0 %1528  ;;  %v6606_v26 = vld [vmem:[#allocation43_spill] sm:$0xff]  ;;  %v6607_v58 = vld [vmem:[#allocation54_spill] sm:$0xff] }
 0x2b6   :  { %v776_v50 = vadd.f32 %v760_v59, %v710_v8  ;;  %v4918_v32 = vadd.f32 %v939_v41, %v889_v47  ;;  %v4922_v52 = vmul.f32 %v4832_v43, %v6605_v16  ;;  %v777_v12 = vadd.f32 %v761_v28, %v711_v20  ;;  %v6608_v8 = vld [vmem:[#allocation85_spill] sm:$0xff]  ;;  %v6609_v47 = vld [vmem:[#allocation87_spill] sm:$0xff]  ;;  %v4936_v10 = vld [vmem:[#allocation2 + $0x98] sm:$0xff] }
 0x2b7   :  { %v1120_v17 = vmul.f32 %v4911_v2, %v6606_v26  ;;  %v663_v1 = vmul.f32 %v4406_v49, %v6607_v58  ;;  %v842_v63 = vmul.f32 %v4548_v5, %v6608_v8  ;;  %v1023_v59 = vmul.f32 %v4858_v24, %v6609_v47  ;;  %6610 = vst [vmem:[#allocation28_spill] sm:$0xff] %v4936_v10  ;;  %v6611_v57 = vld [vmem:[#allocation57_spill] sm:$0xff]  ;;  %v6613_v58 = vld [vmem:[#allocation59_spill] sm:$0xff] }
 0x2b8   :  { %v1069_v28 = vadd.f32 %v4373_v22, %v1035_v42  ;;  %v1119_v20 = vmul.f32 %v4911_v2, %v6611_v57  ;;  %v6612_v41 = vld [vmem:[#allocation81_spill] sm:$0xff]  ;;  %1718 = vrot.lane.b32.xlu1 %v4936_v10, %s3172_s21  ;;  %v1201_v56 = vmul.f32 %v4832_v43, %v6613_v58  ;;  %v6614_v47 = vld [vmem:[#allocation67_spill] sm:$0xff]  ;;  %v890_v42 = vadd.f32 %v4459_v13, %v856_v3  ;;  %v6615_v57 = vld [vmem:[#allocation70_spill] sm:$0xff] }
 0x2b9   :  { %v843_v9 = vmul.f32 %v4548_v5, %v6612_v41  ;;  %1654 = vrot.lane.b32.xlu0 %v3992_v25, %s3173_s22  ;;  %v858_v16 = vadd.f32 %v842_v63, %v776_v50  ;;  %v679_v26 = vadd.f32 %v663_v1, %v597_v11  ;;  %v1136_v8 = vadd.f32 %v1120_v17, %v1070_v40  ;;  %v4954_v54 = vpop.permute.xlu1 %1546  ;;  %v4956_v6 = vpop.permute.xlu0 %1544  ;;  %v6617_v25 = vld [vmem:[#allocation42_spill] sm:$0xff]  ;;  %v6618_v50 = vld [vmem:[#allocation44_spill] sm:$0xff]  ;;  %v6620_v11 = vld [vmem:[#allocation45_spill] sm:$0xff] }
 0x2ba   :  { %v496_v22 = vmul.f32 %v4253_v21, %v6614_v47  ;;  %v940_v41 = vmul.f32 %v4812_v48, %v6615_v57  ;;  %6616 = vst [vmem:[#allocation29_spill] sm:$0xff] %v4954_v54  ;;  %v4960_v10 = vmul.f32 %v4664_v55, %v6617_v25  ;;  %v4964_v40 = vmul.f32 %v4712_v23, %v6618_v50  ;;  %v6621_v13 = vld [vmem:[#allocation125_spill] sm:$0xff]  ;;  %v4969_v1 = vld [vmem:[#allocation2 + $0x188] sm:$0xff] }
 0x2bb   :  { %v859_v45 = vadd.f32 %v843_v9, %v777_v12  ;;  %v1202_v17 = vmul.f32 %v4832_v43, %v6620_v11  ;;  %v1039_v3 = vadd.f32 %v1023_v59, %v6621_v13  ;;  %v6622_v12 = vld [vmem:[#allocation52_spill] sm:$0xff]  ;;  %v1135_v47 = vadd.f32 %v1119_v20, %v1069_v28  ;;  %v6624_v59 = vld [vmem:[#allocation103_spill] sm:$0xff] }
 0x2bc   :  { %6619 = vst [vmem:[#allocation13_spill] sm:$0xff] %v4964_v40  ;;  %v942_v63 = vmul.f32 %v4812_v48, %v6622_v12  ;;  %v6623_v9 = vld [vmem:[#allocation56_spill] sm:$0xff]  ;;  %1814 = vrot.lane.b32.xlu1 %v4635_v18, %s3173_s22  ;;  %v892_v57 = vadd.f32 %v4522_v0, %v858_v16  ;;  %v713_v25 = vadd.f32 %v4470_v4, %v679_v26  ;;  %v6627_v40 = vld [vmem:[#allocation89_spill] sm:$0xff] }
 0x2bd   :  { %v845_v58 = vmul.f32 %v4548_v5, %v6623_v9  ;;  %1734 = vrot.lane.b32.xlu0 %v4969_v1, %s3172_s21  ;;  %v580_v50 = vmul.f32 %v4343_v46, %v6624_v59  ;;  %v1218_v11 = vadd.f32 %v1202_v17, %v1136_v8  ;;  %v1217_v13 = vadd.f32 %v1201_v56, %v1135_v47  ;;  %v4985_v20 = vpop.permute.xlu1 %1291  ;;  %v4987_v18 = vpop.permute.xlu0 %1275  ;;  %v6628_v4 = vld [vmem:[#allocation101_spill] sm:$0xff]  ;;  %v4996_v8 = vld [vmem:[#allocation2 + $0x39] sm:$0xff]  ;;  %v6634_v59 = vld [vmem:[#allocation60_spill] sm:$0xff] }
 0x2be   :  { %v530_v12 = vadd.f32 %v4588_v60, %v496_v22  ;;  %v956_v54 = vadd.f32 %v940_v41, %v890_v42  ;;  %v893_v28 = vadd.f32 %v4490_v7, %v859_v45  ;;  %6625 = vst [vmem:[#allocation11_spill] sm:$0xff] %v4985_v20  ;;  %6626 = vst [vmem:[#allocation120_spill] sm:$0xff] %v4987_v18  ;;  %v6629_v26 = vld [vmem:[#allocation105_spill] sm:$0xff]  ;;  %v6630_v60 = vld [vmem:[#allocation58_spill] sm:$0xff] }
 0x2bf   :  { %v1073_v9 = vadd.f32 %v4535_v19, %v1039_v3  ;;  %v1123_v0 = vmul.f32 %v4911_v2, %v6627_v40  ;;  %v763_v16 = vmul.f32 %v4495_v31, %v6628_v4  ;;  %v662_v56 = vmul.f32 %v4406_v49, %v6629_v26  ;;  %v6631_v45 = vld [vmem:[#allocation61_spill] sm:$0xff]  ;;  %v6633_v40 = vld [vmem:[#allocation91_spill] sm:$0xff]  ;;  %v6637_v18 = vld [vmem:[#allocation136_spill] sm:$0xff] }
 0x2c0   :  { %v5000_v7 = vmul.f32 %v4812_v48, %v6630_v60  ;;  %v1022_v22 = vmul.f32 %v4858_v24, %v6631_v45  ;;  %v6632_v42 = vld [vmem:[#allocation117_spill] sm:$0xff]  ;;  %1892 = vrot.lane.b32.xlu1 %v4996_v8, %s3172_s21  ;;  %v958_v41 = vadd.f32 %v942_v63, %v892_v57  ;;  %v1205_v17 = vmul.f32 %v4832_v43, %v6633_v40  ;;  %v6642_v40 = vld [vmem:[#allocation62_spill] sm:$0xff] }
 0x2c1   :  { %v498_v19 = vmul.f32 %v4253_v21, %v6632_v42  ;;  %1830 = vrot.lane.b32.xlu0 %v4633_v27, %s3173_s22  ;;  %v779_v3 = vadd.f32 %v763_v16, %v713_v25  ;;  %v596_v47 = vadd.f32 %v580_v50, %v530_v12  ;;  %v5014_v4 = vmul.f32 %v4858_v24, %v6634_v59  ;;  %v6635_v26 = vld [vmem:[#allocation73_spill] sm:$0xff]  ;;  %v5024_v27 = vpop.permute.xlu1 %1371  ;;  %v5026_v63 = vpop.permute.xlu0 %1355 }
 0x2c2   :  { %v1021_v60 = vmul.f32 %v4858_v24, %v6635_v26  ;;  %v6636_v45 = vld [vmem:[#allocation137_spill] sm:$0xff]  ;;  %v5022_v20 = vadd.f32 %v6637_v18, %v1218_v11  ;;  %6639 = vst [vmem:[#allocation130_spill] sm:$0xff] %v5024_v27  ;;  %6640 = vst [vmem:[#allocation131_spill] sm:$0xff] %v5026_v63  ;;  %v1038_v57 = vadd.f32 %v1022_v22, %v956_v54  ;;  %v6644_v54 = vld [vmem:[#allocation66_spill] sm:$0xff] }
 0x2c3   :  { %v5019_v42 = vadd.f32 %v6636_v45, %v1217_v13  ;;  %v959_v25 = vadd.f32 %v4893_v62, %v893_v28  ;;  %v1139_v50 = vadd.f32 %v1123_v0, %v1073_v9  ;;  %v678_v12 = vadd.f32 %v662_v56, %v596_v47  ;;  %v5029_v16 = vld [vmem:[#allocation2 + $0x129] sm:$0xff]  ;;  %v6648_v45 = vld [vmem:[#allocation94_spill] sm:$0xff] }
 0x2c4   :  { %6638 = vst [vmem:[#allocation46_spill] sm:$0xff] %v5022_v20  ;;  %6641 = vst [vmem:[#allocation21_spill] sm:$0xff] %v5029_v16  ;;  %v5033_v59 = vmul.f32 %v4911_v2, %v6642_v40  ;;  %v6643_v13 = vld [vmem:[#allocation64_spill] sm:$0xff]  ;;  %v532_v11 = vadd.f32 %v4696_v53, %v498_v19  ;;  %1908 = vrot.lane.b32.xlu1 %v5029_v16, %s3172_s21  ;;  %v1040_v18 = vadd.f32 %v4897_v39, %v958_v41  ;;  %v6646_v56 = vld [vmem:[#allocation69_spill] sm:$0xff] }
 0x2c5   :  { %v5037_v26 = vmul.f32 %v4832_v43, %v6643_v13  ;;  %1894 = vrot.lane.b32.xlu0 %v6644_v54, %s3172_s21  ;;  %v6645_v62 = vld [vmem:[#allocation72_spill] sm:$0xff]  ;;  %v1221_v9 = vadd.f32 %v1205_v17, %v1139_v50  ;;  %v861_v0 = vadd.f32 %v845_v58, %v779_v3  ;;  %v5049_v22 = vmul.f32 %v4812_v48, %v6646_v56  ;;  %v5058_v13 = vpop.permute.xlu1 %1467  ;;  %v5060_v54 = vpop.permute.xlu0 %1451  ;;  %v6650_v41 = vld [vmem:[#allocation107_spill] sm:$0xff]  ;;  %v6662_v20 = vld [vmem:[#allocation113_spill] sm:$0xff] }
 0x2c6   :  { %v1025_v28 = vmul.f32 %v4858_v24, %v6645_v62  ;;  %v5052_v47 = vadd.f32 %v1021_v60, %v4918_v32  ;;  %v6647_v53 = vld [vmem:[#allocation80_spill] sm:$0xff]  ;;  %v582_v40 = vmul.f32 %v4343_v46, %v6648_v45  ;;  %6649 = vst [vmem:[#allocation47_spill] sm:$0xff] %v5058_v13  ;;  %v712_v58 = vadd.f32 %v4553_v61, %v678_v12  ;;  %v6653_v60 = vld [vmem:[#allocation111_spill] sm:$0xff]  ;;  %v6656_v12 = vld [vmem:[#allocation141_spill] sm:$0xff] }
 0x2c7   :  { %v499_v19 = vmul.f32 %v4253_v21, %v6647_v53  ;;  %v762_v17 = vmul.f32 %v4495_v31, %v6650_v41  ;;  %v5066_v3 = vadd.f32 %v4423_v33, %v1038_v57  ;;  %v5068_v32 = vld [vmem:[#allocation2 + $0x141] sm:$0xff]  ;;  %v583_v50 = vmul.f32 %v4343_v46, %v6653_v60  ;;  %v6657_v57 = vld [vmem:[#allocation93_spill] sm:$0xff]  ;;  %v6659_v60 = vld [vmem:[#allocation74_spill] sm:$0xff] }
 0x2c8   :  { %v1041_v39 = vadd.f32 %v1025_v28, %v959_v25  ;;  %6652 = vst [vmem:[#allocation34_spill] sm:$0xff] %v5068_v32  ;;  %v598_v62 = vadd.f32 %v582_v40, %v532_v11  ;;  %v6654_v56 = vld [vmem:[#allocation119_spill] sm:$0xff]  ;;  %1640 = vrot.lane.b32.xlu1 %v4733_v15, %s3173_s22  ;;  %v1255_v33 = vadd.f32 %v6656_v12, %v1221_v9  ;;  %v6658_v45 = vld [vmem:[#allocation160_spill] sm:$0xff]  ;;  %v6661_v13 = vld [vmem:[#allocation109_spill] sm:$0xff] }
 0x2c9   :  { %6651 = vst [vmem:[#allocation30_spill] sm:$0xff] %v5066_v3  ;;  %v664_v53 = vmul.f32 %v4406_v49, %v6654_v56  ;;  %1910 = vrot.lane.b32.xlu0 %v5068_v32, %s3172_s21  ;;  %v6655_v61 = vld [vmem:[#allocation155_spill] sm:$0xff]  ;;  %v1305_v28 = vmul.f32 %v4664_v55, %v6657_v57  ;;  %v895_v41 = vadd.f32 %v6658_v45, %v861_v0  ;;  %v5090_v27 = vpop.permute.xlu1 %1548  ;;  %v6664_v9 = vld [vmem:[#allocation76_spill] sm:$0xff]  ;;  %v6666_v57 = vld [vmem:[#allocation82_spill] sm:$0xff] }
 0x2ca   :  { %v1074_v25 = vadd.f32 %v6655_v61, %v1040_v18  ;;  %v1125_v11 = vmul.f32 %v4911_v2, %v6659_v60  ;;  %v6660_v40 = vld [vmem:[#allocation7_spill] sm:$0xff]  ;;  %v844_v15 = vmul.f32 %v4548_v5, %v6661_v13  ;;  %v665_v63 = vmul.f32 %v4406_v49, %v6662_v20  ;;  %6663 = vst [vmem:[#allocation63_spill] sm:$0xff] %v5090_v27  ;;  %v5092_v18 = vpop.permute.xlu0 %1532  ;;  %v5105_v27 = vld [vmem:[#allocation2 + $0x1b7] sm:$0xff] }
 0x2cb   :  { %v533_v56 = vadd.f32 %v6660_v40, %v499_v19  ;;  %v5096_v61 = vmul.f32 %v4832_v43, %v6664_v9  ;;  %v6665_v0 = vld [vmem:[#allocation167_spill] sm:$0xff]  ;;  %v765_v45 = vmul.f32 %v4495_v31, %v6666_v57  ;;  %v778_v13 = vadd.f32 %v762_v17, %v712_v58  ;;  %6669 = vst [vmem:[#allocation5_spill] sm:$0xff] %v5105_v27  ;;  %v6670_v57 = vld [vmem:[#allocation173_spill] sm:$0xff]  ;;  %v6672_v17 = vld [vmem:[#allocation86_spill] sm:$0xff] }
 0x2cc   :  { %v1075_v12 = vadd.f32 %v6665_v0, %v1041_v39  ;;  %v6667_v19 = vld [vmem:[#allocation95_spill] sm:$0xff]  ;;  %v680_v3 = vadd.f32 %v664_v53, %v598_v62  ;;  %v1140_v9 = vadd.f32 %v4915_v35, %v1074_v25  ;;  %v1321_v39 = vadd.f32 %v1305_v28, %v1255_v33  ;;  %v6675_v25 = vld [vmem:[#allocation102_spill] sm:$0xff] }
 0x2cd   :  { %v1387_v60 = vmul.f32 %v4712_v23, %v6667_v19  ;;  %v599_v40 = vadd.f32 %v583_v50, %v533_v56  ;;  %v6668_v20 = vld [vmem:[#allocation71_spill] sm:$0xff]  ;;  %1656 = vrot.lane.b32.xlu0 %v5105_v27, %s3173_s22  ;;  %v961_v0 = vadd.f32 %v5000_v7, %v895_v41  ;;  %v1301_v16 = vmul.f32 %v4664_v55, %v6670_v57  ;;  %v6671_v19 = vld [vmem:[#allocation84_spill] sm:$0xff]  ;;  %v5121_v56 = vpop.permute.xlu1 %1293 }
 0x2ce   :  { %1720 = vrot.lane.b32.xlu1 %v6668_v20, %s3172_s21  ;;  %v5115_v58 = vmul.f32 %v4548_v5, %v6671_v19  ;;  %v5119_v50 = vmul.f32 %v4812_v48, %v6672_v17  ;;  %v860_v62 = vadd.f32 %v844_v15, %v778_v13  ;;  %6673 = vst [vmem:[#allocation53_spill] sm:$0xff] %v5121_v56  ;;  %v5123_v20 = vpop.permute.xlu0 %1277  ;;  %v6676_v33 = vld [vmem:[#allocation139_spill] sm:$0xff]  ;;  %v6677_v19 = vld [vmem:[#allocation88_spill] sm:$0xff] }
 0x2cf   :  { %v681_v53 = vadd.f32 %v665_v63, %v599_v40  ;;  %6674 = vst [vmem:[#allocation83_spill] sm:$0xff] %v5123_v20  ;;  %v1403_v35 = vadd.f32 %v1387_v60, %v1321_v39  ;;  %v1027_v7 = vmul.f32 %v4858_v24, %v6675_v25  ;;  %v1300_v28 = vmul.f32 %v4664_v55, %v6676_v33  ;;  %v5131_v57 = vld [vmem:[#allocation2 + $0x1a0] sm:$0xff]  ;;  %v6678_v63 = vld [vmem:[#allocation174_spill] sm:$0xff]  ;;  %v5150_v25 = vld [vmem:[%s6291_s3 + $0x88] sm:$0xff] }
 0x2d0   :  { %v1383_v41 = vmul.f32 %v4712_v23, %v4851_v36  ;;  %v5135_v15 = vmul.f32 %v4858_v24, %v6677_v19  ;;  %v714_v13 = vadd.f32 %v6678_v63, %v680_v3  ;;  %v5138_v40 = vadd.f32 %v1125_v11, %v1075_v12  ;;  %v6679_v36 = vld [vmem:[#allocation181_spill] sm:$0xff]  ;;  %v6680_v11 = vld [vmem:[#allocation96_spill] sm:$0xff]  ;;  %v6682_v19 = vld [vmem:[#allocation170_spill] sm:$0xff] }
 0x2d1   :  { %1736 = vrot.lane.b32.xlu0 %v5131_v57, %s3172_s21  ;;  %v1043_v60 = vadd.f32 %v1027_v7, %v961_v0  ;;  %v1317_v39 = vadd.f32 %v1301_v16, %v5019_v42  ;;  %v1382_v17 = vmul.f32 %v4712_v23, %v6679_v36  ;;  %v1222_v3 = vadd.f32 %v4922_v52, %v1140_v9  ;;  %v6683_v0 = vld [vmem:[#allocation122_spill] sm:$0xff]  ;;  %v5159_v16 = vpop.permute.xlu1 %1373  ;;  %v6684_v27 = vld [vmem:[#allocation159_spill] sm:$0xff]  ;;  %v5168_v52 = vld [vmem:[%s6291_s3 + $0x90] sm:$0xff] }
 0x2d2   :  { %1816 = vrot.lane.b32.xlu1 %v4795_v34, %s3173_s22  ;;  %v764_v12 = vmul.f32 %v4495_v31, %v6680_v11  ;;  %v6681_v34 = vld [vmem:[#allocation166_spill] sm:$0xff]  ;;  %v715_v63 = vadd.f32 %v6682_v19, %v681_v53  ;;  %v500_v42 = vmul.f32 %v4253_v21, %v6683_v0  ;;  %v5161_v7 = vpop.permute.xlu0 %1357  ;;  %v1316_v36 = vadd.f32 %v1300_v28, %v4885_v29  ;;  %v6686_v11 = vld [vmem:[#allocation132_spill] sm:$0xff] }
 0x2d3   :  { %v894_v33 = vadd.f32 %v6681_v34, %v860_v62  ;;  %v1437_v20 = vadd.f32 %v6684_v27, %v1403_v35  ;;  %v1399_v56 = vadd.f32 %v1383_v41, %v1317_v39  ;;  %v6685_v62 = vld [vmem:[#allocation129_spill] sm:$0xff]  ;;  %v1480_v21 = vmul.f32 %v5150_v25, %v6686_v11  ;;  %v6687_v29 = vld [vmem:[#allocation98_spill] sm:$0xff]  ;;  %v6690_v19 = vld [vmem:[#allocation20_spill] sm:$0xff] }
 0x2d4   :  { %v780_v9 = vadd.f32 %v764_v12, %v714_v13  ;;  %v584_v53 = vmul.f32 %v4343_v46, %v6685_v62  ;;  %v5174_v34 = vld [vmem:[#allocation2 + $0x69] sm:$0xff]  ;;  %v846_v27 = vmul.f32 %v4548_v5, %v6687_v29  ;;  %v6688_v35 = vld [vmem:[#allocation178_spill] sm:$0xff]  ;;  %v1398_v41 = vadd.f32 %v1382_v17, %v1316_v36 }
 0x2d5   :  { %1832 = vrot.lane.b32.xlu0 %v4793_v30, %s3173_s22  ;;  %v1077_v28 = vadd.f32 %v6688_v35, %v1043_v60  ;;  %v6689_v13 = vld [vmem:[#allocation49_spill] sm:$0xff]  ;;  %v960_v39 = vadd.f32 %v5049_v22, %v894_v33  ;;  %v781_v12 = vadd.f32 %v765_v45, %v715_v63  ;;  %v534_v0 = vadd.f32 %v6690_v19, %v500_v42  ;;  %v5189_v11 = vpop.permute.xlu1 %1469  ;;  %v6691_v17 = vld [vmem:[#allocation144_spill] sm:$0xff]  ;;  %v5197_v22 = vld [vmem:[#allocation2 + $0x159] sm:$0xff] }
 0x2d6   :  { %1896 = vrot.lane.b32.xlu1 %v5174_v34, %s3172_s21  ;;  %v1479_v46 = vmul.f32 %v5150_v25, %v6689_v13  ;;  %v1563_v62 = vmul.f32 %v5168_v52, %v4924_v44  ;;  %v1454_v30 = vpop.permute.xlu0 %1453  ;;  %v1562_v29 = vmul.f32 %v5168_v52, %v4926_v38  ;;  %v1482_v60 = vmul.f32 %v5150_v25, %v5060_v54  ;;  %v6692_v38 = vld [vmem:[#allocation15_spill] sm:$0xff]  ;;  %v6694_v19 = vld [vmem:[#allocation104_spill] sm:$0xff] }
 0x2d7   :  { %v1433_v36 = vadd.f32 %v6691_v17, %v1399_v56  ;;  %v1483_v35 = vmul.f32 %v5150_v25, %v1454_v30  ;;  %v862_v45 = vadd.f32 %v846_v27, %v780_v9  ;;  %v600_v33 = vadd.f32 %v584_v53, %v534_v0  ;;  %v6693_v56 = vld [vmem:[#allocation143_spill] sm:$0xff]  ;;  %v6695_v53 = vld [vmem:[#allocation110_spill] sm:$0xff] }
 0x2d8   :  { %v1496_v63 = vadd.f32 %v1480_v21, %v4847_v14  ;;  %v1495_v44 = vadd.f32 %v1479_v46, %v4844_v37  ;;  %v1487_v54 = vmul.f32 %v5150_v25, %v6692_v38  ;;  %v1432_v42 = vadd.f32 %v6693_v56, %v1398_v41  ;;  %v5220_v17 = vld [vmem:[#allocation2 + $0x1b8] sm:$0xff]  ;;  %v6696_v38 = vld [vmem:[#allocation140_spill] sm:$0xff] }
 0x2d9   :  { %1912 = vrot.lane.b32.xlu0 %v5197_v22, %s3172_s21  ;;  %v5208_v13 = vadd.f32 %v1483_v35, %v1433_v36  ;;  %v1127_v9 = vmul.f32 %v4911_v2, %v6694_v19  ;;  %v666_v14 = vmul.f32 %v4406_v49, %v6695_v53  ;;  %v5215_v27 = vpop.permute.xlu1 %1550  ;;  %v1570_v46 = vmul.f32 %v5168_v52, %v4956_v6  ;;  %v5233_v6 = vld [vmem:[%s6291_s3 + $0xa0] sm:$0xff]  ;;  %v6701_v19 = vld [vmem:[#allocation145_spill] sm:$0xff] }
 0x2da   :  { %3071 = vrot.lane.b32.xlu1 %v4873_v51, %s3173_s22  ;;  %v863_v51 = vadd.f32 %v5115_v58, %v781_v12  ;;  %v1579_v21 = vadd.f32 %v1563_v62, %v1496_v63  ;;  %v1535_v0 = vpop.permute.xlu0 %1534  ;;  %v1578_v37 = vadd.f32 %v1562_v29, %v1495_v44  ;;  %v1498_v30 = vadd.f32 %v1482_v60, %v1432_v42  ;;  %v5226_v58 = vld [vmem:[#allocation2 + $0xc8] sm:$0xff]  ;;  %v6697_v12 = vld [vmem:[#allocation39_spill] sm:$0xff]  ;;  %v6699_v60 = vld [vmem:[#allocation106_spill] sm:$0xff] }
 0x2db   :  { %v1565_v41 = vmul.f32 %v5168_v52, %v1535_v0  ;;  %v1143_v36 = vadd.f32 %v1127_v9, %v1077_v28  ;;  %v1042_v35 = vadd.f32 %v5014_v4, %v960_v39  ;;  %v1256_v49 = vadd.f32 %v6696_v38, %v1222_v3  ;;  %v6698_v3 = vld [vmem:[#allocation100_spill] sm:$0xff] }
 0x2dc   :  { %v896_v62 = vadd.f32 %v6697_v12, %v862_v45  ;;  %v682_v28 = vadd.f32 %v666_v14, %v600_v33  ;;  %v1503_v29 = vadd.f32 %v1487_v54, %v1437_v20  ;;  %v946_v39 = vmul.f32 %v4812_v48, %v6698_v3  ;;  %v6700_v44 = vld [vmem:[#allocation176_spill] sm:$0xff]  ;;  %v6702_v45 = vld [vmem:[#allocation147_spill] sm:$0xff]  ;;  %v6703_v14 = vld [vmem:[#allocation161_spill] sm:$0xff] }
 0x2dd   :  { %1722 = vrot.lane.b32.xlu0 %v5226_v58, %s3172_s21  ;;  %v5236_v4 = vadd.f32 %v1565_v41, %v1498_v30  ;;  %v1209_v63 = vmul.f32 %v4832_v43, %v6699_v60  ;;  %v897_v56 = vadd.f32 %v6700_v44, %v863_v51  ;;  %v1631_v42 = vpop.permute.xlu1 %1630  ;;  %v1613_v9 = vadd.f32 %v6701_v19, %v1579_v21  ;;  %v6704_v51 = vld [vmem:[#allocation28_spill] sm:$0xff]  ;;  %v6707_v60 = vld [vmem:[#allocation121_spill] sm:$0xff] }
 0x2de   :  { %1738 = vrot.lane.b32.xlu1 %v5220_v17, %s3172_s21  ;;  %v1629_v53 = vpop.permute.xlu0 %1628  ;;  %v1586_v0 = vadd.f32 %v1570_v46, %v1503_v29  ;;  %v1663_v38 = vmul.f32 %v5233_v6, %v1631_v42  ;;  %v1612_v33 = vadd.f32 %v6702_v45, %v1578_v37  ;;  %v1076_v30 = vadd.f32 %v6703_v14, %v1042_v35  ;;  %v6705_v46 = vld [vmem:[#allocation22_spill] sm:$0xff]  ;;  %v6706_v3 = vld [vmem:[#allocation112_spill] sm:$0xff] }
 0x2df   :  { %v1662_v20 = vmul.f32 %v5233_v6, %v1629_v53  ;;  %v1225_v54 = vadd.f32 %v1209_v63, %v1143_v36  ;;  %v1223_v41 = vadd.f32 %v5096_v61, %v5138_v40  ;;  %v962_v21 = vadd.f32 %v946_v39, %v896_v62  ;;  %v6708_v62 = vld [vmem:[#allocation150_spill] sm:$0xff]  ;;  %v6709_v39 = vld [vmem:[#allocation172_spill] sm:$0xff]  ;;  %v6712_v53 = vld [vmem:[#allocation175_spill] sm:$0xff] }
 0x2e0   :  { %v716_v12 = vadd.f32 %v6705_v46, %v682_v28  ;;  %v5255_v29 = vadd.f32 %v1663_v38, %v1613_v9  ;;  %v766_v36 = vmul.f32 %v4495_v31, %v6706_v3  ;;  %v963_v35 = vadd.f32 %v5119_v50, %v897_v56  ;;  %v6710_v42 = vld [vmem:[#allocation8_spill] sm:$0xff]  ;;  %v5273_v9 = vld [vmem:[#allocation2 + $0x171] sm:$0xff] }
 0x2e1   :  { %1818 = vrot.lane.b32.xlu0 %v6704_v51, %s3173_s22  ;;  %v5257_v37 = vadd.f32 %v1662_v20, %v1612_v33  ;;  %v1029_v61 = vmul.f32 %v4858_v24, %v6707_v60  ;;  %v5265_v40 = vpop.permute.xlu1 %1646  ;;  %v1381_v28 = vmul.f32 %v4712_v23, %v6708_v62  ;;  %v1309_v44 = vmul.f32 %v4664_v55, %v6709_v39  ;;  %v5275_v50 = vld [vmem:[#allocation2 + $0x81] sm:$0xff]  ;;  %v6716_v46 = vld [vmem:[#allocation13_spill] sm:$0xff] }
 0x2e2   :  { %1834 = vrot.lane.b32.xlu1 %v4969_v1, %s3173_s22  ;;  %v1322_v1 = vadd.f32 %v4960_v10, %v1256_v49  ;;  %v1645_v63 = vpop.permute.xlu0 %1644  ;;  %v1620_v19 = vadd.f32 %v6710_v42, %v1586_v0  ;;  %v1142_v56 = vadd.f32 %v5033_v59, %v1076_v30  ;;  %v6711_v10 = vld [vmem:[#allocation9_spill] sm:$0xff]  ;;  %v1259_v38 = vadd.f32 %v6712_v53, %v1225_v54  ;;  %v6713_v33 = vld [vmem:[#allocation12_spill] sm:$0xff]  ;;  %v6719_v62 = vld [vmem:[#allocation51_spill] sm:$0xff] }
 0x2e3   :  { %v1670_v31 = vmul.f32 %v5233_v6, %v1645_v63  ;;  %v1257_v49 = vadd.f32 %v6711_v10, %v1223_v41  ;;  %v782_v45 = vadd.f32 %v766_v36, %v716_v12  ;;  %v1044_v0 = vadd.f32 %v5135_v15, %v962_v21  ;;  %v6714_v59 = vld [vmem:[#allocation153_spill] sm:$0xff]  ;;  %v6715_v41 = vld [vmem:[#allocation78_spill] sm:$0xff]  ;;  %v6717_v12 = vld [vmem:[#allocation75_spill] sm:$0xff] }
 0x2e4   :  { %v1391_v20 = vmul.f32 %v4712_v23, %v6713_v33  ;;  %v1071_v30 = vadd.f32 %v6714_v59, %v5052_v47  ;;  %v1307_v54 = vmul.f32 %v4664_v55, %v6715_v41  ;;  %v1045_v51 = vadd.f32 %v1029_v61, %v963_v35  ;;  %v6718_v21 = vld [vmem:[#allocation116_spill] sm:$0xff]  ;;  %v6720_v47 = vld [vmem:[#allocation90_spill] sm:$0xff]  ;;  %v6722_v10 = vld [vmem:[#allocation177_spill] sm:$0xff] }
 0x2e5   :  { %1898 = vrot.lane.b32.xlu0 %v5275_v50, %s3172_s21  ;;  %v5287_v14 = vadd.f32 %v1670_v31, %v1620_v19  ;;  %v1404_v3 = vadd.f32 %v6716_v46, %v1322_v1  ;;  %v5294_v60 = vpop.permute.xlu1 %1375  ;;  %v1121_v15 = vmul.f32 %v4911_v2, %v6717_v12  ;;  %v848_v36 = vmul.f32 %v4548_v5, %v6718_v21  ;;  %v5306_v1 = vld [vmem:[#allocation2 + $0x51] sm:$0xff]  ;;  %v6727_v41 = vld [vmem:[#allocation156_spill] sm:$0xff]  ;;  %v5330_v21 = vld [vmem:[#allocation2] sm:$0xff] }
 0x2e6   :  { %1914 = vrot.lane.b32.xlu1 %v5273_v9, %s3172_s21  ;;  %v5296_v63 = vpop.permute.xlu0 %1359  ;;  %v1397_v39 = vadd.f32 %v1381_v28, %v6719_v62  ;;  %v1325_v42 = vadd.f32 %v1309_v44, %v1259_v38  ;;  %v1128_v19 = vmul.f32 %v4911_v2, %v6720_v47  ;;  %v1224_v35 = vadd.f32 %v5037_v26, %v1142_v56  ;;  %v6723_v28 = vld [vmem:[#allocation17_spill] sm:$0xff]  ;;  %v6724_v38 = vld [vmem:[#allocation92_spill] sm:$0xff]  ;;  %v6731_v62 = vld [vmem:[#allocation6_spill] sm:$0xff] }
 0x2e7   :  { %v1323_v61 = vadd.f32 %v1307_v54, %v1257_v49  ;;  %6721 = vst [vmem:[#allocation79_spill] sm:$0xff] %v5306_v1  ;;  %v864_v31 = vadd.f32 %v848_v36, %v782_v45  ;;  %v1078_v5 = vadd.f32 %v6722_v10, %v1044_v0  ;;  %v1481_v44 = vmul.f32 %v5150_v25, %v6723_v28  ;;  %v6725_v26 = vld [vmem:[#allocation16_spill] sm:$0xff]  ;;  %v6728_v45 = vld [vmem:[#allocation142_spill] sm:$0xff]  ;;  %v6732_v47 = vld [vmem:[#allocation149_spill] sm:$0xff] }
 0x2e8   :  { %v1407_v53 = vadd.f32 %v1391_v20, %v1325_v42  ;;  %v1210_v33 = vmul.f32 %v4832_v43, %v6724_v38  ;;  %v1079_v56 = vadd.f32 %v6725_v26, %v1045_v51  ;;  %v6726_v49 = vld [vmem:[#allocation128_spill] sm:$0xff]  ;;  %v1438_v54 = vadd.f32 %v6727_v41, %v1404_v3  ;;  %6729 = vst [vmem:[#allocation18_spill] sm:$0xff] %v5330_v21  ;;  %v6730_v36 = vld [vmem:[#allocation118_spill] sm:$0xff]  ;;  %v6735_v26 = vld [vmem:[#allocation179_spill] sm:$0xff] }
 0x2e9   :  { %1992 = vrot.lane.b32.xlu0 %v4996_v8, %s3173_s22  ;;  %v1129_v59 = vmul.f32 %v4911_v2, %v6726_v49  ;;  %v5321_v46 = vpop.permute.xlu1 %1471  ;;  %v1431_v0 = vadd.f32 %v6728_v45, %v1397_v39  ;;  %v1564_v20 = vmul.f32 %v5168_v52, %v5092_v18  ;;  %v1491_v12 = vmul.f32 %v5150_v25, %v5189_v11  ;;  %v6733_v18 = vld [vmem:[#allocation21_spill] sm:$0xff]  ;;  %v6734_v11 = vld [vmem:[#allocation115_spill] sm:$0xff]  ;;  %v6736_v45 = vld [vmem:[#allocation138_spill] sm:$0xff] }
 0x2ea   :  { %1994 = vrot.lane.b32.xlu1 %v5306_v1, %s3173_s22  ;;  %v5323_v8 = vpop.permute.xlu0 %1455  ;;  %v5334_v51 = vpack.i.bf16 %v5330_v21, %v5330_v21  ;;  %v948_v3 = vmul.f32 %v4812_v48, %v6730_v36  ;;  %v1258_v42 = vadd.f32 %v6731_v62, %v1224_v35  ;;  %v1389_v39 = vmul.f32 %v4712_v23, %v6732_v47  ;;  %v6737_v35 = vld [vmem:[#allocation163_spill] sm:$0xff]  ;;  %v6738_v62 = vld [vmem:[#allocation10_spill] sm:$0xff] }
 0x2eb   :  { %v898_v10 = vadd.f32 %v6734_v11, %v864_v31  ;;  %v1144_v28 = vadd.f32 %v1128_v19, %v1078_v5  ;;  %v1497_v38 = vadd.f32 %v1481_v44, %v1431_v0  ;;  %v1441_v49 = vadd.f32 %v6735_v26, %v1407_v53  ;;  %v6739_v53 = vld [vmem:[#allocation158_spill] sm:$0xff]  ;;  %v5359_v0 = vld [vmem:[#allocation2 + $0xb0] sm:$0xff] }
 0x2ec   :  { %v1145_v41 = vadd.f32 %v1129_v59, %v1079_v56  ;;  %v1308_v48 = vmul.f32 %v4664_v55, %v6736_v45  ;;  %v1211_v36 = vmul.f32 %v4832_v43, %v6737_v35  ;;  %v1488_v47 = vmul.f32 %v5150_v25, %v6738_v62  ;;  %v6740_v56 = vld [vmem:[#allocation29_spill] sm:$0xff] }
 0x2ed   :  { %2008 = vrot.lane.b32.xlu0 %v6733_v18, %s3173_s22  ;;  %v1553_v21 = vpop.permute.xlu1 %1552  ;;  %v1580_v1 = vadd.f32 %v1564_v20, %v1497_v38  ;;  %v1507_v18 = vadd.f32 %v1491_v12, %v1441_v49  ;;  %v1405_v5 = vadd.f32 %v1389_v39, %v1323_v61  ;;  %v1122_v44 = vmul.f32 %v4911_v2, %v6739_v53  ;;  %v6741_v39 = vld [vmem:[#allocation108_spill] sm:$0xff]  ;;  %v6742_v62 = vld [vmem:[#allocation157_spill] sm:$0xff] }
 0x2ee   :  { %2010 = vrot.lane.b32.xlu1 %v5068_v32, %s3173_s22  ;;  %v1537_v32 = vpop.permute.xlu0 %1536  ;;  %v1574_v31 = vmul.f32 %v5168_v52, %v1553_v21  ;;  %v1571_v59 = vmul.f32 %v5168_v52, %v6740_v56  ;;  %v964_v20 = vadd.f32 %v948_v3, %v898_v10  ;;  %v1226_v12 = vadd.f32 %v1210_v33, %v1144_v28  ;;  %v6743_v33 = vld [vmem:[#allocation151_spill] sm:$0xff] }
 0x2ef   :  { %v1566_v19 = vmul.f32 %v5168_v52, %v1537_v32  ;;  %v5370_v61 = vadd.f32 %v1121_v15, %v1071_v30  ;;  %v1030_v11 = vmul.f32 %v4858_v24, %v6741_v39  ;;  %v1227_v38 = vadd.f32 %v1211_v36, %v1145_v41  ;;  %v6745_v15 = vld [vmem:[#allocation11_spill] sm:$0xff]  ;;  %v6751_v39 = vld [vmem:[#allocation25_spill] sm:$0xff] }
 0x2f0   :  { %v5365_v21 = vadd.f32 %v1574_v31, %v1507_v18  ;;  %v1504_v26 = vadd.f32 %v1488_v47, %v1438_v54  ;;  %v1324_v35 = vadd.f32 %v1308_v48, %v1258_v42  ;;  %v1130_v3 = vmul.f32 %v4911_v2, %v6742_v62  ;;  %v5385_v41 = vld [vmem:[#allocation2 + $0x99] sm:$0xff]  ;;  %v5394_v2 = vld [vmem:[%s6291_s3 + $0xa8] sm:$0xff] }
 0x2f1   :  { %3076 = vrot.lane.b32.xlu0 %v5334_v51, %s3172_s21  ;;  %v5368_v32 = vadd.f32 %v1566_v19, %v5208_v13  ;;  %v5374_v49 = vpop.permute.xlu1 %1648  ;;  %v1614_v10 = vadd.f32 %v6743_v33, %v1580_v1  ;;  %v6744_v13 = vld [vmem:[#allocation168_spill] sm:$0xff]  ;;  %v1311_v24 = vmul.f32 %v4664_v55, %v6745_v15  ;;  %v1046_v1 = vadd.f32 %v1030_v11, %v964_v20  ;;  %v6746_v54 = vld [vmem:[#allocation30_spill] sm:$0xff]  ;;  %v6747_v48 = vld [vmem:[#allocation171_spill] sm:$0xff] }
 0x2f2   :  { %1820 = vrot.lane.b32.xlu1 %v5359_v0, %s3173_s22  ;;  %v1633_v45 = vpop.permute.xlu0 %1632  ;;  %v5381_v18 = vadd.f32 %v6744_v13, %v1405_v5  ;;  %v1587_v30 = vadd.f32 %v1571_v59, %v1504_v26  ;;  %v1138_v42 = vadd.f32 %v1122_v44, %v6746_v54  ;;  %v1260_v36 = vadd.f32 %v6747_v48, %v1226_v12  ;;  %v6748_v31 = vld [vmem:[#allocation180_spill] sm:$0xff]  ;;  %v6749_v5 = vld [vmem:[#allocation135_spill] sm:$0xff]  ;;  %v6753_v13 = vld [vmem:[#allocation169_spill] sm:$0xff] }
 0x2f3   :  { %v1664_v28 = vmul.f32 %v5233_v6, %v1633_v45  ;;  %v1390_v19 = vmul.f32 %v4712_v23, %v6748_v31  ;;  %v1310_v53 = vmul.f32 %v4664_v55, %v6749_v5  ;;  %v6750_v56 = vld [vmem:[#allocation27_spill] sm:$0xff]  ;;  %v1261_v26 = vadd.f32 %v6751_v39, %v1227_v38  ;;  %v5413_v33 = vld [vmem:[#allocation2 + $0x189] sm:$0xff]  ;;  %v6757_v39 = vld [vmem:[#allocation46_spill] sm:$0xff] }
 0x2f4   :  { %v1302_v59 = vmul.f32 %v4664_v55, %v6750_v56  ;;  %v1393_v44 = vmul.f32 %v4712_v23, %v5159_v16  ;;  %v1671_v20 = vmul.f32 %v5233_v6, %v5265_v40  ;;  %v1621_v38 = vadd.f32 %v6753_v13, %v1587_v30  ;;  %v6754_v16 = vld [vmem:[#allocation130_spill] sm:$0xff]  ;;  %v6755_v15 = vld [vmem:[#allocation131_spill] sm:$0xff] }
 0x2f5   :  { %1836 = vrot.lane.b32.xlu0 %v5131_v57, %s3173_s22  ;;  %v5398_v47 = vadd.f32 %v1664_v28, %v1614_v10  ;;  %v1713_v45 = vpop.permute.xlu1 %1712  ;;  %v6752_v10 = vld [vmem:[#allocation164_spill] sm:$0xff]  ;;  %v1327_v55 = vadd.f32 %v1311_v24, %v1261_v26  ;;  %v1392_v40 = vmul.f32 %v4712_v23, %v6754_v16  ;;  %v1384_v54 = vmul.f32 %v4712_v23, %v6755_v15  ;;  %v6756_v24 = vld [vmem:[#allocation114_spill] sm:$0xff] }
 0x2f6   :  { %1900 = vrot.lane.b32.xlu1 %v5385_v41, %s3172_s21  ;;  %v1711_v62 = vpop.permute.xlu0 %1710  ;;  %v1745_v12 = vmul.f32 %v5394_v2, %v1713_v45  ;;  %v1203_v28 = vmul.f32 %v4832_v43, %v6752_v10  ;;  %v1080_v30 = vadd.f32 %v6756_v24, %v1046_v1  ;;  %v1406_v5 = vadd.f32 %v1390_v19, %v1324_v35  ;;  %v6758_v15 = vld [vmem:[#allocation24_spill] sm:$0xff] }
 0x2f7   :  { %v1744_v11 = vmul.f32 %v5394_v2, %v1711_v62  ;;  %v1326_v56 = vadd.f32 %v1310_v53, %v1260_v36  ;;  %v1318_v26 = vadd.f32 %v1302_v59, %v6757_v39  ;;  %v1409_v10 = vadd.f32 %v1393_v44, %v1327_v55  ;;  %v6761_v44 = vld [vmem:[#allocation77_spill] sm:$0xff] }
 0x2f8   :  { %v5427_v48 = vadd.f32 %v1745_v12, %v5255_v29  ;;  %v1687_v13 = vadd.f32 %v1671_v20, %v1621_v38  ;;  %v1212_v29 = vmul.f32 %v4832_v43, %v6758_v15  ;;  %v6759_v12 = vld [vmem:[#allocation26_spill] sm:$0xff]  ;;  %v1146_v59 = vadd.f32 %v1130_v3, %v1080_v30  ;;  %v3127_v15 = vld [vmem:[%s6291_s3 + $0x68] sm:$0xff] }
 0x2f9   :  { %1916 = vrot.lane.b32.xlu0 %v5413_v33, %s3172_s21  ;;  %v5430_v31 = vadd.f32 %v1744_v11, %v5257_v37  ;;  %v1729_v45 = vpop.permute.xlu1 %1728  ;;  %v1204_v37 = vmul.f32 %v4832_v43, %v6759_v12  ;;  %v6760_v11 = vld [vmem:[#allocation47_spill] sm:$0xff]  ;;  %v1408_v1 = vadd.f32 %v1392_v40, %v1326_v56  ;;  %v1400_v36 = vadd.f32 %v1384_v54, %v1318_v26  ;;  %v6762_v20 = vld [vmem:[#allocation162_spill] sm:$0xff] }
 0x2fa   :  { %1996 = vrot.lane.b32.xlu1 %v5174_v34, %s3173_s22  ;;  %v1727_v62 = vpop.permute.xlu0 %1726  ;;  %v1753_v16 = vmul.f32 %v5394_v2, %v1729_v45  ;;  %v1490_v35 = vmul.f32 %v5150_v25, %v6760_v11  ;;  %v1489_v43 = vmul.f32 %v5150_v25, %v6761_v44  ;;  %v1440_v55 = vadd.f32 %v6762_v20, %v1406_v5  ;;  %v5464_v30 = vld [vmem:[#allocation2 + $0xb1] sm:$0xff]  ;;  %v6764_v45 = vld [vmem:[#allocation63_spill] sm:$0xff] }
 0x2fb   :  { %v1752_v23 = vmul.f32 %v5394_v2, %v1727_v62  ;;  %v1573_v38 = vmul.f32 %v5168_v52, %v5215_v27  ;;  %v1492_v40 = vmul.f32 %v5150_v25, %v5321_v46  ;;  %v1484_v54 = vmul.f32 %v5150_v25, %v5323_v8  ;;  %v6765_v62 = vld [vmem:[#allocation14_spill] sm:$0xff]  ;;  %v5483_v20 = vld [vmem:[#allocation2 + $0x1a1] sm:$0xff] }
 0x2fc   :  { %v5446_v19 = vadd.f32 %v1753_v16, %v1687_v13  ;;  %v1228_v26 = vadd.f32 %v1212_v29, %v1146_v59  ;;  %v1506_v5 = vadd.f32 %v1490_v35, %v1440_v55  ;;  %v1572_v27 = vmul.f32 %v5168_v52, %v6764_v45  ;;  %v6766_v13 = vld [vmem:[#allocation148_spill] sm:$0xff] }
 0x2fd   :  { %2012 = vrot.lane.b32.xlu0 %v5197_v22, %s3173_s22  ;;  %v5449_v53 = vadd.f32 %v1752_v23, %v5287_v14  ;;  %v1474_v24 = vpop.permute.xlu1 %1473  ;;  %v6763_v14 = vld [vmem:[#allocation48_spill] sm:$0xff]  ;;  %v1220_v46 = vadd.f32 %v1204_v37, %v1138_v42  ;;  %v1442_v8 = vadd.f32 %v6765_v62, %v1408_v1  ;;  %v3126_v23 = vld [vmem:[#allocation2 + $0x1b8] sm:$0xff]  ;;  %v1219_v12 = vadd.f32 %v1203_v28, %v5370_v61  ;;  %v6767_v61 = vld [vmem:[#allocation53_spill] sm:$0xff] }
 0x2fe   :  { %1822 = vrot.lane.b32.xlu1 %v5226_v58, %s3173_s22  ;;  %v5456_v39 = vpop.permute.xlu0 %1457  ;;  %v1443_v56 = vadd.f32 %v6763_v14, %v1409_v10  ;;  %v1493_v3 = vmul.f32 %v5150_v25, %v1474_v24  ;;  %v1434_v10 = vadd.f32 %v6766_v13, %v1400_v36  ;;  %v1246_v29 = vmul.f32 %v3127_v15, %v3126_v23  ;;  %v3128_v14 = vld [vmem:[%s6291_s3 + $0x70] sm:$0xff]  ;;  %v6771_v62 = vld [vmem:[#allocation182_spill] sm:$0xff]  ;;  %v6772_v13 = vld [vmem:[#allocation152_spill] sm:$0xff] }
 0x2ff   :  { %v1505_v11 = vadd.f32 %v1489_v43, %v5381_v18  ;;  %v1589_v35 = vadd.f32 %v1573_v38, %v1506_v5  ;;  %v1508_v42 = vadd.f32 %v1492_v40, %v1442_v8  ;;  %v1312_v28 = vmul.f32 %v3128_v14, %v6767_v61  ;;  %v6768_v18 = vld [vmem:[#allocation146_spill] sm:$0xff]  ;;  %v6769_v38 = vld [vmem:[#allocation83_spill] sm:$0xff] }
 0x300   :  { %v5474_v16 = vadd.f32 %v1493_v3, %v1443_v56  ;;  %v1500_v37 = vadd.f32 %v1484_v54, %v1434_v10  ;;  %v1262_v24 = vadd.f32 %v1246_v29, %v1228_v26  ;;  %v1254_v43 = vadd.f32 %v6768_v18, %v1220_v46  ;;  %v6770_v3 = vld [vmem:[#allocation120_spill] sm:$0xff]  ;;  %v3129_v5 = vld [vmem:[%s6291_s3 + $0x78] sm:$0xff] }
 0x301   :  { %1838 = vrot.lane.b32.xlu0 %v5220_v17, %s3173_s22  ;;  %v1555_v59 = vpop.permute.xlu1 %1554  ;;  %v1588_v55 = vadd.f32 %v1572_v27, %v1505_v11  ;;  %v1304_v40 = vmul.f32 %v3128_v14, %v6769_v38  ;;  %v1303_v26 = vmul.f32 %v3128_v14, %v6770_v3  ;;  %v1394_v45 = vmul.f32 %v3129_v5, %v5294_v60  ;;  %v6774_v60 = vld [vmem:[#allocation165_spill] sm:$0xff] }
 0x302   :  { %1902 = vrot.lane.b32.xlu1 %v5464_v30, %s3172_s21  ;;  %v1539_v44 = vpop.permute.xlu0 %1538  ;;  %v1575_v1 = vmul.f32 %v5168_v52, %v1555_v59  ;;  %v1623_v8 = vadd.f32 %v6771_v62, %v1589_v35  ;;  %v1615_v46 = vadd.f32 %v6772_v13, %v5236_v4  ;;  %v1386_v23 = vmul.f32 %v3129_v5, %v5296_v63  ;;  %v6773_v59 = vld [vmem:[#allocation154_spill] sm:$0xff] }
 0x303   :  { %v1567_v36 = vmul.f32 %v5168_v52, %v1539_v44  ;;  %v1672_v15 = vmul.f32 %v5233_v6, %v5374_v49  ;;  %v1253_v44 = vadd.f32 %v6773_v59, %v1219_v12  ;;  %v1320_v4 = vadd.f32 %v1304_v40, %v1254_v43  ;;  %v5533_v43 = vld [vmem:[#allocation2 + $0xc9] sm:$0xff] }
 0x304   :  { %v5495_v54 = vadd.f32 %v1575_v1, %v1508_v42  ;;  %v1328_v42 = vadd.f32 %v1312_v28, %v1262_v24  ;;  %v1385_v63 = vmul.f32 %v3129_v5, %v5161_v7  ;;  %v5525_v28 = vld [vmem:[#allocation2 + $0x1b9] sm:$0xff]  ;;  %v5543_v5 = vld [vmem:[#allocation2 + $0xe1] sm:$0xff] }
 0x305   :  { %1918 = vrot.lane.b32.xlu0 %v5483_v20, %s3172_s21  ;;  %v5497_v56 = vadd.f32 %v1567_v36, %v1500_v37  ;;  %v1651_v27 = vpop.permute.xlu1 %1650  ;;  %v1622_v37 = vadd.f32 %v6774_v60, %v1588_v55  ;;  %v1319_v1 = vadd.f32 %v1303_v26, %v1253_v44  ;;  %v1402_v24 = vadd.f32 %v1386_v23, %v1320_v4  ;;  %v3131_v7 = vld [vmem:[%s6291_s3 + $0x80] sm:$0xff] }
 0x306   :  { %1998 = vrot.lane.b32.xlu1 %v5275_v50, %s3173_s22  ;;  %v1635_v10 = vpop.permute.xlu0 %1634  ;;  %v1673_v29 = vmul.f32 %v5233_v6, %v1651_v27  ;;  %v1410_v36 = vadd.f32 %v1394_v45, %v1328_v42  ;;  %v1428_v18 = vmul.f32 %v3131_v7, %v5525_v28  ;;  %v1420_v38 = vmul.f32 %v5533_v43, %v3131_v7  ;;  %v5545_v45 = vld [vmem:[#allocation2 + $0x1d1] sm:$0xff]  ;;  %v3134_v4 = vld [vmem:[#allocation2 + $0x187] sm:$0xff] }
 0x307   :  { %v1665_v11 = vmul.f32 %v5233_v6, %v1635_v10  ;;  %v1688_v61 = vadd.f32 %v1672_v15, %v1622_v37  ;;  %v1401_v40 = vadd.f32 %v1385_v63, %v1319_v1  ;;  %6775 = vst [vmem:[#allocation124_spill] sm:$0xff] %v5543_v5  ;;  %v3133_v27 = vld [vmem:[#allocation2 + $0xb1] sm:$0xff]  ;;  %v1485_v10 = vmul.f32 %v5150_v25, %v5456_v39 }
 0x308   :  { %v5519_v35 = vadd.f32 %v1673_v29, %v1623_v8  ;;  %v1419_v62 = vmul.f32 %v3133_v27, %v3131_v7  ;;  %v1444_v13 = vadd.f32 %v1428_v18, %v1410_v36  ;;  %v1436_v15 = vadd.f32 %v1420_v38, %v1402_v24  ;;  %v5569_v63 = vld [vmem:[%s6291_s3 + $0x98] sm:$0xff]  ;;  %v5591_v27 = vld [vmem:[%s6291_s3 + $0xb0] sm:$0xff] }
 0x309   :  { %2014 = vrot.lane.b32.xlu0 %v5273_v9, %s3173_s22  ;;  %v5521_v49 = vadd.f32 %v1665_v11, %v1615_v46  ;;  %v1731_v14 = vpop.permute.xlu1 %1730  ;;  %v1608_v1 = vmul.f32 %v5569_v63, %v3134_v4  ;;  %v3136_v36 = vld [vmem:[#allocation2 + $0x97] sm:$0xff]  ;;  %v3139_v4 = vld [vmem:[#allocation2 + $0x140] sm:$0xff] }
 0x30a   :  { %3081 = vrot.lane.b32.xlu1 %v5334_v51, %s3173_s22  ;;  %v1715_v12 = vpop.permute.xlu0 %1714  ;;  %v1754_v55 = vmul.f32 %v5394_v2, %v1731_v14  ;;  %v1435_v11 = vadd.f32 %v1419_v62, %v1401_v40  ;;  %v1600_v14 = vmul.f32 %v3136_v36, %v5569_v63  ;;  %v3140_v36 = vld [vmem:[#allocation2 + $0x128] sm:$0xff] }
 0x30b   :  { %v1746_v51 = vmul.f32 %v5394_v2, %v1715_v12 }
 0x30c   :  { %v5538_v3 = vadd.f32 %v1754_v55, %v1688_v61  ;;  %v1501_v60 = vadd.f32 %v1485_v10, %v1435_v11  ;;  %v1616_v18 = vadd.f32 %v1600_v14, %v5368_v32 }
 0x30d   :  { %1904 = vrot.lane.b32.xlu0 %v5533_v43, %s3172_s21  ;;  %v5541_v26 = vadd.f32 %v1746_v51, %v5398_v47  ;;  %v1476_v8 = vpop.permute.xlu1 %1475  ;;  %v3085_v47 = vpack.i.bf16 %v5545_v45, %v5543_v5  ;;  %v1624_v51 = vadd.f32 %v1608_v1, %v5365_v21  ;;  %v1787_v1 = vmul.f32 %v3139_v4, %v5591_v27 }
 0x30e   :  { %1920 = vrot.lane.b32.xlu1 %v5525_v28, %s3172_s21  ;;  %v1460_v46 = vpop.permute.xlu0 %1459  ;;  %v1494_v23 = vmul.f32 %v5150_v25, %v1476_v8 }
 0x30f   :  { %v1486_v29 = vmul.f32 %v5150_v25, %v1460_v46  ;;  %v3137_v46 = vld [vmem:[#allocation2 + $0x50] sm:$0xff] }
 0x310   :  { %v5557_v59 = vadd.f32 %v1494_v23, %v1444_v13  ;;  %v5601_v13 = vld [vmem:[%s6291_s3 + $0xb8] sm:$0xff]  ;;  %v1779_v10 = vmul.f32 %v3137_v46, %v5591_v27 }
 0x311   :  { %2000 = vrot.lane.b32.xlu0 %v5385_v41, %s3173_s22  ;;  %v5559_v44 = vadd.f32 %v1486_v29, %v1436_v15  ;;  %v1557_v39 = vpop.permute.xlu1 %1556  ;;  %v3138_v23 = vld [vmem:[#allocation2 + $0x38] sm:$0xff] }
 0x312   :  { %2016 = vrot.lane.b32.xlu1 %v5413_v33, %s3173_s22  ;;  %v1541_v42 = vpop.permute.xlu0 %1540  ;;  %v1576_v37 = vmul.f32 %v5168_v52, %v1557_v39  ;;  %v1778_v15 = vmul.f32 %v3138_v23, %v5591_v27 }
 0x313   :  { %v1568_v25 = vmul.f32 %v5168_v52, %v1541_v42  ;;  %v1795_v42 = vadd.f32 %v1779_v10, %v5427_v48 }
 0x314   :  { %v5574_v12 = vadd.f32 %v1576_v37, %v5474_v16  ;;  %v1794_v37 = vadd.f32 %v1778_v15, %v5430_v31 }
 0x315   :  { %3086 = vrot.lane.b32.xlu0 %v3085_v47, %s3172_s21  ;;  %v5576_v24 = vadd.f32 %v1568_v25, %v1501_v60  ;;  %v1653_v61 = vpop.permute.xlu1 %1652 }
 0x316   :  { %2002 = vrot.lane.b32.xlu1 %v5464_v30, %s3173_s22  ;;  %v1674_v7 = vmul.f32 %v5233_v6, %v1653_v61 }
 0x317   :  { %v1637_v55 = vpop.permute.xlu0 %1636 }
 0x318   :  { %v1666_v38 = vmul.f32 %v5233_v6, %v1637_v55  ;;  %v5586_v16 = vadd.f32 %v1674_v7, %v1624_v51  ;;  %v1803_v51 = vadd.f32 %v1787_v1, %v5446_v19  ;;  %v3142_v19 = vld [vmem:[#allocation2 + $0x19f] sm:$0xff] }
 0x319   :  { %2018 = vrot.lane.b32.xlu0 %v5483_v20, %s3173_s22  ;;  %v1733_v21 = vpop.permute.xlu1 %1732 }
 0x31a   :  { %2004 = vrot.lane.b32.xlu1 %v5533_v43, %s3173_s22  ;;  %v1682_v40 = vadd.f32 %v1666_v38, %v1616_v18  ;;  %v1755_v32 = vmul.f32 %v5394_v2, %v1733_v21  ;;  %v3141_v18 = vld [vmem:[#allocation2 + $0xaf] sm:$0xff] }
 0x31b   :  { %v1717_v62 = vpop.permute.xlu0 %1716  ;;  %v1601_v38 = vmul.f32 %v3141_v18, %v5569_v63 }
 0x31c   :  { %v1747_v8 = vmul.f32 %v5394_v2, %v1717_v62  ;;  %v5606_v29 = vadd.f32 %v1755_v32, %v5519_v35  ;;  %v1786_v35 = vmul.f32 %v3140_v36, %v5591_v27 }
 0x31d   :  { %2020 = vrot.lane.b32.xlu0 %v5525_v28, %s3173_s22  ;;  %v1617_v46 = vadd.f32 %v1601_v38, %v5497_v56 }
 0x31e   :  { %3091 = vrot.lane.b32.xlu1 %v3085_v47, %s3173_s22  ;;  %v5609_v11 = vadd.f32 %v1747_v8, %v5521_v49  ;;  %v1813_v47 = vpop.permute.xlu1 %1812  ;;  %v1802_v7 = vadd.f32 %v1786_v35, %v5449_v53  ;;  %v3143_v35 = vld [vmem:[#allocation2 + $0x68] sm:$0xff] }
 0x31f   :  { %v1811_v39 = vpop.permute.xlu0 %1810  ;;  %v1845_v60 = vmul.f32 %v5601_v13, %v1813_v47  ;;  %v1609_v47 = vmul.f32 %v3142_v19, %v5569_v63 }
 0x320   :  { %v1844_v25 = vmul.f32 %v5601_v13, %v1811_v39 }
 0x321   :  { %v1861_v14 = vadd.f32 %v1845_v60, %v1795_v42 }
 0x322   :  { %v1860_v61 = vadd.f32 %v1844_v25, %v1794_v37  ;;  %v1829_v49 = vpop.permute.xlu1 %1828  ;;  %v1625_v37 = vadd.f32 %v1609_v47, %v5495_v54 }
 0x323   :  { %v1827_v55 = vpop.permute.xlu0 %1826  ;;  %v1853_v48 = vmul.f32 %v5601_v13, %v1829_v49  ;;  %v1780_v49 = vmul.f32 %v3143_v35, %v5591_v27 }
 0x324   :  { %v1852_v31 = vmul.f32 %v5601_v13, %v1827_v55 }
 0x325   :  { %v1869_v21 = vadd.f32 %v1853_v48, %v1803_v51  ;;  %v1796_v54 = vadd.f32 %v1780_v49, %v5541_v26  ;;  %v6776_v49 = vld [vmem:[#allocation5_spill] sm:$0xff] }
 0x326   :  { %v1868_v62 = vadd.f32 %v1852_v31, %v1802_v7  ;;  %v1639_v32 = vpop.permute.xlu1 %1638  ;;  %v3144_v31 = vld [vmem:[#allocation2 + $0x158] sm:$0xff] }
 0x327   :  { %v3067_v8 = vpop.permute.xlu0 %3066  ;;  %v1667_v10 = vmul.f32 %v5233_v6, %v1639_v32  ;;  %v1788_v18 = vmul.f32 %v3144_v31, %v5591_v27 }
 0x328   :  { %v3069_v23 = vunpack.i.h.bf16 %v3067_v8  ;;  %v3068_v15 = vunpack.i.l.bf16 %v3067_v8 }
 0x329   :  { %v1683_v39 = vadd.f32 %v1667_v10, %v1617_v46  ;;  %v1804_v46 = vadd.f32 %v1788_v18, %v5538_v3 }
 0x32a   :  { %v1577_v53 = vmul.f32 %v3069_v23, %v5168_v52  ;;  %v1569_v42 = vmul.f32 %v3068_v15, %v5168_v52  ;;  %v1719_v60 = vpop.permute.xlu1 %1718 }
 0x32b   :  { %v1655_v25 = vpop.permute.xlu0 %1654  ;;  %v1748_v1 = vmul.f32 %v5394_v2, %v1719_v60 }
 0x32c   :  { %v5629_v4 = vadd.f32 %v1577_v53, %v5557_v59  ;;  %v5632_v56 = vadd.f32 %v1569_v42, %v5559_v44  ;;  %v1675_v36 = vmul.f32 %v5233_v6, %v1655_v25  ;;  %v5645_v44 = vld [vmem:[%s6291_s3 + $0xc0] sm:$0xff] }
 0x32d   :  { %v5637_v55 = vadd.f32 %v1748_v1, %v1682_v40 }
 0x32e   :  { %v1691_v52 = vadd.f32 %v1675_v36, %v1625_v37  ;;  %v1815_v51 = vpop.permute.xlu1 %1814 }
 0x32f   :  { %v1735_v48 = vpop.permute.xlu0 %1734  ;;  %v1846_v59 = vmul.f32 %v5601_v13, %v1815_v51  ;;  %v1610_v51 = vmul.f32 %v5569_v63, %v6776_v49 }
 0x330   :  { %v1756_v7 = vmul.f32 %v5394_v2, %v1735_v48 }
 0x331   :  { %v5648_v38 = vadd.f32 %v1846_v59, %v1796_v54 }
 0x332   :  { %v5651_v40 = vadd.f32 %v1756_v7, %v5586_v16  ;;  %v1893_v32 = vpop.permute.xlu1 %1892  ;;  %v3145_v16 = vld [vmem:[#allocation2 + $0xc7] sm:$0xff]  ;;  %v1626_v7 = vadd.f32 %v1610_v51, %v5574_v12 }
 0x333   :  { %v1831_v8 = vpop.permute.xlu0 %1830  ;;  %v1926_v26 = vmul.f32 %v5645_v44, %v1893_v32  ;;  %v1602_v60 = vmul.f32 %v3145_v16, %v5569_v63 }
 0x334   :  { %v1854_v10 = vmul.f32 %v5601_v13, %v1831_v8 }
 0x335   :  { %v5656_v23 = vadd.f32 %v1926_v26, %v1860_v61  ;;  %v1618_v61 = vadd.f32 %v1602_v60, %v5576_v24  ;;  %v3146_v24 = vld [vmem:[#allocation2 + $0x80] sm:$0xff] }
 0x336   :  { %v5658_v15 = vadd.f32 %v1854_v10, %v1804_v46  ;;  %v1909_v19 = vpop.permute.xlu1 %1908  ;;  %v1781_v18 = vmul.f32 %v3146_v24, %v5591_v27  ;;  %v3148_v24 = vld [vmem:[#allocation2 + $0x39] sm:$0xff] }
 0x337   :  { %v1895_v47 = vpop.permute.xlu0 %1894  ;;  %v1934_v53 = vmul.f32 %v5645_v44, %v1909_v19 }
 0x338   :  { %v1927_v42 = vmul.f32 %v5645_v44, %v1895_v47 }
 0x339   :  { %v5663_v37 = vadd.f32 %v1934_v53, %v1868_v62 }
 0x33a   :  { %v5665_v25 = vadd.f32 %v1927_v42, %v1861_v14  ;;  %v1641_v3 = vpop.permute.xlu1 %1640 }
 0x33b   :  { %v1911_v1 = vpop.permute.xlu0 %1910  ;;  %v1668_v36 = vmul.f32 %v5233_v6, %v1641_v3 }
 0x33c   :  { %v1935_v35 = vmul.f32 %v5645_v44, %v1911_v1 }
 0x33d   :  { %v5672_v48 = vadd.f32 %v1668_v36, %v1618_v61 }
 0x33e   :  { %v5674_v54 = vadd.f32 %v1935_v35, %v1869_v21  ;;  %v1797_v21 = vadd.f32 %v1781_v18, %v5609_v11 }
 0x33f   :  { %v1657_v62 = vpop.permute.xlu0 %1656 }
 0x340   :  { %v1721_v59 = vpop.permute.xlu1 %1720  ;;  %v1676_v31 = vmul.f32 %v5233_v6, %v1657_v62 }
 0x341   :  { %v1749_v14 = vmul.f32 %v5394_v2, %v1721_v59 }
 0x342   :  { %v5682_v8 = vadd.f32 %v1676_v31, %v1626_v7  ;;  %v3147_v7 = vld [vmem:[#allocation2 + $0x98] sm:$0xff] }
 0x343   :  { %v5680_v32 = vadd.f32 %v1749_v14, %v1683_v39  ;;  %v1737_v46 = vpop.permute.xlu0 %1736  ;;  %v5714_v14 = vld [vmem:[%s6291_s3 + $0xc8] sm:$0xff]  ;;  %v1782_v31 = vmul.f32 %v3147_v7, %v5591_v27  ;;  %v5733_v7 = vmul.f32 %v5226_v58, %v5591_v27  ;;  %v3150_v58 = vld [vmem:[#allocation2 + $0xdf] sm:$0xff] }
 0x344   :  { %v1817_v26 = vpop.permute.xlu1 %1816  ;;  %v1757_v19 = vmul.f32 %v5394_v2, %v1737_v46  ;;  %v1960_v18 = vmul.f32 %v3148_v24, %v5714_v14  ;;  %v5737_v24 = vmul.f32 %v5714_v14, %v5275_v50  ;;  %v3151_v50 = vld [vmem:[#allocation2 + $0x170] sm:$0xff] }
 0x345   :  { %v1847_v10 = vmul.f32 %v5601_v13, %v1817_v26  ;;  %v3149_v26 = vld [vmem:[#allocation2 + $0x129] sm:$0xff]  ;;  %6782 = vst [vmem:[#allocation134_spill] sm:$0xff] %v5733_v7 }
 0x346   :  { %v5689_v12 = vadd.f32 %v1757_v19, %v1691_v52  ;;  %v1968_v46 = vmul.f32 %v3149_v26, %v5714_v14  ;;  %v1783_v19 = vmul.f32 %v5359_v0, %v5591_v27  ;;  %6783 = vst [vmem:[#allocation19_spill] sm:$0xff] %v5737_v24  ;;  %v5741_v26 = vmul.f32 %v5385_v41, %v5714_v14  ;;  %v6785_v0 = vld [vmem:[#allocation34_spill] sm:$0xff]  ;;  %v3152_v7 = vld [vmem:[#allocation2 + $0x188] sm:$0xff] }
 0x347   :  { %v5687_v47 = vadd.f32 %v1847_v10, %v1797_v21  ;;  %v5691_v42 = vpop.permute.xlu0 %1832  ;;  %v6779_v21 = vld [vmem:[#allocation79_spill] sm:$0xff]  ;;  %v1789_v24 = vmul.f32 %v3151_v50, %v5591_v27  ;;  %v1790_v41 = vmul.f32 %v3152_v7, %v5591_v27  ;;  %v5773_v7 = vmul.f32 %v5714_v14, %v5413_v33  ;;  %v6792_v33 = vld [vmem:[#allocation18_spill] sm:$0xff] }
 0x348   :  { %v1897_v53 = vpop.permute.xlu1 %1896  ;;  %v1961_v10 = vmul.f32 %v6779_v21, %v5714_v14  ;;  %6784 = vst [vmem:[#allocation127_spill] sm:$0xff] %v5741_v26  ;;  %v1969_v21 = vmul.f32 %v5714_v14, %v6785_v0  ;;  %v5758_v0 = vmul.f32 %v5714_v14, %v5197_v22  ;;  %v3153_v26 = vld [vmem:[#allocation2 + $0x1cf] sm:$0xff]  ;;  %v5798_v50 = vmul.f32 %v5714_v14, %v5545_v45 }
 0x349   :  { %6777 = vst [vmem:[#allocation31_spill] sm:$0xff] %v5687_v47  ;;  %v5729_v47 = vmul.f32 %v5174_v34, %v5714_v14  ;;  %v5751_v34 = vmul.f32 %v5533_v43, %v5714_v14  ;;  %v1791_v43 = vmul.f32 %v5591_v27, %v5131_v57  ;;  %6789 = vst [vmem:[#allocation97_spill] sm:$0xff] %v5773_v7  ;;  %v5778_v22 = vld [vmem:[%s6291_s3 + $0xd0] sm:$0xff] }
 0x34a   :  { %v1805_v7 = vadd.f32 %v1789_v24, %v5606_v29 }
 0x34b   :  { %v1913_v39 = vpop.permute.xlu0 %1912  ;;  %6787 = vst [vmem:[#allocation41_spill] sm:$0xff] %v5751_v34  ;;  %v5765_v34 = vmul.f32 %v5591_v27, %v5220_v17  ;;  %v5786_v17 = vmul.f32 %v5714_v14, %v5483_v20 }
 0x34c   :  { %v5693_v16 = vpop.permute.xlu1 %3071 }
 0x34d   :  { %6790 = vst [vmem:[#allocation65_spill] sm:$0xff] %v5786_v17  ;;  %v3074_v45 = vunpack.i.h.bf16 %v5693_v16 }
 0x34f   :  { %v5697_v3 = vpop.permute.xlu0 %1722 }
 0x350   :  { %v5695_v60 = vpop.permute.xlu1 %1738 }
 0x353   :  { %v5701_v11 = vpop.permute.xlu0 %1818 }
 0x354   :  { %v5699_v1 = vpop.permute.xlu1 %1834 }
 0x357   :  { %v5705_v36 = vpop.permute.xlu0 %1898 }
 0x358   :  { %v5703_v61 = vpop.permute.xlu1 %1914 }
 0x35b   :  { %v1993_v35 = vpop.permute.xlu0 %1992 }
 0x35c   :  { %v1995_v52 = vpop.permute.xlu1 %1994  ;;  %v2026_v29 = vmul.f32 %v5778_v22, %v1993_v35 }
 0x35f   :  { %v2009_v51 = vpop.permute.xlu0 %2008 }
 0x360   :  { %v2011_v49 = vpop.permute.xlu1 %2010 }
 0x363   :  { %v5709_v62 = vpop.permute.xlu0 %3076 }
 0x364   :  { %v5707_v59 = vpop.permute.xlu1 %1820 }
 0x365   :  { %6778 = vst [vmem:[#allocation23_spill] sm:$0xff] %v5707_v59 }
 0x367   :  { %v5725_v59 = vpop.permute.xlu0 %1836 }
 0x368   :  { %v5723_v5 = vpop.permute.xlu1 %1900  ;;  %6781 = vst [vmem:[#allocation133_spill] sm:$0xff] %v5725_v59  ;;  %v5747_v59 = vmul.f32 %v5714_v14, %v5464_v30  ;;  %v1611_v30 = vmul.f32 %v3153_v26, %v5569_v63  ;;  %v5794_v26 = vmul.f32 %v6792_v33, %v5591_v27  ;;  %v2027_v27 = vmul.f32 %v5778_v22, %v1995_v52 }
 0x369   :  { %6780 = vst [vmem:[#allocation36_spill] sm:$0xff] %v5723_v5  ;;  %v1603_v5 = vmul.f32 %v3150_v58, %v5569_v63  ;;  %v5769_v58 = vmul.f32 %v5714_v14, %v5273_v9  ;;  %v5790_v9 = vmul.f32 %v5525_v28, %v5714_v14  ;;  %v1806_v28 = vadd.f32 %v1790_v41, %v5651_v40 }
 0x36a   :  { %6786 = vst [vmem:[#allocation126_spill] sm:$0xff] %v5747_v59  ;;  %v1928_v59 = vmul.f32 %v5645_v44, %v1897_v53  ;;  %v1627_v17 = vadd.f32 %v1611_v30, %v5629_v4  ;;  %v1936_v33 = vmul.f32 %v5645_v44, %v1913_v39  ;;  %v1977_v53 = vadd.f32 %v1961_v10, %v5665_v25 }
 0x36b   :  { %6788 = vst [vmem:[#allocation55_spill] sm:$0xff] %v5769_v58  ;;  %v5782_v57 = vpop.permute.xlu0 %1916  ;;  %6791 = vst [vmem:[#allocation32_spill] sm:$0xff] %v5790_v9  ;;  %v3073_v58 = vunpack.i.l.bf16 %v5693_v16  ;;  %v1619_v20 = vadd.f32 %v1603_v5, %v5632_v56  ;;  %v5807_v9 = vadd.f32 %v1782_v31, %v5637_v55  ;;  %v1855_v4 = vmul.f32 %v5601_v13, %v5691_v42 }
 0x36c   :  { %v5780_v63 = vpop.permute.xlu1 %1996  ;;  %v1750_v56 = vmul.f32 %v5394_v2, %v5697_v3  ;;  %v2035_v55 = vmul.f32 %v5778_v22, %v2011_v49  ;;  %v2034_v40 = vmul.f32 %v5778_v22, %v2009_v51  ;;  %v1944_v16 = vadd.f32 %v1928_v59, %v5648_v38  ;;  %v5837_v38 = vld [vmem:[%s6293_s4] ss:$0 sm:$0xff] }
 0x36d   :  { %v1669_v39 = vmul.f32 %v3073_v58, %v5233_v6  ;;  %v1758_v25 = vmul.f32 %v5394_v2, %v5695_v60  ;;  %v1976_v52 = vadd.f32 %v1960_v18, %v5656_v23  ;;  %v2043_v35 = vadd.f32 %v2027_v27, %v1977_v53  ;;  %v6794_v53 = vld [vmem:[#allocation31_spill] sm:$0xff] }
 0x36e   :  { %v1985_v31 = vadd.f32 %v1969_v21, %v5674_v54  ;;  %v1984_v42 = vadd.f32 %v1968_v46, %v5663_v37  ;;  %v5830_v3 = vadd.f32 %v1783_v19, %v5680_v32  ;;  %v1677_v49 = vmul.f32 %v3074_v45, %v5233_v6 }
 0x36f   :  { %v2013_v5 = vpop.permute.xlu0 %2012  ;;  %v1952_v51 = vadd.f32 %v1936_v33, %v5658_v15  ;;  %v2042_v60 = vadd.f32 %v2026_v29, %v1976_v52  ;;  %v1807_v23 = vadd.f32 %v1791_v43, %v5689_v12  ;;  %v1871_v54 = vadd.f32 %v1855_v4, %v1805_v7  ;;  %v6797_v52 = vld [vmem:[#allocation133_spill] sm:$0xff] }
 0x370   :  { %v5814_v24 = vpop.permute.xlu1 %1822  ;;  %v1766_v37 = vadd.f32 %v1750_v56, %v5672_v48  ;;  %v2051_v32 = vadd.f32 %v2035_v55, %v1985_v31  ;;  %v2050_v46 = vadd.f32 %v2034_v40, %v1984_v42  ;;  %v1685_v10 = vadd.f32 %v1669_v39, %v1619_v20  ;;  %v6793_v20 = vld [vmem:[#allocation134_spill] sm:$0xff]  ;;  %v6795_v55 = vld [vmem:[#allocation23_spill] sm:$0xff]  ;;  %v6796_v39 = vld [vmem:[#allocation36_spill] sm:$0xff] }
 0x371   :  { %v1774_v6 = vadd.f32 %v1758_v25, %v5682_v8  ;;  %v3078_v15 = vunpack.i.l.bf16 %v5709_v62  ;;  %v1978_v19 = vadd.f32 %v5729_v47, %v1944_v16  ;;  %v1856_v21 = vmul.f32 %v5601_v13, %v5699_v1 }
 0x372   :  { %v1937_v12 = vmul.f32 %v5645_v44, %v5703_v61  ;;  %v1929_v41 = vmul.f32 %v5645_v44, %v5705_v36  ;;  %v5853_v48 = vadd.f32 %v5837_v38, %v2043_v35  ;;  %v1693_v30 = vadd.f32 %v1677_v49, %v1627_v17 }
 0x373   :  { %v5840_v18 = vpop.permute.xlu0 %1838  ;;  %v5856_v43 = vadd.f32 %v5837_v38, %v2042_v60  ;;  %v3079_v8 = vunpack.i.h.bf16 %v5709_v62  ;;  %v1986_v47 = vadd.f32 %v5758_v0, %v1952_v51  ;;  %v1848_v1 = vmul.f32 %v5601_v13, %v5701_v11 }
 0x374   :  { %v1903_v59 = vpop.permute.xlu1 %1902  ;;  %v5863_v61 = vadd.f32 %v5837_v38, %v2051_v32  ;;  %v5866_v36 = vadd.f32 %v5837_v38, %v2050_v46  ;;  %v1800_v17 = vadd.f32 %v6793_v20, %v1766_v37  ;;  %v1751_v27 = vmul.f32 %v3078_v15, %v5394_v2 }
 0x375   :  { %v2028_v62 = vmul.f32 %v5778_v22, %v5780_v63  ;;  %v2036_v0 = vmul.f32 %v5778_v22, %v2013_v5  ;;  %v5874_v45 = vadd.f32 %v5765_v34, %v1774_v6  ;;  %v1872_v33 = vadd.f32 %v1856_v21, %v1806_v28  ;;  %v6799_v21 = vld [vmem:[#allocation55_spill] sm:$0xff] }
 0x376   :  { %v1953_v11 = vadd.f32 %v1937_v12, %v1871_v54  ;;  %v1945_v29 = vadd.f32 %v1929_v41, %v6794_v53  ;;  %v2082_v4 = vmax.f32 %v5853_v48, 0.0  ;;  %v2081_v56 = vmax.f32 %v5856_v43, 0.0  ;;  %v6798_v54 = vld [vmem:[#allocation19_spill] sm:$0xff] }
 0x377   :  { %v1919_v7 = vpop.permute.xlu0 %1918  ;;  %v1849_v40 = vmul.f32 %v5601_v13, %v6795_v55  ;;  %v1759_v16 = vmul.f32 %v3079_v8, %v5394_v2  ;;  %v1930_v63 = vmul.f32 %v5645_v44, %v6796_v39  ;;  %v2090_v34 = vmax.f32 %v5863_v61, 0.0  ;;  %v6800_v53 = vld [vmem:[#allocation127_spill] sm:$0xff] }
 0x378   :  { %v1999_v58 = vpop.permute.xlu1 %1998  ;;  %v2089_v28 = vmax.f32 %v5866_v36, 0.0  ;;  %v1857_v35 = vmul.f32 %v5601_v13, %v6797_v52  ;;  %v1938_v31 = vmul.f32 %v5645_v44, %v5782_v57  ;;  %v1864_v42 = vadd.f32 %v1848_v1, %v5807_v9 }
 0x379   :  { %v1767_v49 = vadd.f32 %v1751_v27, %v1685_v10  ;;  %v2044_v51 = vadd.f32 %v2028_v62, %v1978_v19  ;;  %v2052_v2 = vadd.f32 %v2036_v0, %v1986_v47  ;;  %v1931_v60 = vmul.f32 %v5645_v44, %v1903_v59 }
 0x37a   :  { %v1979_v37 = vadd.f32 %v6798_v54, %v1945_v29  ;;  %v2029_v32 = vmul.f32 %v5778_v22, %v1999_v58  ;;  %v2097_v6 = vadd.f32 %v2082_v4, %v2081_v56  ;;  %v1775_v15 = vadd.f32 %v1759_v16, %v1693_v30 }
 0x37b   :  { %v2015_v25 = vpop.permute.xlu0 %2014  ;;  %v1946_v57 = vadd.f32 %v1930_v63, %v1864_v42  ;;  %v1987_v9 = vadd.f32 %v6799_v21, %v1953_v11  ;;  %v2104_v59 = vadd.f32 %v2090_v34, %v2089_v28  ;;  %v1865_v12 = vadd.f32 %v1849_v40, %v5830_v3  ;;  %v6801_v40 = vld [vmem:[#allocation97_spill] sm:$0xff]  ;;  %v6802_v42 = vld [vmem:[#allocation126_spill] sm:$0xff] }
 0x37c   :  { %v3082_v5 = vpop.permute.xlu1 %3081  ;;  %v2037_v46 = vmul.f32 %v5778_v22, %v2015_v25  ;;  %v1873_v41 = vadd.f32 %v1857_v35, %v1807_v23  ;;  %v1954_v8 = vadd.f32 %v1938_v31, %v1872_v33  ;;  %v5906_v47 = vadd.f32 %v5837_v38, %v2044_v51 }
 0x37d   :  { %v1850_v30 = vmul.f32 %v5601_v13, %v5814_v24  ;;  %v5911_v58 = vadd.f32 %v5837_v38, %v2052_v2  ;;  %v1801_v1 = vadd.f32 %v5794_v26, %v1767_v49  ;;  %v1947_v20 = vadd.f32 %v1931_v60, %v1865_v12 }
 0x37e   :  { %v2045_v27 = vadd.f32 %v2029_v32, %v1979_v37  ;;  %v1939_v62 = vmul.f32 %v5645_v44, %v1919_v7  ;;  %v2053_v0 = vadd.f32 %v2037_v46, %v1987_v9  ;;  %v3084_v11 = vunpack.i.h.bf16 %v3082_v5 }
 0x37f   :  { %v1905_v19 = vpop.permute.xlu0 %1904  ;;  %v3083_v3 = vunpack.i.l.bf16 %v3082_v5  ;;  %v1809_v23 = vadd.f32 %v5794_v26, %v1775_v15  ;;  %v1980_v29 = vadd.f32 %v6800_v53, %v1946_v57  ;;  %v1988_v16 = vadd.f32 %v6801_v40, %v1954_v8  ;;  %v6805_v40 = vld [vmem:[#allocation124_spill] sm:$0xff] }
 0x380   :  { %v1921_v10 = vpop.permute.xlu1 %1920  ;;  %v1932_v24 = vmul.f32 %v5645_v44, %v1905_v19  ;;  %v2083_v25 = vmax.f32 %v5906_v47, 0.0  ;;  %v1866_v7 = vadd.f32 %v1850_v30, %v1800_v17  ;;  %v2091_v52 = vmax.f32 %v5911_v58, 0.0 }
 0x381   :  { %v1858_v26 = vmul.f32 %v5601_v13, %v5840_v18  ;;  %v5926_v5 = vadd.f32 %v5837_v38, %v2045_v27  ;;  %v1955_v35 = vadd.f32 %v1939_v62, %v1873_v41  ;;  %v5929_v31 = vadd.f32 %v5837_v38, %v2053_v0  ;;  %v6803_v0 = vld [vmem:[#allocation41_spill] sm:$0xff] }
 0x382   :  { %v1981_v49 = vadd.f32 %v6802_v42, %v1947_v20  ;;  %v1859_v51 = vmul.f32 %v3084_v11, %v5601_v13  ;;  %v1851_v2 = vmul.f32 %v3083_v3, %v5601_v13  ;;  %v1940_v32 = vmul.f32 %v5645_v44, %v1921_v10  ;;  %v6804_v3 = vld [vmem:[#allocation65_spill] sm:$0xff] }
 0x383   :  { %v2001_v55 = vpop.permute.xlu0 %2000  ;;  %v1948_v18 = vadd.f32 %v1932_v24, %v1866_v7  ;;  %v2098_v57 = vadd.f32 %v2097_v6, %v2083_v25  ;;  %v2105_v21 = vadd.f32 %v2104_v59, %v2091_v52  ;;  %v1874_v9 = vadd.f32 %v1858_v26, %v5874_v45 }
 0x384   :  { %v2017_v33 = vpop.permute.xlu1 %2016  ;;  %v2030_v63 = vmul.f32 %v5778_v22, %v2001_v55  ;;  %v2084_v13 = vmax.f32 %v5926_v5, 0.0  ;;  %v2092_v12 = vmax.f32 %v5929_v31, 0.0  ;;  %v1875_v8 = vadd.f32 %v1859_v51, %v1809_v23 }
 0x385   :  { %v2038_v39 = vmul.f32 %v5778_v22, %v2017_v33  ;;  %v1867_v45 = vadd.f32 %v1851_v2, %v1801_v1  ;;  %v1956_v62 = vadd.f32 %v1940_v32, %v1874_v9  ;;  %v1982_v11 = vadd.f32 %v6803_v0, %v1948_v18  ;;  %v6806_v2 = vld [vmem:[#allocation32_spill] sm:$0xff] }
 0x386   :  { %v2046_v17 = vadd.f32 %v2030_v63, %v1980_v29  ;;  %v1989_v33 = vadd.f32 %v6804_v3, %v1955_v35  ;;  %v2099_v24 = vadd.f32 %v2098_v57, %v2084_v13 }
 0x387   :  { %v2054_v60 = vadd.f32 %v2038_v39, %v1988_v16  ;;  %v3087_v37 = vpop.permute.xlu0 %3086  ;;  %v1967_v16 = vmul.f32 %v5714_v14, %v6805_v40 }
 0x388   :  { %v2003_v54 = vpop.permute.xlu1 %2002  ;;  %v3089_v15 = vunpack.i.h.bf16 %v3087_v37  ;;  %v3088_v19 = vunpack.i.l.bf16 %v3087_v37  ;;  %v5948_v20 = vadd.f32 %v5837_v38, %v2046_v17 }
 0x389   :  { %v2031_v46 = vmul.f32 %v5778_v22, %v2003_v54  ;;  %v5945_v30 = vadd.f32 %v5837_v38, %v2054_v60  ;;  %v1990_v60 = vadd.f32 %v6806_v2, %v1956_v62 }
 0x38a   :  { %v1941_v10 = vmul.f32 %v3089_v15, %v5645_v44  ;;  %v1933_v6 = vmul.f32 %v3088_v19, %v5645_v44  ;;  %v2106_v44 = vadd.f32 %v2105_v21, %v2092_v12  ;;  %v2085_v63 = vmax.f32 %v5948_v20, 0.0 }
 0x38b   :  { %v2047_v41 = vadd.f32 %v2031_v46, %v1981_v49  ;;  %v2019_v27 = vpop.permute.xlu0 %2018  ;;  %v2093_v39 = vmax.f32 %v5945_v30, 0.0 }
 0x38c   :  { %v2005_v59 = vpop.permute.xlu1 %2004  ;;  %v1957_v23 = vadd.f32 %v1941_v10, %v1875_v8  ;;  %v2039_v55 = vmul.f32 %v5778_v22, %v2019_v27  ;;  %v1949_v1 = vadd.f32 %v1933_v6, %v1867_v45  ;;  %v2100_v9 = vadd.f32 %v2099_v24, %v2085_v63 }
 0x38d   :  { %v5954_v53 = vadd.f32 %v5837_v38, %v2047_v41  ;;  %v2032_v29 = vmul.f32 %v5778_v22, %v2005_v59  ;;  %v2107_v21 = vadd.f32 %v2106_v44, %v2093_v39 }
 0x38e   :  { %v2055_v26 = vadd.f32 %v2039_v55, %v1989_v33  ;;  %v1991_v32 = vadd.f32 %v5798_v50, %v1957_v23  ;;  %v1983_v46 = vadd.f32 %v1967_v16, %v1949_v1 }
 0x38f   :  { %v2048_v7 = vadd.f32 %v2032_v29, %v1982_v11  ;;  %v2021_v42 = vpop.permute.xlu0 %2020  ;;  %v2086_v54 = vmax.f32 %v5954_v53, 0.0 }
 0x390   :  { %v3092_v35 = vpop.permute.xlu1 %3091  ;;  %v2040_v17 = vmul.f32 %v5778_v22, %v2021_v42  ;;  %v5973_v14 = vadd.f32 %v5837_v38, %v2055_v26 }
 0x391   :  { %v3094_v49 = vunpack.i.h.bf16 %v3092_v35  ;;  %v3093_v51 = vunpack.i.l.bf16 %v3092_v35  ;;  %v5970_v37 = vadd.f32 %v5837_v38, %v2048_v7  ;;  %v2101_v6 = vadd.f32 %v2100_v9, %v2086_v54 }
 0x392   :  { %v2056_v57 = vadd.f32 %v2040_v17, %v1990_v60  ;;  %v2094_v19 = vmax.f32 %v5973_v14, 0.0  ;;  %v3174_v17 = vmov 0.0|0.0  }
 0x393   :  { %v2041_v18 = vmul.f32 %v3094_v49, %v5778_v22  ;;  %v2033_v15 = vmul.f32 %v3093_v51, %v5778_v22  ;;  %v2087_v41 = vmax.f32 %v5970_v37, 0.0  ;;  %2971 = vmatprep.subr.bf16.mxu1 %v3174_v17 }
 0x394   :  { %v5985_v50 = vadd.f32 %v5837_v38, %v2056_v57  ;;  %v2108_v22 = vadd.f32 %v2107_v21, %v2094_v19  ;;  %v2165_v57 = vld [vmem:[%s6294_s5 + $0x18] sm:$0xff] }
 0x395   :  { %v2049_v10 = vadd.f32 %v2033_v15, %v1983_v46  ;;  %v2057_v8 = vadd.f32 %v2041_v18, %v1991_v32  ;;  %v2102_v62 = vadd.f32 %v2101_v6, %v2087_v41  ;;  %v2162_v32 = vld [vmem:[%s6294_s5] sm:$0xff]  ;;  %v2163_v18 = vld [vmem:[%s6294_s5 + $0x8] sm:$0xff]  ;;  %v2164_v46 = vld [vmem:[%s6294_s5 + $0x10] sm:$0xff] }
 0x396   :  { %v2095_v45 = vmax.f32 %v5985_v50, 0.0  ;;  %v2972_v15 = vpack.c.bf16 %v2163_v18, %v2162_v32  ;;  %v2166_v6 = vld [vmem:[%s6294_s5 + $0x20] sm:$0xff] }
 0x397   :  { %v5992_v59 = vadd.f32 %v5837_v38, %v2049_v10  ;;  %v5995_v27 = vadd.f32 %v5837_v38, %v2057_v8  ;;  %v2975_v10 = vpack.c.bf16 %v2165_v57, %v2164_v46 }
 0x398   :  { %v2109_v3 = vadd.f32 %v2108_v22, %v2095_v45  ;;  %2973 = vmatpush3.bf16.msra.mxu1 %v2972_v15  ;;  %v2167_v22 = vld [vmem:[%s6294_s5 + $0x28] sm:$0xff] }
 0x399   :  { %v2088_v0 = vmax.f32 %v5992_v59, 0.0  ;;  %v2096_v11 = vmax.f32 %v5995_v27, 0.0  ;;  %2974 = vmatprep.subr.bf16.mxu1 %v3174_v17 }
 0x39b   :  { %v2103_v33 = vadd.f32 %v2102_v62, %v2088_v0  ;;  %v2110_v23 = vadd.f32 %v2109_v3, %v2096_v11  ;;  %v2978_v62 = vpack.c.bf16 %v2167_v22, %v2166_v6  ;;  %v2168_v3 = vld [vmem:[%s6294_s5 + $0x30] sm:$0xff]  ;;  %v2477_v22 = vld [vmem:[%s6296_s9 + $0x8] sm:$0xff] }
 0x39c   :  { %2976 = vmatpush3.bf16.msra.mxu1 %v2975_v10 }
 0x39d   :  { %v2111_v38 = vrot.slane %v2103_v33, 4  ;;  %v2117_v29 = vrot.slane %v2110_v23, 4  ;;  %2977 = vmatprep.subr.bf16.mxu1 %v3174_v17 }
 0x39f   :  { %v2118_v55 = vadd.f32 %v2117_v29, %v2110_v23  ;;  %v2112_v24 = vadd.f32 %v2111_v38, %v2103_v33  ;;  %v2169_v33 = vld [vmem:[%s6294_s5 + $0x38] sm:$0xff]  ;;  %v2170_v38 = vld [vmem:[%s6294_s5 + $0x40] sm:$0xff]  ;;  %v2171_v29 = vld [vmem:[%s6294_s5 + $0x48] sm:$0xff] }
 0x3a0   :  { %2979 = vmatpush3.bf16.msra.mxu1 %v2978_v62  ;;  %v2981_v23 = vpack.c.bf16 %v2169_v33, %v2168_v3  ;;  %v2740_v3 = vld [vmem:[%s6297_s6] ss:$0 sm:$0xff] }
 0x3a1   :  { %v2113_v44 = vrot.slane %v2112_v24, 2  ;;  %v2119_v1 = vrot.slane %v2118_v55, 2  ;;  %2980 = vmatprep.subr.bf16.mxu1 %v3174_v17 }
 0x3a3   :  { %v2114_v40 = vadd.f32 %v2113_v44, %v2112_v24  ;;  %v2120_v16 = vadd.f32 %v2119_v1, %v2118_v55  ;;  %v2984_v55 = vpack.c.bf16 %v2171_v29, %v2170_v38  ;;  %v2172_v24 = vld [vmem:[%s6294_s5 + $0x50] sm:$0xff]  ;;  %v2173_v44 = vld [vmem:[%s6294_s5 + $0x58] sm:$0xff] }
 0x3a4   :  { %2982 = vmatpush3.bf16.msra.mxu1 %v2981_v23  ;;  %v2987_v1 = vpack.c.bf16 %v2173_v44, %v2172_v24  ;;  %v2479_v24 = vld [vmem:[%s6296_s9 + $0x18] sm:$0xff]  ;;  %v2480_v44 = vld [vmem:[%s6296_s9 + $0x20] sm:$0xff] }
 0x3a5   :  { %v2115_v7 = vrot.slane %v2114_v40, 1  ;;  %v2121_v26 = vrot.slane %v2120_v16, 1  ;;  %2983 = vmatprep.subr.bf16.mxu1 %v3174_v17 }
 0x3a7   :  { %v2116_v35 = vadd.f32 %v2115_v7, %v2114_v40  ;;  %v2122_v42 = vadd.f32 %v2121_v26, %v2120_v16  ;;  %v2174_v40 = vld [vmem:[%s6294_s5 + $0x60] sm:$0xff]  ;;  %v2175_v16 = vld [vmem:[%s6294_s5 + $0x68] sm:$0xff] }
 0x3a8   :  { %2985 = vmatpush3.bf16.msra.mxu1 %v2984_v55  ;;  %v2990_v7 = vpack.c.bf16 %v2175_v16, %v2174_v40  ;;  %v2478_v55 = vld [vmem:[%s6296_s9 + $0x10] sm:$0xff]  ;;  %v2481_v40 = vld [vmem:[%s6296_s9 + $0x28] sm:$0xff] }
 0x3a9   :  { %v2126_v49 = vsel %vm2125_vm1, %v2122_v42, %v2116_v35  ;;  %2986 = vmatprep.subr.bf16.mxu1 %v3174_v17  ;;  %v3003_v16 = vpack.c.bf16 %v2481_v40, %v2480_v44 }
 0x3aa   :  { %2128 = vrot.lane.b32.xlu0 %v2126_v49, %s3172_s21  ;;  %v2177_v49 = vld [vmem:[%s6294_s5 + $0x78] sm:$0xff] }
 0x3ac   :  { %2988 = vmatpush3.bf16.msra.mxu1 %v2987_v1  ;;  %v2999_v1 = vpack.c.bf16 %v2479_v24, %v2478_v55 }
 0x3ad   :  { %2989 = vmatprep.subr.bf16.mxu1 %v3174_v17 }
 0x3b0   :  { %2991 = vmatpush3.bf16.msra.mxu1 %v2990_v7  ;;  %v2482_v7 = vld [vmem:[%s6296_s9 + $0x30] sm:$0xff] }
 0x3b1   :  { %2992 = vmatprep.subr.bf16.mxu1 %v3174_v17 }
 0x41c   :  { %v2129_v51 = vpop.permute.xlu0 %2128 }
 0x41d   :  { %v2131_v2 = vrot.slane %v2129_v51, 1  ;;  %v2134_v21 = vadd.f32 %v2129_v51, %v2116_v35 }
 0x41f   :  { %v2135_v60 = vadd.f32 %v2131_v2, %v2122_v42  ;;  %v2176_v42 = vld [vmem:[%s6294_s5 + $0x70] sm:$0xff]  ;;  %v3154_v2 = vld [vmem:[#allocation2] sm:$0xff] }
 0x420   :  { %v2993_v51 = vpack.c.bf16 %v2177_v49, %v2176_v42  ;;  %2891 = vmatprep.mubr.msk.f32.mxu1 %vm3176_vm2, %v3154_v2  ;;  %v2484_v42 = vld [vmem:[%s6296_s9 + $0x40] sm:$0xff]  ;;  %v2485_v49 = vld [vmem:[%s6296_s9 + $0x48] sm:$0xff] }
 0x421   :  { %v2138_v9 = vrot.slane %v2135_v60, 7 }
 0x422   :  { %2994 = vmatpush3.bf16.msra.mxu1 %v2993_v51  ;;  %v3011_v51 = vpack.c.bf16 %v2485_v49, %v2484_v42 }
 0x423   :  { %v2139_v8 = vsel %vm2125_vm1, %v2138_v9, %v2134_v21  ;;  %2894 = vmatprep.subr.mxu1 %v3154_v2 }
 0x424   :  { %2141 = vrot.lane.b32.xlu1 %v2139_v8, %s3175_s13 }
 0x496   :  { %v2142_v26 = vpop.permute.xlu1 %2141 }
 0x497   :  { %v2144_v35 = vrot.slane %v2142_v26, 1  ;;  %v2147_v18 = vadd.f32 %v2142_v26, %v2134_v21  ;;  %v2476_v21 = vld [vmem:[%s6296_s9] sm:$0xff]  ;;  %v2483_v26 = vld [vmem:[%s6296_s9 + $0x38] sm:$0xff] }
 0x498   :  { %v2995_v62 = vpack.c.bf16 %v2477_v22, %v2476_v21  ;;  %v2351_v21 = vlaneseq }
 0x499   :  { %v2148_v32 = vadd.f32 %v2144_v35, %v2135_v60  ;;  %v2261_v60 = vld [vmem:[%s6295_s7] sm:$0xff]  ;;  %v3007_v35 = vpack.c.bf16 %v2483_v26, %v2482_v7 }
 0x49a   :  { %2996 = vmatprep.subr.bf16.mxu0 %v2995_v62 }
 0x49b   :  { %v2151_v46 = vrot.slane %v2148_v32, 7  ;;  %2998 = vmatpush3.bf16.msra.mxu0 %v2995_v62 }
 0x49c   :  { %3000 = vmatprep.subr.bf16.mxu0 %v2999_v1 }
 0x49d   :  { %v2152_v17 = vsel %vm2125_vm1, %v2151_v46, %v2147_v18  ;;  %v2488_v46 = vld [vmem:[%s6296_s9 + $0x60] sm:$0xff] }
 0x49e   :  { %2154 = vrot.lane.b32.xlu0 %v2152_v17, %s3177_s30  ;;  %v2489_v17 = vld [vmem:[%s6296_s9 + $0x68] sm:$0xff] }
 0x49f   :  { %3002 = vmatpush3.bf16.msra.mxu0 %v2999_v1 }
 0x4a0   :  { %3004 = vmatprep.subr.bf16.mxu0 %v3003_v16 }
 0x4a3   :  { %3006 = vmatpush3.bf16.msra.mxu0 %v3003_v16 }
 0x4a4   :  { %3008 = vmatprep.subr.bf16.mxu0 %v3007_v35 }
 0x4a7   :  { %3010 = vmatpush3.bf16.msra.mxu0 %v3007_v35 }
 0x4a8   :  { %3012 = vmatprep.subr.bf16.mxu0 %v3011_v51 }
 0x4ab   :  { %3014 = vmatpush3.bf16.msra.mxu0 %v3011_v51 }
 0x510   :  { %v2155_v15 = vpop.permute.xlu0 %2154 }
 0x511   :  { %v2157_v57 = vrot.slane %v2155_v15, 1  ;;  %v2160_v10 = vadd.f32 %v2155_v15, %v2147_v18  ;;  %v3019_v15 = vpack.c.bf16 %v2489_v17, %v2488_v46 }
 0x513   :  { %v2161_v9 = vadd.f32 %v2157_v57, %v2148_v32  ;;  %v2487_v32 = vld [vmem:[%s6296_s9 + $0x58] sm:$0xff]  ;;  %v2490_v57 = vld [vmem:[%s6296_s9 + $0x70] sm:$0xff] }
 0x515   :  { %v2187_v8 = vrot.slane %v2161_v9, 7  ;;  %v2491_v9 = vld [vmem:[%s6296_s9 + $0x78] sm:$0xff] }
 0x517   :  { %v2188_v6 = vsel %vm2125_vm1, %v2187_v8, %v2160_v10  ;;  %v3023_v10 = vpack.c.bf16 %v2491_v9, %v2490_v57  ;;  %v2741_v8 = vld [vmem:[%s6298_s8] ss:$0 sm:$0xff] }
 0x518   :  { %2892 = vmatmul.mubr.f32.vlgmr.msra.gmra.mrb[16].mxu1 %v2188_v6  ;;  %v3178_v6 = vmov 1966171168  }
 0x519   :  { %2896 = vmatprep.mubr.msk.f32.mxu1 %vm3176_vm2, %v3154_v2  ;;  %2895 = vmatpush3.msra.mxu1 %v2261_v60  ;;  %v2486_v2 = vld [vmem:[%s6296_s9 + $0x50] sm:$0xff]  ;;  %v2349_v60 = vunpack.c.l.s4 %v3178_v6 }
 0x51a   :  { %v3015_v18 = vpack.c.bf16 %v2487_v32, %v2486_v2 }
 0x51c   :  { %3016 = vmatprep.subr.bf16.mxu0 %v3015_v18 }
 0x51d   :  { %3018 = vmatpush3.bf16.msra.mxu0 %v3015_v18 }
 0x51e   :  { %3020 = vmatprep.subr.bf16.mxu0 %v3019_v15 }
 0x521   :  { %3022 = vmatpush3.bf16.msra.mxu0 %v3019_v15 }
 0x522   :  { %3024 = vmatprep.subr.bf16.mxu0 %v3023_v10 }
 0x525   :  { %3026 = vmatpush3.bf16.msra.mxu0 %v3023_v10 }
 0x5eb   :  { %v2256_v33 = vpop.f32.mrb[16].mxu1 }
 0x5ec   :  { %v2257_v23 = vadd.f32 %v2740_v3, %v2256_v33  ;;  %v2893_v38 = vpop.f32.mrb[17].mxu1 }
 0x5ed   :  { %v2352_v38 = vshrl.u32 %v2351_v21, 7 }
 0x5ee   :  { %v2260_v29 = vmax.f32 %v2257_v23, 0.0  ;;  %v2350_v23 = vunpack.c.0.s8 %v2349_v60 }
 0x5ef   :  { %v2372_v40 = vsub.s32 0, %v2352_v38 }
 0x5f0   :  { %2897 = vmatmul.mubr.msk.f32.vlgmr.msra.gmra.mrb[18].mxu1 %vm2269_vm3, %v2260_v29  ;;  %v2353_v24 = vsub.s32 %v2350_v23, %v2352_v38 }
 0x6c3   :  { %v2339_v22 = vpop.f32.mrb[18].mxu1 }
 0x6c4   :  { %v2340_v62 = vadd.f32 %v2741_v8, %v2339_v22  ;;  %v2898_v3 = vpop.f32.mrb[19].mxu1 }
 0x6c6   :  { %v2343_v33 = vadd.f32 3.0, %v2340_v62 }
 0x6c8   :  { %v2344_v29 = vmax.f32 %v2343_v33, 0.0 }
 0x6ca   :  { %v2345_v55 = vmin.f32 %v2344_v29, 6.0 }
 0x6cc   :  { %v2346_v44 = vmul.f32 0.16666667, %v2345_v55 }
 0x6ce   :  { %v2354_v1 = vrot.slane %v2346_v44, %v2353_v24 }
 0x6d0   :  { %v2355_v16 = vcombine.high %v2354_v1, %v2354_v1  ;;  %v2362_v7 = vrot.slane %v2354_v1, %v2353_v24 }
 0x6d2   :  { %v2373_v26 = vrot.slane %v2362_v7, %v2372_v40  ;;  %v2369_v35 = vrot.slane %v2355_v16, %v2353_v24 }
 0x6d4   :  { %v2380_v42 = vmul.f32 %v2373_v26, %v2081_v56  ;;  %v2381_v49 = vmul.f32 %v2373_v26, %v2082_v4  ;;  %v2382_v51 = vmul.f32 %v2373_v26, %v2083_v25  ;;  %v2383_v2 = vmul.f32 %v2373_v26, %v2084_v13 }
 0x6d5   :  { %v2384_v32 = vmul.f32 %v2373_v26, %v2085_v63  ;;  %v2385_v18 = vmul.f32 %v2373_v26, %v2086_v54  ;;  %v2386_v46 = vmul.f32 %v2373_v26, %v2087_v41  ;;  %v6136_v48 = vmul.f32 %v2373_v26, %v2088_v0 }
 0x6d6   :  { %v2396_v43 = vadd.f32 3.0, %v2380_v42  ;;  %v2397_v56 = vadd.f32 3.0, %v2381_v49  ;;  %v2398_v17 = vadd.f32 3.0, %v2382_v51  ;;  %v2399_v4 = vadd.f32 3.0, %v2383_v2 }
 0x6d7   :  { %v2400_v47 = vadd.f32 3.0, %v2384_v32  ;;  %v2401_v25 = vadd.f32 3.0, %v2385_v18  ;;  %v2402_v5 = vadd.f32 3.0, %v2386_v46  ;;  %v2377_v13 = vrot.slane %v2369_v35, %v2372_v40 }
 0x6d8   :  { %v2412_v20 = vmax.f32 %v2396_v43, 0.0  ;;  %v2413_v63 = vmax.f32 %v2397_v56, 0.0  ;;  %v2414_v15 = vmax.f32 %v2398_v17, 0.0  ;;  %v2415_v53 = vmax.f32 %v2399_v4, 0.0 }
 0x6d9   :  { %v2416_v54 = vmax.f32 %v2400_v47, 0.0  ;;  %v2417_v57 = vmax.f32 %v2401_v25, 0.0  ;;  %v2418_v37 = vmax.f32 %v2402_v5, 0.0  ;;  %v2403_v8 = vadd.f32 3.0, %v6136_v48 }
 0x6da   :  { %v2428_v41 = vmin.f32 %v2412_v20, 6.0  ;;  %v2429_v9 = vmin.f32 %v2413_v63, 6.0  ;;  %v2430_v10 = vmin.f32 %v2414_v15, 6.0  ;;  %v2431_v59 = vmin.f32 %v2415_v53, 6.0 }
 0x6db   :  { %v2432_v0 = vmin.f32 %v2416_v54, 6.0  ;;  %v2388_v22 = vmul.f32 %v2377_v13, %v2089_v28  ;;  %v2433_v62 = vmin.f32 %v2417_v57, 6.0  ;;  %v2434_v3 = vmin.f32 %v2418_v37, 6.0 }
 0x6dc   :  { %v2444_v6 = vmul.f32 0.16666667, %v2428_v41  ;;  %v2445_v60 = vmul.f32 0.16666667, %v2429_v9  ;;  %v2446_v21 = vmul.f32 0.16666667, %v2430_v10  ;;  %v2389_v33 = vmul.f32 %v2377_v13, %v2090_v34 }
 0x6dd   :  { %v2447_v29 = vmul.f32 0.16666667, %v2431_v59  ;;  %v2419_v55 = vmax.f32 %v2403_v8, 0.0  ;;  %v2448_v24 = vmul.f32 0.16666667, %v2432_v0  ;;  %v2404_v1 = vadd.f32 3.0, %v2388_v22 }
 0x6de   :  { %v2460_v23 = vmul.f32 %v2444_v6, %v2380_v42  ;;  %v2461_v38 = vmul.f32 %v2445_v60, %v2381_v49  ;;  %v2462_v44 = vmul.f32 %v2446_v21, %v2382_v51  ;;  %v2405_v40 = vadd.f32 3.0, %v2389_v33 }
 0x6df   :  { %v2390_v16 = vmul.f32 %v2377_v13, %v2091_v52  ;;  %v2449_v36 = vmul.f32 0.16666667, %v2433_v62  ;;  %v2450_v28 = vmul.f32 0.16666667, %v2434_v3  ;;  %v2391_v7 = vmul.f32 %v2377_v13, %v2092_v12  ;;  %v6159_v62 = vld [vmem:[%s6299_s10] ss:$0 sm:$0xff] }
 0x6e0   :  { %2931 = vmatprep.mubr.f32.mxu0 %v2460_v23  ;;  %v2392_v61 = vmul.f32 %v2377_v13, %v2093_v39  ;;  %v2463_v34 = vmul.f32 %v2447_v29, %v2383_v2  ;;  %v2435_v26 = vmin.f32 %v2419_v55, 6.0  ;;  %v2420_v35 = vmax.f32 %v2404_v1, 0.0 }
 0x6e1   :  { %2932 = vmatmul.mubr.f32.vlgmr.msra.gmra.mrb[0].mxu0 %v2461_v38  ;;  %v2406_v42 = vadd.f32 3.0, %v2390_v16  ;;  %v2464_v49 = vmul.f32 %v2448_v24, %v2384_v32  ;;  %v2421_v51 = vmax.f32 %v2405_v40, 0.0  ;;  %v2407_v43 = vadd.f32 3.0, %v2391_v7 }
 0x6e2   :  { %2934 = vmatprep.mubr.f32.mxu0 %v2462_v44  ;;  %v2393_v58 = vmul.f32 %v2377_v13, %v2094_v19  ;;  %v2436_v52 = vmin.f32 %v2420_v35, 6.0  ;;  %v2408_v17 = vadd.f32 3.0, %v2392_v61  ;;  %v2394_v31 = vmul.f32 %v2377_v13, %v2095_v45  ;;  %v3155_v44 = vld [vmem:[%s6290_s0 + $0x8] sm:$0xff]  ;;  %v3157_v35 = vld [vmem:[%s6290_s0 + $0x18] sm:$0xff] }
 0x6e3   :  { %v2422_v56 = vmax.f32 %v2406_v42, 0.0  ;;  %v2465_v12 = vmul.f32 %v2449_v36, %v2385_v18  ;;  %v2466_v30 = vmul.f32 %v2450_v28, %v2386_v46  ;;  %v2451_v39 = vmul.f32 0.16666667, %v2435_v26  ;;  %v3156_v36 = vld [vmem:[%s6290_s0] sm:$0xff] }
 0x6e4   :  { %v2437_v2 = vmin.f32 %v2421_v51, 6.0  ;;  %v2423_v4 = vmax.f32 %v2407_v43, 0.0  ;;  %v2409_v47 = vadd.f32 3.0, %v2393_v58  ;;  %v2395_v32 = vmul.f32 %v2377_v13, %v2096_v11  ;;  %v3158_v43 = vld [vmem:[%s6290_s0 + $0x10] sm:$0xff] }
 0x6e5   :  { %2935 = vmatmul.mubr.f32.gmra.mrb[2].mxu0 %v2463_v34  ;;  %v2452_v25 = vmul.f32 0.16666667, %v2436_v52  ;;  %v2438_v14 = vmin.f32 %v2422_v56, 6.0  ;;  %v2424_v19 = vmax.f32 %v2408_v17, 0.0  ;;  %v2410_v5 = vadd.f32 3.0, %v2394_v31 }
 0x6e6   :  { %2937 = vmatprep.mubr.f32.mxu0 %v2464_v49  ;;  %v2467_v50 = vmul.f32 %v2451_v39, %v6136_v48  ;;  %v2453_v45 = vmul.f32 0.16666667, %v2437_v2  ;;  %v2439_v20 = vmin.f32 %v2423_v4, 6.0  ;;  %v2425_v63 = vmax.f32 %v2409_v47, 0.0  ;;  %v3160_v4 = vld [vmem:[%s6290_s0 + $0x20] sm:$0xff] }
 0x6e7   :  { %v2411_v18 = vadd.f32 3.0, %v2395_v32  ;;  %v2468_v46 = vmul.f32 %v2452_v25, %v2388_v22  ;;  %v2454_v15 = vmul.f32 0.16666667, %v2438_v14  ;;  %v2440_v53 = vmin.f32 %v2424_v19, 6.0 }
 0x6e8   :  { %v2426_v54 = vmax.f32 %v2410_v5, 0.0  ;;  %v2469_v27 = vmul.f32 %v2453_v45, %v2389_v33  ;;  %v2455_v11 = vmul.f32 0.16666667, %v2439_v20  ;;  %v2441_v13 = vmin.f32 %v2425_v63, 6.0  ;;  %v3161_v5 = vld [vmem:[%s6290_s0 + $0x38] sm:$0xff]  ;;  %v3162_v63 = vld [vmem:[%s6290_s0 + $0x30] sm:$0xff] }
 0x6e9   :  { %2938 = vmatmul.mubr.f32.gmra.mrb[4].mxu0 %v2465_v12  ;;  %v2427_v57 = vmax.f32 %v2411_v18, 0.0  ;;  %v2470_v37 = vmul.f32 %v2454_v15, %v2390_v16  ;;  %v2456_v41 = vmul.f32 0.16666667, %v2440_v53  ;;  %v3159_v12 = vld [vmem:[%s6290_s0 + $0x28] sm:$0xff] }
 0x6ea   :  { %2940 = vmatprep.mubr.f32.mxu0 %v2466_v30  ;;  %v2442_v9 = vmin.f32 %v2426_v54, 6.0  ;;  %v2471_v48 = vmul.f32 %v2455_v11, %v2391_v7  ;;  %v2457_v10 = vmul.f32 0.16666667, %v2441_v13 }
 0x6eb   :  { %v2443_v8 = vmin.f32 %v2427_v57, 6.0  ;;  %v2472_v59 = vmul.f32 %v2456_v41, %v2392_v61 }
 0x6ec   :  { %v2458_v0 = vmul.f32 0.16666667, %v2442_v9  ;;  %v2473_v6 = vmul.f32 %v2457_v10, %v2393_v58 }
 0x6ed   :  { %2941 = vmatmul.mubr.f32.gmra.mrb[6].mxu0 %v2467_v50  ;;  %v2459_v60 = vmul.f32 0.16666667, %v2443_v8 }
 0x6ee   :  { %2943 = vmatprep.mubr.f32.mxu0 %v2468_v46  ;;  %v2474_v21 = vmul.f32 %v2458_v0, %v2394_v31 }
 0x6ef   :  { %v2475_v22 = vmul.f32 %v2459_v60, %v2395_v32 }
 0x6f1   :  { %2944 = vmatmul.mubr.f32.gmra.mrb[8].mxu0 %v2469_v27  ;;  %v3163_v27 = vld [vmem:[%s6290_s0 + $0x48] sm:$0xff] }
 0x6f2   :  { %2946 = vmatprep.mubr.f32.mxu0 %v2470_v37  ;;  %v3164_v37 = vld [vmem:[%s6290_s0 + $0x40] sm:$0xff] }
 0x6f5   :  { %2947 = vmatmul.mubr.f32.gmra.mrb[10].mxu0 %v2471_v48 }
 0x6f6   :  { %2949 = vmatprep.mubr.f32.mxu0 %v2472_v59  ;;  %v3165_v59 = vld [vmem:[%s6290_s0 + $0x58] sm:$0xff] }
 0x6f9   :  { %2950 = vmatmul.mubr.f32.gmra.mrb[12].mxu0 %v2473_v6 }
 0x6fa   :  { %2952 = vmatprep.mubr.f32.mxu0 %v2474_v21  ;;  %v3166_v21 = vld [vmem:[%s6290_s0 + $0x50] sm:$0xff] }
 0x6fd   :  { %2953 = vmatmul.mubr.f32.gmra.mrb[14].mxu0 %v2475_v22 }
 0x7b4   :  { %v2933_v3 = vpop.f32.mrb[0].mxu0 }
 0x7b5   :  { %v2571_v33 = vadd.f32 %v2933_v3, %v6159_v62  ;;  %v2565_v23 = vpop.f32.mrb[1].mxu0 }
 0x7b6   :  { %v2566_v38 = vadd.f32 %v6159_v62, %v2565_v23 }
 0x7b7   :  { %v2645_v29 = vmax.f32 %v2571_v33, 0.0 }
 0x7b8   :  { %v2644_v55 = vmax.f32 %v2566_v38, 0.0  ;;  %v2936_v24 = vpop.f32.mrb[2].mxu0 }
 0x7b9   :  { %v2661_v1 = vadd.f32 %v3155_v44, %v2645_v29  ;;  %v2581_v40 = vadd.f32 %v2936_v24, %v6159_v62  ;;  %v2575_v16 = vpop.f32.mrb[3].mxu0  ;;  %v3167_v29 = vld [vmem:[%s6290_s0 + $0x68] sm:$0xff] }
 0x7ba   :  { %v2660_v28 = vadd.f32 %v3156_v36, %v2644_v55  ;;  %v2576_v7 = vadd.f32 %v6159_v62, %v2575_v16 }
 0x7bb   :  { %2677 = vst.msk [vmem:[%s6300_s11 + $0x8] sm:$0xff] %vm69_vm0, %v2661_v1  ;;  %v2647_v61 = vmax.f32 %v2581_v40, 0.0  ;;  %v3168_v1 = vld [vmem:[%s6290_s0 + $0x60] sm:$0xff] }
 0x7bc   :  { %2676 = vst.msk [vmem:[%s6300_s11] sm:$0xff] %vm69_vm0, %v2660_v28  ;;  %v2646_v34 = vmax.f32 %v2576_v7, 0.0  ;;  %v2939_v26 = vpop.f32.mrb[4].mxu0  ;;  %v3169_v7 = vld [vmem:[%s6290_s0 + $0x78] sm:$0xff] }
 0x7bd   :  { %v2663_v42 = vadd.f32 %v3157_v35, %v2647_v61  ;;  %v2591_v49 = vadd.f32 %v2939_v26, %v6159_v62  ;;  %v2585_v51 = vpop.f32.mrb[5].mxu0 }
 0x7be   :  { %v2662_v58 = vadd.f32 %v3158_v43, %v2646_v34  ;;  %v2586_v52 = vadd.f32 %v6159_v62, %v2585_v51 }
 0x7bf   :  { %2679 = vst.msk [vmem:[%s6300_s11 + $0x18] sm:$0xff] %vm69_vm0, %v2663_v42  ;;  %v2649_v56 = vmax.f32 %v2591_v49, 0.0 }
 0x7c0   :  { %2678 = vst.msk [vmem:[%s6300_s11 + $0x10] sm:$0xff] %vm69_vm0, %v2662_v58  ;;  %v2648_v17 = vmax.f32 %v2586_v52, 0.0  ;;  %v2942_v31 = vpop.f32.mrb[6].mxu0 }
 0x7c1   :  { %v2665_v30 = vadd.f32 %v3159_v12, %v2649_v56  ;;  %v2601_v39 = vadd.f32 %v2942_v31, %v6159_v62  ;;  %v2595_v2 = vpop.f32.mrb[7].mxu0 }
 0x7c2   :  { %v2664_v47 = vadd.f32 %v3160_v4, %v2648_v17  ;;  %v2596_v32 = vadd.f32 %v6159_v62, %v2595_v2 }
 0x7c3   :  { %2681 = vst.msk [vmem:[%s6300_s11 + $0x28] sm:$0xff] %vm69_vm0, %v2665_v30  ;;  %v2651_v25 = vmax.f32 %v2601_v39, 0.0 }
 0x7c4   :  { %2680 = vst.msk [vmem:[%s6300_s11 + $0x20] sm:$0xff] %vm69_vm0, %v2664_v47  ;;  %v2650_v14 = vmax.f32 %v2596_v32, 0.0  ;;  %v2945_v19 = vpop.f32.mrb[8].mxu0 }
 0x7c5   :  { %v2667_v50 = vadd.f32 %v3161_v5, %v2651_v25  ;;  %v2611_v45 = vadd.f32 %v2945_v19, %v6159_v62  ;;  %v2605_v20 = vpop.f32.mrb[9].mxu0 }
 0x7c6   :  { %v2666_v18 = vadd.f32 %v3162_v63, %v2650_v14  ;;  %v2606_v46 = vadd.f32 %v6159_v62, %v2605_v20 }
 0x7c7   :  { %2683 = vst.msk [vmem:[%s6300_s11 + $0x38] sm:$0xff] %vm69_vm0, %v2667_v50  ;;  %v2653_v15 = vmax.f32 %v2611_v45, 0.0 }
 0x7c8   :  { %2682 = vst.msk [vmem:[%s6300_s11 + $0x30] sm:$0xff] %vm69_vm0, %v2666_v18  ;;  %v2652_v53 = vmax.f32 %v2606_v46, 0.0  ;;  %v2948_v54 = vpop.f32.mrb[10].mxu0 }
 0x7c9   :  { %v2669_v11 = vadd.f32 %v3163_v27, %v2653_v15  ;;  %v2621_v13 = vadd.f32 %v2948_v54, %v6159_v62  ;;  %v2615_v57 = vpop.f32.mrb[11].mxu0 }
 0x7ca   :  { %v2668_v41 = vadd.f32 %v3164_v37, %v2652_v53  ;;  %v2616_v9 = vadd.f32 %v6159_v62, %v2615_v57 }
 0x7cb   :  { %2685 = vst.msk [vmem:[%s6300_s11 + $0x48] sm:$0xff] %vm69_vm0, %v2669_v11  ;;  %v2655_v48 = vmax.f32 %v2621_v13, 0.0 }
 0x7cc   :  { %2684 = vst.msk [vmem:[%s6300_s11 + $0x40] sm:$0xff] %vm69_vm0, %v2668_v41  ;;  %v2654_v10 = vmax.f32 %v2616_v9, 0.0  ;;  %v2951_v8 = vpop.f32.mrb[12].mxu0 }
 0x7cd   :  { %v2671_v0 = vadd.f32 %v3165_v59, %v2655_v48  ;;  %v2631_v6 = vadd.f32 %v2951_v8, %v6159_v62  ;;  %v2625_v60 = vpop.f32.mrb[13].mxu0 }
 0x7ce   :  { %v2670_v22 = vadd.f32 %v3166_v21, %v2654_v10  ;;  %v2626_v3 = vadd.f32 %v6159_v62, %v2625_v60 }
 0x7cf   :  { %2687 = vst.msk [vmem:[%s6300_s11 + $0x58] sm:$0xff] %vm69_vm0, %v2671_v0  ;;  %v2657_v33 = vmax.f32 %v2631_v6, 0.0 }
 0x7d0   :  { %2686 = vst.msk [vmem:[%s6300_s11 + $0x50] sm:$0xff] %vm69_vm0, %v2670_v22  ;;  %v2656_v23 = vmax.f32 %v2626_v3, 0.0  ;;  %v2954_v38 = vpop.f32.mrb[14].mxu0 }
 0x7d1   :  { %v2673_v55 = vadd.f32 %v3167_v29, %v2657_v33  ;;  %v2641_v24 = vadd.f32 %v2954_v38, %v6159_v62  ;;  %v2635_v44 = vpop.f32.mrb[15].mxu0 }
 0x7d2   :  { %v2672_v40 = vadd.f32 %v3168_v1, %v2656_v23  ;;  %v2636_v16 = vadd.f32 %v6159_v62, %v2635_v44  ;;  %v3170_v62 = vld [vmem:[%s6290_s0 + $0x70] sm:$0xff] }
 0x7d3   :  { %2689 = vst.msk [vmem:[%s6300_s11 + $0x68] sm:$0xff] %vm69_vm0, %v2673_v55  ;;  %v2659_v36 = vmax.f32 %v2641_v24, 0.0 }
 0x7d4   :  { %2688 = vst.msk [vmem:[%s6300_s11 + $0x60] sm:$0xff] %vm69_vm0, %v2672_v40  ;;  %v2658_v28 = vmax.f32 %v2636_v16, 0.0 }
 0x7d5   :  { %v2675_v61 = vadd.f32 %v3169_v7, %v2659_v36 }
 0x7d6   :  { %v2674_v34 = vadd.f32 %v3170_v62, %v2658_v28 }
 0x7d7   :  { %2691 = vst.msk [vmem:[%s6300_s11 + $0x78] sm:$0xff] %vm69_vm0, %v2675_v61 }
 0x7d8   :  { %2690 = vst.msk [vmem:[%s6300_s11 + $0x70] sm:$0xff] %vm69_vm0, %v2674_v34 }

</bundles_post_ra>
